<compile_context>
chip_gen: v7x
topology: tpu7x:2x2x1
jax: 0.10.0
libtpu: 0.0.40
codegen_flags: <defaults>
</compile_context>

<pallas_src>
import functools

import jax
import jax.numpy as jnp
from jax.experimental import pallas as pl
from jax.experimental.pallas import tpu as pltpu

# ----- deterministic "parameters" of RegLoss (its __init__ arguments) -----
LAMBDA_SIM = 1.0
LAMBDA_PENAL = 0.5
LAMBDA_ANA = 1.0
NUM_CLASSES = 2

LNCC_KERNEL_SIZE = 7        # LocalNormalizedCrossCorrelationLoss(kernel_size=7, rectangular)
LNCC_SMOOTH_NR = 0.0
LNCC_SMOOTH_DR = 1e-5
DICE_SMOOTH_NR = 1e-5
DICE_SMOOTH_DR = 1e-5


# --------------------------------------------------------------------------
# host-side operator matrices (values are exactly 0 / 1 / +-0.5)
# --------------------------------------------------------------------------
def _band(n, r):
    """Box-filter band matrix: B[i,j] = 1 if |i-j| <= r (zero-padded 1-D box conv)."""
    i = jnp.arange(n)
    return (jnp.abs(i[:, None] - i[None, :]) <= r).astype(jnp.float32)


def _cdiff(n):
    """Left-mul central-difference matrix: (C @ x)[i] = 0.5*x[i+1] - 0.5*x[i-1]."""
    i = jnp.arange(n)
    return (0.5 * (i[None, :] == i[:, None] + 1).astype(jnp.float32)
            - 0.5 * (i[None, :] == i[:, None] - 1).astype(jnp.float32))


def _interior_mask(D, H, W):
    """(D, H*W) mask of the region surviving MONAI's double spatial_gradient crop."""
    md = ((jnp.arange(D) >= 2) & (jnp.arange(D) <= D - 3)).astype(jnp.float32)
    mh = ((jnp.arange(H) >= 2) & (jnp.arange(H) <= H - 3)).astype(jnp.float32)
    mw = ((jnp.arange(W) >= 2) & (jnp.arange(W) <= W - 3)).astype(jnp.float32)
    m3 = md[:, None, None] * mh[None, :, None] * mw[None, None, :]
    return m3.reshape(D, H * W)


# --------------------------------------------------------------------------
# Warp (MONAI Warp: mode='bilinear', padding_mode='border', align_corners=True)
# TODO(synk): data-dependent trilinear gather kept in plain JAX glue (single
#             flattened jnp.take over all 8 corners per batch).
# --------------------------------------------------------------------------
def warp(image, ddf):
    B, C, D, H, W = image.shape
    gd, gh, gw = jnp.meshgrid(jnp.arange(D, dtype=jnp.float32),
                              jnp.arange(H, dtype=jnp.float32),
                              jnp.arange(W, dtype=jnp.float32), indexing="ij")
    cd = jnp.clip(gd[None] + ddf[:, 0], 0.0, D - 1.0)
    ch = jnp.clip(gh[None] + ddf[:, 1], 0.0, H - 1.0)
    cw = jnp.clip(gw[None] + ddf[:, 2], 0.0, W - 1.0)
    d0 = jnp.floor(cd); h0 = jnp.floor(ch); w0 = jnp.floor(cw)
    td, th, tw = cd - d0, ch - h0, cw - w0
    d0i = d0.astype(jnp.int32); h0i = h0.astype(jnp.int32); w0i = w0.astype(jnp.int32)
    d1i = jnp.minimum(d0i + 1, D - 1)
    h1i = jnp.minimum(h0i + 1, H - 1)
    w1i = jnp.minimum(w0i + 1, W - 1)

    def flat(di, hi, wi):
        return ((di * H + hi) * W + wi).reshape(B, -1)              # (B, DHW)

    idx = jnp.stack([flat(d0i, h0i, w0i), flat(d0i, h0i, w1i),
                     flat(d0i, h1i, w0i), flat(d0i, h1i, w1i),
                     flat(d1i, h0i, w0i), flat(d1i, h0i, w1i),
                     flat(d1i, h1i, w0i), flat(d1i, h1i, w1i)], axis=1)   # (B, 8, DHW)
    td = td.reshape(B, -1); th = th.reshape(B, -1); tw = tw.reshape(B, -1)
    wts = jnp.stack([(1 - td) * (1 - th) * (1 - tw), (1 - td) * (1 - th) * tw,
                     (1 - td) * th * (1 - tw),       (1 - td) * th * tw,
                     td * (1 - th) * (1 - tw),       td * (1 - th) * tw,
                     td * th * (1 - tw),             td * th * tw], axis=1)  # (B, 8, DHW)

    img_flat = image.reshape(B, C, D * H * W)

    def one(img_b, idx_b, w_b):
        g = jnp.take(img_b, idx_b.reshape(-1), axis=1, mode="clip")
        g = g.reshape(C, 8, -1)
        return jnp.sum(g * w_b[None], axis=1)                        # (C, DHW)

    out = jax.vmap(one)(img_flat, idx, wts)
    return out.reshape(B, C, D, H, W)


# --------------------------------------------------------------------------
# Fused LNCC + Dice kernel (one grid step per batch element)
# --------------------------------------------------------------------------
def _sim_dice_kernel(p_ref, t_ref, ps_ref, ts_ref, bd5_ref, bhw_ref,
                     ncc_ref, dice_ref, *, D, kvol):
    p = p_ref[0]                    # (D, H*W)   warped moving image
    t = t_ref[0]                    # (D, H*W)   target image
    bd5 = bd5_ref[...]              # (5D, 5D)   kron(I_5, box_D)  -- left-mul
    bhw = bhw_ref[...]              # (HW, HW)   kron(box_H, box_W) -- right-mul

    # stack the five moments along sublanes -> 2 large MXU matmuls total
    stack = jnp.concatenate([t, p, t * t, p * p, t * p], axis=0)     # (5D, HW), f32
    s = jnp.dot(jnp.dot(bd5, stack, preferred_element_type=jnp.float32),
                bhw, preferred_element_type=jnp.float32)

    t_sum = s[0 * D:1 * D]
    p_sum = s[1 * D:2 * D]
    t2_sum = s[2 * D:3 * D]
    p2_sum = s[3 * D:4 * D]
    tp_sum = s[4 * D:5 * D]

    t_avg = t_sum * (1.0 / kvol)
    p_avg = p_sum * (1.0 / kvol)
    cross = tp_sum - p_avg * t_sum            # (no clamp on cross, matching MONAI)
    t_var = jnp.maximum(t2_sum - t_avg * t_sum, 0.0)
    p_var = jnp.maximum(p2_sum - p_avg * p_sum, 0.0)
    ncc = (cross * cross + LNCC_SMOOTH_NR) / (t_var * p_var + LNCC_SMOOTH_DR)
    ncc_ref[...] = jnp.broadcast_to(jnp.sum(ncc), (1, 1, 1))

    # Dice on the foreground channel only (include_background=False, num_classes=2)
    ps = ps_ref[0]                  # (D, H*W)   warped seg, channel 1
    ts = ts_ref[0]                  # (D, H*W)   seg1, channel 1
    inter = jnp.sum(ps * ts)
    denom = jnp.sum(ts) + jnp.sum(ps)
    dice_ref[...] = jnp.broadcast_to(
        1.0 - (2.0 * inter + DICE_SMOOTH_NR) / (denom + DICE_SMOOTH_DR), (1, 1, 1))


def sim_and_dice_losses(warped_img, target_img, warped_seg_fg, seg1_fg):
    B, C, D, H, W = warped_img.shape
    assert C == 1
    HW = H * W
    r = (LNCC_KERNEL_SIZE - 1) // 2
    bd5 = jnp.kron(jnp.eye(5, dtype=jnp.float32), _band(D, r))       # (5D, 5D)
    bhw = jnp.kron(_band(H, r), _band(W, r))                         # (HW, HW)
    kvol = float(LNCC_KERNEL_SIZE ** 3)

    p2d = warped_img.reshape(B, D, HW).astype(jnp.float32)
    t2d = target_img.reshape(B, D, HW).astype(jnp.float32)
    ps2d = warped_seg_fg.reshape(B, D, HW).astype(jnp.float32)
    ts2d = seg1_fg.reshape(B, D, HW).astype(jnp.float32)

    ncc_sum, dice_b = pl.pallas_call(
        functools.partial(_sim_dice_kernel, D=D, kvol=kvol),
        out_shape=(jax.ShapeDtypeStruct((B, 1, 1), jnp.float32),
                   jax.ShapeDtypeStruct((B, 1, 1), jnp.float32)),
        grid=(B,),
        in_specs=[
            pl.BlockSpec((1, D, HW), lambda b: (b, 0, 0)),
            pl.BlockSpec((1, D, HW), lambda b: (b, 0, 0)),
            pl.BlockSpec((1, D, HW), lambda b: (b, 0, 0)),
            pl.BlockSpec((1, D, HW), lambda b: (b, 0, 0)),
            pl.BlockSpec((5 * D, 5 * D), lambda b: (0, 0)),
            pl.BlockSpec((HW, HW), lambda b: (0, 0)),
        ],
        out_specs=(pl.BlockSpec((1, 1, 1), lambda b: (b, 0, 0)),
                   pl.BlockSpec((1, 1, 1), lambda b: (b, 0, 0))),
        compiler_params=pltpu.CompilerParams(dimension_semantics=("parallel",)),
    )(p2d, t2d, ps2d, ts2d, bd5, bhw)

    sim = -(jnp.sum(ncc_sum) / float(B * C * D * H * W))   # LNCC: mean over volume, negated
    dice = jnp.mean(dice_b)                                # Dice: mean over (B, 1)
    return sim, dice


# --------------------------------------------------------------------------
# Bending energy (MONAI BendingEnergyLoss(normalize=True, reduction='mean'))
# --------------------------------------------------------------------------
def _bending_kernel(x_ref, ad_ref, rhw_ref, mw_ref, o_ref, *, D, H, W, HW):
    x = x_ref[0]                    # (3D, HW)  all 3 displacement channels stacked
    ad = ad_ref[...]                # (3D, 3D)  kron(I_3, cdiff_D) -- left-mul
    rhw = rhw_ref[...]              # (HW, 2HW) [cdiff_H | cdiff_W] -- right-mul
    mw = mw_ref[...]                # (3D, HW)  interior mask / size_c^2 per channel row

    # first derivatives (fused H|W operator -> one large matmul)
    gD = jnp.dot(ad, x, preferred_element_type=jnp.float32)          # (3D, HW)
    ghw = jnp.dot(x, rhw, preferred_element_type=jnp.float32)        # (3D, 2HW)
    gH = ghw[:, :HW]
    gW = ghw[:, HW:]

    # second derivatives: stack the first derivatives, apply the fused operator once
    dDD = jnp.dot(ad, gD, preferred_element_type=jnp.float32)        # (3D, HW)
    G = jnp.concatenate([gD, gH, gW], axis=0)                        # (9D, HW)
    S = jnp.dot(G, rhw, preferred_element_type=jnp.float32)          # (9D, 2HW)
    n = 3 * D
    dDH = S[0 * n:1 * n, :HW]
    dDW = S[0 * n:1 * n, HW:]
    dHH = S[1 * n:2 * n, :HW]
    dHW = S[1 * n:2 * n, HW:]
    dWW = S[2 * n:3 * n, HW:]

    def msum(a):
        return jnp.sum(mw * a * a)

    # MONAI normalize=True: first-order gradient along dim1 is scaled by
    # (size[dim1] / size[channel]) once; second derivatives get no extra scale.
    energy = (float(D * D) * (msum(dDD) + 2.0 * msum(dDH) + 2.0 * msum(dDW))
              + float(H * H) * (msum(dHH) + 2.0 * msum(dHW))
              + float(W * W) * msum(dWW))
    o_ref[...] = jnp.broadcast_to(energy, (1, 1, 1))


def bending_energy_loss(disp):
    B, C, D, H, W = disp.shape
    assert C == 3 and min(D, H, W) > 4
    HW = H * W
    ad = jnp.kron(jnp.eye(3, dtype=jnp.float32), _cdiff(D))                 # (3D, 3D)
    rh = jnp.kron(_cdiff(H).T, jnp.eye(W, dtype=jnp.float32))               # (HW, HW)
    rw = jnp.kron(jnp.eye(H, dtype=jnp.float32), _cdiff(W).T)               # (HW, HW)
    rhw = jnp.concatenate([rh, rw], axis=1)                                 # (HW, 2HW)

    mask = _interior_mask(D, H, W)                                          # (D, HW)
    inv_sz2 = jnp.array([1.0 / (D * D), 1.0 / (H * H), 1.0 / (W * W)], jnp.float32)
    mw = (inv_sz2[:, None, None] * mask[None]).reshape(3 * D, HW)           # (3D, HW)

    x2d = disp.reshape(B, 3 * D, HW).astype(jnp.float32)

    per_b = pl.pallas_call(
        functools.partial(_bending_kernel, D=D, H=H, W=W, HW=HW),
        out_shape=jax.ShapeDtypeStruct((B, 1, 1), jnp.float32),
        grid=(B,),
        in_specs=[
            pl.BlockSpec((1, 3 * D, HW), lambda b: (b, 0, 0)),
            pl.BlockSpec((3 * D, 3 * D), lambda b: (0, 0)),
            pl.BlockSpec((HW, 2 * HW), lambda b: (0, 0)),
            pl.BlockSpec((3 * D, HW), lambda b: (0, 0)),
        ],
        out_specs=pl.BlockSpec((1, 1, 1), lambda b: (b, 0, 0)),
        compiler_params=pltpu.CompilerParams(dimension_semantics=("parallel",)),
    )(x2d, ad, rhw, mw)

    n_valid = B * C * (D - 4) * (H - 4) * (W - 4)
    return jnp.sum(per_b) / float(n_valid)


# --------------------------------------------------------------------------
# RegLoss.forward
# --------------------------------------------------------------------------
def reg_loss(img_pair, disp, seg1, seg2):
    moving_img = img_pair[:, 1:2]
    target_img = img_pair[:, 0:1]
    warped_img = warp(moving_img, disp)
    warped_seg = warp(seg2, disp)
    sim, dice = sim_and_dice_losses(warped_img, target_img,
                                    warped_seg[:, 1], seg1[:, 1])
    penal = bending_energy_loss(disp)
    return LAMBDA_SIM * sim + LAMBDA_PENAL * penal + LAMBDA_ANA * dice


if __name__ == "__main__":
    B, D, H, W = 2, 16, 16, 16
    key = jax.random.PRNGKey(0)
    k1, k2, k3, k4 = jax.random.split(key, 4)
    img_pair = jax.random.normal(k1, (B, 2, D, H, W), jnp.float32)
    disp = 0.5 * jax.random.normal(k2, (B, 3, D, H, W), jnp.float32)
    m1 = (jax.random.uniform(k3, (B, 1, D, H, W)) > 0.5).astype(jnp.float32)
    m2 = (jax.random.uniform(k4, (B, 1, D, H, W)) > 0.5).astype(jnp.float32)
    seg1 = jnp.concatenate([1.0 - m1, m1], axis=1)   # one-hot, NUM_CLASSES = 2
    seg2 = jnp.concatenate([1.0 - m2, m2], axis=1)

    loss = jax.jit(reg_loss)(img_pair, disp, seg1, seg2)
    loss = jax.block_until_ready(loss)
    assert loss.shape == () and bool(jnp.isfinite(loss))
    print("KERNEL_OK")
</pallas_src>

<mosaic_0001>
module attributes {stable_mosaic.version = 11 : i64} {
  func.func @_sim_dice_kernel(%arg0: i32, %arg1: memref<1x16x256xf32, #tpu.memory_space<vmem>>, %arg2: memref<1x16x256xf32, #tpu.memory_space<vmem>>, %arg3: memref<1x16x256xf32, #tpu.memory_space<vmem>>, %arg4: memref<1x16x256xf32, #tpu.memory_space<vmem>>, %arg5: memref<80x80xf32, #tpu.memory_space<vmem>>, %arg6: memref<256x256xf32, #tpu.memory_space<vmem>>, %arg7: memref<1x1x1xf32, #tpu.memory_space<vmem>>, %arg8: memref<1x1x1xf32, #tpu.memory_space<vmem>>) attributes {dimension_semantics = [#tpu.dimension_semantics<parallel>], iteration_bounds = array<i64: 2>, scalar_prefetch = 0 : i64, scratch_operands = 0 : i64, tpu.core_type = #tpu.core_type<tc>, window_params = [{transform_indices = @transform_0, window_bounds = array<i64: 1, 16, 256>}, {transform_indices = @transform_1, window_bounds = array<i64: 1, 16, 256>}, {transform_indices = @transform_2, window_bounds = array<i64: 1, 16, 256>}, {transform_indices = @transform_3, window_bounds = array<i64: 1, 16, 256>}, {pipeline_mode = #tpu.pipeline_mode<synchronous>, transform_indices = @transform_4, window_bounds = array<i64: 80, 80>}, {pipeline_mode = #tpu.pipeline_mode<synchronous>, transform_indices = @transform_5, window_bounds = array<i64: 256, 256>}, {transform_indices = @transform_6, window_bounds = array<i64: 1, 1, 1>}, {transform_indices = @transform_7, window_bounds = array<i64: 1, 1, 1>}]} {
    %c0 = arith.constant 0 : index
    %c0_0 = arith.constant 0 : index
    %c0_1 = arith.constant 0 : index
    %0 = vector.load %arg1[%c0, %c0_0, %c0_1] : memref<1x16x256xf32, #tpu.memory_space<vmem>>, vector<1x16x256xf32>
    %1 = vector.shape_cast %0 : vector<1x16x256xf32> to vector<16x256xf32>
    %c0_2 = arith.constant 0 : index
    %c0_3 = arith.constant 0 : index
    %c0_4 = arith.constant 0 : index
    %2 = vector.load %arg2[%c0_2, %c0_3, %c0_4] : memref<1x16x256xf32, #tpu.memory_space<vmem>>, vector<1x16x256xf32>
    %3 = vector.shape_cast %2 : vector<1x16x256xf32> to vector<16x256xf32>
    %c0_5 = arith.constant 0 : index
    %c0_6 = arith.constant 0 : index
    %4 = vector.load %arg5[%c0_5, %c0_6] : memref<80x80xf32, #tpu.memory_space<vmem>>, vector<80x80xf32>
    %c0_7 = arith.constant 0 : index
    %c0_8 = arith.constant 0 : index
    %5 = vector.load %arg6[%c0_7, %c0_8] : memref<256x256xf32, #tpu.memory_space<vmem>>, vector<256x256xf32>
    %6 = arith.mulf %3, %3 : vector<16x256xf32>
    %7 = arith.mulf %1, %1 : vector<16x256xf32>
    %8 = arith.mulf %3, %1 : vector<16x256xf32>
    %9 = tpu.concatenate %3, %1, %6, %7, %8 in 0 : vector<16x256xf32>, vector<16x256xf32>, vector<16x256xf32>, vector<16x256xf32>, vector<16x256xf32> -> vector<80x256xf32>
    %cst = arith.constant dense<0.000000e+00> : vector<80x256xf32>
    %10 = tpu.matmul %4, %9, %cst {dimension_numbers = #tpu.dot_dimension_numbers<[1], [0], [0], [1], [0, 0, 1, 1], [], []>} : vector<80x80xf32>, vector<80x256xf32>, vector<80x256xf32> -> vector<80x256xf32>
    %cst_9 = arith.constant dense<0.000000e+00> : vector<80x256xf32>
    %11 = tpu.matmul %10, %5, %cst_9 {dimension_numbers = #tpu.dot_dimension_numbers<[1], [0], [0], [1], [0, 0, 1, 1], [], []>} : vector<80x256xf32>, vector<256x256xf32>, vector<80x256xf32> -> vector<80x256xf32>
    %12 = vector.extract_strided_slice %11 {offsets = [0, 0], sizes = [16, 256], strides = [1, 1]} : vector<80x256xf32> to vector<16x256xf32>
    %13 = vector.extract_strided_slice %11 {offsets = [16, 0], sizes = [16, 256], strides = [1, 1]} : vector<80x256xf32> to vector<16x256xf32>
    %14 = vector.extract_strided_slice %11 {offsets = [32, 0], sizes = [16, 256], strides = [1, 1]} : vector<80x256xf32> to vector<16x256xf32>
    %15 = vector.extract_strided_slice %11 {offsets = [48, 0], sizes = [16, 256], strides = [1, 1]} : vector<80x256xf32> to vector<16x256xf32>
    %16 = vector.extract_strided_slice %11 {offsets = [64, 0], sizes = [16, 256], strides = [1, 1]} : vector<80x256xf32> to vector<16x256xf32>
    %cst_10 = arith.constant 0.002915452 : f32
    %17 = vector.broadcast %cst_10 : f32 to vector<16x256xf32>
    %18 = arith.mulf %12, %17 : vector<16x256xf32>
    %cst_11 = arith.constant 0.002915452 : f32
    %19 = vector.broadcast %cst_11 : f32 to vector<16x256xf32>
    %20 = arith.mulf %13, %19 : vector<16x256xf32>
    %21 = arith.mulf %20, %12 : vector<16x256xf32>
    %22 = arith.subf %16, %21 : vector<16x256xf32>
    %23 = arith.mulf %18, %12 : vector<16x256xf32>
    %24 = arith.subf %14, %23 : vector<16x256xf32>
    %cst_12 = arith.constant 0.000000e+00 : f32
    %25 = vector.broadcast %cst_12 : f32 to vector<16x256xf32>
    %26 = arith.maximumf %24, %25 : vector<16x256xf32>
    %27 = arith.mulf %20, %13 : vector<16x256xf32>
    %28 = arith.subf %15, %27 : vector<16x256xf32>
    %cst_13 = arith.constant 0.000000e+00 : f32
    %29 = vector.broadcast %cst_13 : f32 to vector<16x256xf32>
    %30 = arith.maximumf %28, %29 : vector<16x256xf32>
    %31 = arith.mulf %22, %22 : vector<16x256xf32>
    %cst_14 = arith.constant 0.000000e+00 : f32
    %32 = vector.broadcast %cst_14 : f32 to vector<16x256xf32>
    %33 = arith.addf %31, %32 : vector<16x256xf32>
    %34 = arith.mulf %26, %30 : vector<16x256xf32>
    %cst_15 = arith.constant 9.99999974E-6 : f32
    %35 = vector.broadcast %cst_15 : f32 to vector<16x256xf32>
    %36 = arith.addf %34, %35 : vector<16x256xf32>
    %37 = arith.divf %33, %36 : vector<16x256xf32>
    %38 = vector.shape_cast %37 : vector<16x256xf32> to vector<1x16x256xf32>
    %cst_16 = arith.constant dense<0.000000e+00> : vector<1xf32>
    %39 = vector.multi_reduction <add>, %38, %cst_16 [1, 2] : vector<1x16x256xf32> to vector<1xf32>
    %40 = vector.shape_cast %39 : vector<1xf32> to vector<1x1x1xf32>
    %41 = vector.extract %40[0, 0, 0] : f32 from vector<1x1x1xf32>
    %42 = vector.broadcast %41 : f32 to vector<1x1x1xf32>
    %c0_17 = arith.constant 0 : index
    %c0_18 = arith.constant 0 : index
    %c0_19 = arith.constant 0 : index
    %43 = vector.load %arg7[%c0_17, %c0_18, %c0_19] : memref<1x1x1xf32, #tpu.memory_space<vmem>>, vector<1x1x1xf32>
    tpu.vector_store %arg7[%c0_17, %c0_18, %c0_19], %42 {strides = array<i32>} : memref<1x1x1xf32, #tpu.memory_space<vmem>>, vector<1x1x1xf32>,
    %c0_20 = arith.constant 0 : index
    %c0_21 = arith.constant 0 : index
    %c0_22 = arith.constant 0 : index
    %44 = vector.load %arg3[%c0_20, %c0_21, %c0_22] : memref<1x16x256xf32, #tpu.memory_space<vmem>>, vector<1x16x256xf32>
    %45 = vector.shape_cast %44 : vector<1x16x256xf32> to vector<16x256xf32>
    %c0_23 = arith.constant 0 : index
    %c0_24 = arith.constant 0 : index
    %c0_25 = arith.constant 0 : index
    %46 = vector.load %arg4[%c0_23, %c0_24, %c0_25] : memref<1x16x256xf32, #tpu.memory_space<vmem>>, vector<1x16x256xf32>
    %47 = vector.shape_cast %46 : vector<1x16x256xf32> to vector<16x256xf32>
    %48 = arith.mulf %45, %47 : vector<16x256xf32>
    %49 = vector.shape_cast %48 : vector<16x256xf32> to vector<1x16x256xf32>
    %cst_26 = arith.constant dense<0.000000e+00> : vector<1xf32>
    %50 = vector.multi_reduction <add>, %49, %cst_26 [1, 2] : vector<1x16x256xf32> to vector<1xf32>
    %51 = vector.shape_cast %50 : vector<1xf32> to vector<1x1x1xf32>
    %52 = vector.extract %51[0, 0, 0] : f32 from vector<1x1x1xf32>
    %53 = vector.shape_cast %47 : vector<16x256xf32> to vector<1x16x256xf32>
    %cst_27 = arith.constant dense<0.000000e+00> : vector<1xf32>
    %54 = vector.multi_reduction <add>, %53, %cst_27 [1, 2] : vector<1x16x256xf32> to vector<1xf32>
    %55 = vector.shape_cast %54 : vector<1xf32> to vector<1x1x1xf32>
    %56 = vector.extract %55[0, 0, 0] : f32 from vector<1x1x1xf32>
    %57 = vector.shape_cast %45 : vector<16x256xf32> to vector<1x16x256xf32>
    %cst_28 = arith.constant dense<0.000000e+00> : vector<1xf32>
    %58 = vector.multi_reduction <add>, %57, %cst_28 [1, 2] : vector<1x16x256xf32> to vector<1xf32>
    %59 = vector.shape_cast %58 : vector<1xf32> to vector<1x1x1xf32>
    %60 = vector.extract %59[0, 0, 0] : f32 from vector<1x1x1xf32>
    %61 = arith.addf %56, %60 : f32
    %cst_29 = arith.constant 2.000000e+00 : f32
    %62 = arith.mulf %cst_29, %52 : f32
    %cst_30 = arith.constant 9.99999974E-6 : f32
    %63 = arith.addf %62, %cst_30 : f32
    %cst_31 = arith.constant 9.99999974E-6 : f32
    %64 = arith.addf %61, %cst_31 : f32
    %65 = arith.divf %63, %64 : f32
    %cst_32 = arith.constant 1.000000e+00 : f32
    %66 = arith.subf %cst_32, %65 : f32
    %67 = vector.broadcast %66 : f32 to vector<1x1x1xf32>
    %c0_33 = arith.constant 0 : index
    %c0_34 = arith.constant 0 : index
    %c0_35 = arith.constant 0 : index
    %68 = vector.load %arg8[%c0_33, %c0_34, %c0_35] : memref<1x1x1xf32, #tpu.memory_space<vmem>>, vector<1x1x1xf32>
    tpu.vector_store %arg8[%c0_33, %c0_34, %c0_35], %67 {strides = array<i32>} : memref<1x1x1xf32, #tpu.memory_space<vmem>>, vector<1x1x1xf32>,
    return
  }
  func.func @transform_0(%arg0: i32) -> (i32, i32, i32) {
    %c0_i32 = arith.constant 0 : i32
    %c0_i32_0 = arith.constant 0 : i32
    %c0_i32_1 = arith.constant 0 : i32
    return %arg0, %c0_i32, %c0_i32_0 : i32, i32, i32
  }
  func.func @transform_1(%arg0: i32) -> (i32, i32, i32) {
    %c0_i32 = arith.constant 0 : i32
    %c0_i32_0 = arith.constant 0 : i32
    %c0_i32_1 = arith.constant 0 : i32
    return %arg0, %c0_i32, %c0_i32_0 : i32, i32, i32
  }
  func.func @transform_2(%arg0: i32) -> (i32, i32, i32) {
    %c0_i32 = arith.constant 0 : i32
    %c0_i32_0 = arith.constant 0 : i32
    %c0_i32_1 = arith.constant 0 : i32
    return %arg0, %c0_i32, %c0_i32_0 : i32, i32, i32
  }
  func.func @transform_3(%arg0: i32) -> (i32, i32, i32) {
    %c0_i32 = arith.constant 0 : i32
    %c0_i32_0 = arith.constant 0 : i32
    %c0_i32_1 = arith.constant 0 : i32
    return %arg0, %c0_i32, %c0_i32_0 : i32, i32, i32
  }
  func.func @transform_4(%arg0: i32) -> (i32, i32) {
    %c0_i32 = arith.constant 0 : i32
    %c0_i32_0 = arith.constant 0 : i32
    %c0_i32_1 = arith.constant 0 : i32
    return %c0_i32, %c0_i32_0 : i32, i32
  }
  func.func @transform_5(%arg0: i32) -> (i32, i32) {
    %c0_i32 = arith.constant 0 : i32
    %c0_i32_0 = arith.constant 0 : i32
    %c0_i32_1 = arith.constant 0 : i32
    return %c0_i32, %c0_i32_0 : i32, i32
  }
  func.func @transform_6(%arg0: i32) -> (i32, i32, i32) {
    %c0_i32 = arith.constant 0 : i32
    %c0_i32_0 = arith.constant 0 : i32
    %c0_i32_1 = arith.constant 0 : i32
    return %arg0, %c0_i32, %c0_i32_0 : i32, i32, i32
  }
  func.func @transform_7(%arg0: i32) -> (i32, i32, i32) {
    %c0_i32 = arith.constant 0 : i32
    %c0_i32_0 = arith.constant 0 : i32
    %c0_i32_1 = arith.constant 0 : i32
    return %arg0, %c0_i32, %c0_i32_0 : i32, i32, i32
  }
}

module attributes {stable_mosaic.version = 11 : i64} {
  func.func @_bending_kernel(%arg0: i32, %arg1: memref<1x48x256xf32, #tpu.memory_space<vmem>>, %arg2: memref<48x48xf32, #tpu.memory_space<vmem>>, %arg3: memref<256x512xf32, #tpu.memory_space<vmem>>, %arg4: memref<48x256xf32, #tpu.memory_space<vmem>>, %arg5: memref<1x1x1xf32, #tpu.memory_space<vmem>>) attributes {dimension_semantics = [#tpu.dimension_semantics<parallel>], iteration_bounds = array<i64: 2>, scalar_prefetch = 0 : i64, scratch_operands = 0 : i64, tpu.core_type = #tpu.core_type<tc>, window_params = [{transform_indices = @transform_0, window_bounds = array<i64: 1, 48, 256>}, {pipeline_mode = #tpu.pipeline_mode<synchronous>, transform_indices = @transform_1, window_bounds = array<i64: 48, 48>}, {pipeline_mode = #tpu.pipeline_mode<synchronous>, transform_indices = @transform_2, window_bounds = array<i64: 256, 512>}, {pipeline_mode = #tpu.pipeline_mode<synchronous>, transform_indices = @transform_3, window_bounds = array<i64: 48, 256>}, {transform_indices = @transform_4, window_bounds = array<i64: 1, 1, 1>}]} {
    %c0 = arith.constant 0 : index
    %c0_0 = arith.constant 0 : index
    %c0_1 = arith.constant 0 : index
    %0 = vector.load %arg1[%c0, %c0_0, %c0_1] : memref<1x48x256xf32, #tpu.memory_space<vmem>>, vector<1x48x256xf32>
    %1 = vector.shape_cast %0 : vector<1x48x256xf32> to vector<48x256xf32>
    %c0_2 = arith.constant 0 : index
    %c0_3 = arith.constant 0 : index
    %2 = vector.load %arg2[%c0_2, %c0_3] : memref<48x48xf32, #tpu.memory_space<vmem>>, vector<48x48xf32>
    %c0_4 = arith.constant 0 : index
    %c0_5 = arith.constant 0 : index
    %3 = vector.load %arg3[%c0_4, %c0_5] : memref<256x512xf32, #tpu.memory_space<vmem>>, vector<256x512xf32>
    %c0_6 = arith.constant 0 : index
    %c0_7 = arith.constant 0 : index
    %4 = vector.load %arg4[%c0_6, %c0_7] : memref<48x256xf32, #tpu.memory_space<vmem>>, vector<48x256xf32>
    %cst = arith.constant dense<0.000000e+00> : vector<48x256xf32>
    %5 = tpu.matmul %2, %1, %cst {dimension_numbers = #tpu.dot_dimension_numbers<[1], [0], [0], [1], [0, 0, 1, 1], [], []>} : vector<48x48xf32>, vector<48x256xf32>, vector<48x256xf32> -> vector<48x256xf32>
    %cst_8 = arith.constant dense<0.000000e+00> : vector<48x512xf32>
    %6 = tpu.matmul %1, %3, %cst_8 {dimension_numbers = #tpu.dot_dimension_numbers<[1], [0], [0], [1], [0, 0, 1, 1], [], []>} : vector<48x256xf32>, vector<256x512xf32>, vector<48x512xf32> -> vector<48x512xf32>
    %7 = vector.extract_strided_slice %6 {offsets = [0, 0], sizes = [48, 256], strides = [1, 1]} : vector<48x512xf32> to vector<48x256xf32>
    %8 = vector.extract_strided_slice %6 {offsets = [0, 256], sizes = [48, 256], strides = [1, 1]} : vector<48x512xf32> to vector<48x256xf32>
    %cst_9 = arith.constant dense<0.000000e+00> : vector<48x256xf32>
    %9 = tpu.matmul %2, %5, %cst_9 {dimension_numbers = #tpu.dot_dimension_numbers<[1], [0], [0], [1], [0, 0, 1, 1], [], []>} : vector<48x48xf32>, vector<48x256xf32>, vector<48x256xf32> -> vector<48x256xf32>
    %10 = tpu.concatenate %5, %7, %8 in 0 : vector<48x256xf32>, vector<48x256xf32>, vector<48x256xf32> -> vector<144x256xf32>
    %cst_10 = arith.constant dense<0.000000e+00> : vector<144x512xf32>
    %11 = tpu.matmul %10, %3, %cst_10 {dimension_numbers = #tpu.dot_dimension_numbers<[1], [0], [0], [1], [0, 0, 1, 1], [], []>} : vector<144x256xf32>, vector<256x512xf32>, vector<144x512xf32> -> vector<144x512xf32>
    %12 = vector.extract_strided_slice %11 {offsets = [0, 0], sizes = [48, 256], strides = [1, 1]} : vector<144x512xf32> to vector<48x256xf32>
    %13 = vector.extract_strided_slice %11 {offsets = [0, 256], sizes = [48, 256], strides = [1, 1]} : vector<144x512xf32> to vector<48x256xf32>
    %14 = vector.extract_strided_slice %11 {offsets = [48, 0], sizes = [48, 256], strides = [1, 1]} : vector<144x512xf32> to vector<48x256xf32>
    %15 = vector.extract_strided_slice %11 {offsets = [48, 256], sizes = [48, 256], strides = [1, 1]} : vector<144x512xf32> to vector<48x256xf32>
    %16 = vector.extract_strided_slice %11 {offsets = [96, 256], sizes = [48, 256], strides = [1, 1]} : vector<144x512xf32> to vector<48x256xf32>
    %17 = arith.mulf %4, %9 : vector<48x256xf32>
    %18 = arith.mulf %17, %9 : vector<48x256xf32>
    %19 = vector.shape_cast %18 : vector<48x256xf32> to vector<1x48x256xf32>
    %cst_11 = arith.constant dense<0.000000e+00> : vector<1xf32>
    %20 = vector.multi_reduction <add>, %19, %cst_11 [1, 2] : vector<1x48x256xf32> to vector<1xf32>
    %21 = vector.shape_cast %20 : vector<1xf32> to vector<1x1x1xf32>
    %22 = vector.extract %21[0, 0, 0] : f32 from vector<1x1x1xf32>
    %23 = arith.mulf %4, %12 : vector<48x256xf32>
    %24 = arith.mulf %23, %12 : vector<48x256xf32>
    %25 = vector.shape_cast %24 : vector<48x256xf32> to vector<1x48x256xf32>
    %cst_12 = arith.constant dense<0.000000e+00> : vector<1xf32>
    %26 = vector.multi_reduction <add>, %25, %cst_12 [1, 2] : vector<1x48x256xf32> to vector<1xf32>
    %27 = vector.shape_cast %26 : vector<1xf32> to vector<1x1x1xf32>
    %28 = vector.extract %27[0, 0, 0] : f32 from vector<1x1x1xf32>
    %cst_13 = arith.constant 2.000000e+00 : f32
    %29 = arith.mulf %cst_13, %28 : f32
    %30 = arith.addf %22, %29 : f32
    %31 = arith.mulf %4, %13 : vector<48x256xf32>
    %32 = arith.mulf %31, %13 : vector<48x256xf32>
    %33 = vector.shape_cast %32 : vector<48x256xf32> to vector<1x48x256xf32>
    %cst_14 = arith.constant dense<0.000000e+00> : vector<1xf32>
    %34 = vector.multi_reduction <add>, %33, %cst_14 [1, 2] : vector<1x48x256xf32> to vector<1xf32>
    %35 = vector.shape_cast %34 : vector<1xf32> to vector<1x1x1xf32>
    %36 = vector.extract %35[0, 0, 0] : f32 from vector<1x1x1xf32>
    %cst_15 = arith.constant 2.000000e+00 : f32
    %37 = arith.mulf %cst_15, %36 : f32
    %38 = arith.addf %30, %37 : f32
    %cst_16 = arith.constant 2.560000e+02 : f32
    %39 = arith.mulf %cst_16, %38 : f32
    %40 = arith.mulf %4, %14 : vector<48x256xf32>
    %41 = arith.mulf %40, %14 : vector<48x256xf32>
    %42 = vector.shape_cast %41 : vector<48x256xf32> to vector<1x48x256xf32>
    %cst_17 = arith.constant dense<0.000000e+00> : vector<1xf32>
    %43 = vector.multi_reduction <add>, %42, %cst_17 [1, 2] : vector<1x48x256xf32> to vector<1xf32>
    %44 = vector.shape_cast %43 : vector<1xf32> to vector<1x1x1xf32>
    %45 = vector.extract %44[0, 0, 0] : f32 from vector<1x1x1xf32>
    %46 = arith.mulf %4, %15 : vector<48x256xf32>
    %47 = arith.mulf %46, %15 : vector<48x256xf32>
    %48 = vector.shape_cast %47 : vector<48x256xf32> to vector<1x48x256xf32>
    %cst_18 = arith.constant dense<0.000000e+00> : vector<1xf32>
    %49 = vector.multi_reduction <add>, %48, %cst_18 [1, 2] : vector<1x48x256xf32> to vector<1xf32>
    %50 = vector.shape_cast %49 : vector<1xf32> to vector<1x1x1xf32>
    %51 = vector.extract %50[0, 0, 0] : f32 from vector<1x1x1xf32>
    %cst_19 = arith.constant 2.000000e+00 : f32
    %52 = arith.mulf %cst_19, %51 : f32
    %53 = arith.addf %45, %52 : f32
    %cst_20 = arith.constant 2.560000e+02 : f32
    %54 = arith.mulf %cst_20, %53 : f32
    %55 = arith.addf %39, %54 : f32
    %56 = arith.mulf %4, %16 : vector<48x256xf32>
    %57 = arith.mulf %56, %16 : vector<48x256xf32>
    %58 = vector.shape_cast %57 : vector<48x256xf32> to vector<1x48x256xf32>
    %cst_21 = arith.constant dense<0.000000e+00> : vector<1xf32>
    %59 = vector.multi_reduction <add>, %58, %cst_21 [1, 2] : vector<1x48x256xf32> to vector<1xf32>
    %60 = vector.shape_cast %59 : vector<1xf32> to vector<1x1x1xf32>
    %61 = vector.extract %60[0, 0, 0] : f32 from vector<1x1x1xf32>
    %cst_22 = arith.constant 2.560000e+02 : f32
    %62 = arith.mulf %cst_22, %61 : f32
    %63 = arith.addf %55, %62 : f32
    %64 = vector.broadcast %63 : f32 to vector<1x1x1xf32>
    %c0_23 = arith.constant 0 : index
    %c0_24 = arith.constant 0 : index
    %c0_25 = arith.constant 0 : index
    %65 = vector.load %arg5[%c0_23, %c0_24, %c0_25] : memref<1x1x1xf32, #tpu.memory_space<vmem>>, vector<1x1x1xf32>
    tpu.vector_store %arg5[%c0_23, %c0_24, %c0_25], %64 {strides = array<i32>} : memref<1x1x1xf32, #tpu.memory_space<vmem>>, vector<1x1x1xf32>,
    return
  }
  func.func @transform_0(%arg0: i32) -> (i32, i32, i32) {
    %c0_i32 = arith.constant 0 : i32
    %c0_i32_0 = arith.constant 0 : i32
    %c0_i32_1 = arith.constant 0 : i32
    return %arg0, %c0_i32, %c0_i32_0 : i32, i32, i32
  }
  func.func @transform_1(%arg0: i32) -> (i32, i32) {
    %c0_i32 = arith.constant 0 : i32
    %c0_i32_0 = arith.constant 0 : i32
    %c0_i32_1 = arith.constant 0 : i32
    return %c0_i32, %c0_i32_0 : i32, i32
  }
  func.func @transform_2(%arg0: i32) -> (i32, i32) {
    %c0_i32 = arith.constant 0 : i32
    %c0_i32_0 = arith.constant 0 : i32
    %c0_i32_1 = arith.constant 0 : i32
    return %c0_i32, %c0_i32_0 : i32, i32
  }
  func.func @transform_3(%arg0: i32) -> (i32, i32) {
    %c0_i32 = arith.constant 0 : i32
    %c0_i32_0 = arith.constant 0 : i32
    %c0_i32_1 = arith.constant 0 : i32
    return %c0_i32, %c0_i32_0 : i32, i32
  }
  func.func @transform_4(%arg0: i32) -> (i32, i32, i32) {
    %c0_i32 = arith.constant 0 : i32
    %c0_i32_0 = arith.constant 0 : i32
    %c0_i32_1 = arith.constant 0 : i32
    return %arg0, %c0_i32, %c0_i32_0 : i32, i32, i32
  }
}

</mosaic_0001>

<bundles_post_ra>
// kernel: squeeze.14
= control target key start
LH: loop header
LB: loop body
LE: loop exit
PB: predicated region body
PF: predicated region fallthrough
CT: control target
= control target key end

     0   :  { %vm125_vm0 = vcmask 1043458   ;;  %s165_s6 = smov 3  ;;  %vm130_vm1 = vcmask 1045508   ;;  %vm135_vm2 = vcmask 1047558   ;;  %s168_s9 = smov 12  ;;  %vm4_vm3 = vcmask 1047556   ;;  %s3058_s0 = inlined_call_operand.vmem [shape: f32[2,16,16,16], index: 0, kind: input, shape index: {}]   ;;  %s3059_s1 = inlined_call_operand.vmem [shape: f32[2,16,256], index: 1, kind: output, shape index: {}]  }
   0x1   :  { %v1454_v0 = vld [vmem:[%s3058_s0 + $0xf] ss:$16 sm:%s165_s6]   ;;  %s173_s10 = smov 48  ;;  %s178_s15 = smov 192  ;;  %vm6_vm4 = vcmask 130048   ;;  %vm139_vm5 = vcmask 1048448  }
   0x2   :  { %v1455_v1 = vld [vmem:[%s3058_s0 + $0xf] ss:$16 sm:%s168_s9]   ;;  %s120_s16 = smov 3  ;;  %s123_s21 = smov 12  ;;  %vm322_vm6 = vcmask 917248   ;;  %vm505_vm7 = vcmask 786048  }
   0x3   :  { %v1456_v2 = vld [vmem:[%s3058_s0 + $0xf] ss:$16 sm:%s173_s10]   ;;  %v171_v3 = vsel %vm125_vm0, %v1455_v1, %v1454_v0  ;;  %v1445_v5 = vld [vmem:[%s3058_s0 + $0x7] ss:$16 sm:%s120_s16]   ;;  %s128_s22 = smov 48  ;;  %s133_s27 = smov 192 }
   0x4   :  { %v1457_v4 = vld [vmem:[%s3058_s0 + $0xf] ss:$16 sm:%s178_s15]   ;;  %v176_v6 = vsel %vm130_vm1, %v1456_v2, %v171_v3  ;;  %v1446_v7 = vld [vmem:[%s3058_s0 + $0x7] ss:$16 sm:%s123_s21]   ;;  %s188_s28 = smov 3  ;;  %s191_s4 = smov 12 }
   0x5   :  { %v1447_v8 = vld [vmem:[%s3058_s0 + $0x7] ss:$16 sm:%s128_s22]   ;;  %v181_v9 = vsel %vm135_vm2, %v1457_v4, %v176_v6  ;;  %v126_v10 = vsel %vm125_vm0, %v1446_v7, %v1445_v5  ;;  %v1459_v12 = vld [vmem:[%s3058_s0 + $0x10f] ss:$16 sm:%s188_s28]   ;;  %s196_s5 = smov 48  ;;  %s1725_s6 = smov 112  }
   0x6   :  { %v1448_v11 = vld [vmem:[%s3058_s0 + $0x7] ss:$16 sm:%s133_s27]   ;;  %182 = vrot.lane.b32.xlu1 %v181_v9, %s1725_s6  ;;  %v131_v13 = vsel %vm130_vm1, %v1447_v8, %v126_v10  ;;  %s201_s9 = smov 192  ;;  %s142_s10 = smov 3  ;;  %vm688_vm8 = vcmask 654848   ;;  %vm871_vm9 = vcmask 523648  }
   0x7   :  { %v1460_v14 = vld [vmem:[%s3058_s0 + $0x10f] ss:$16 sm:%s191_s4]   ;;  %v136_v15 = vsel %vm135_vm2, %v1448_v11, %v131_v13  ;;  %s145_s15 = smov 12  ;;  %s150_s16 = smov 48  ;;  %v1449_v20 = vld [vmem:[%s3058_s0 + $0x107] ss:$16 sm:%s142_s10]  }
   0x8   :  { %v194_v16 = vsel %vm125_vm0, %v1460_v14, %v1459_v12  ;;  %v1461_v17 = vld [vmem:[%s3058_s0 + $0x10f] ss:$16 sm:%s196_s5]   ;;  %137 = vrot.lane.b32.xlu0 %v136_v15, %s1725_s6  ;;  %s155_s19 = smov 192  ;;  %s234_s20 = smov 3  ;;  %vm1054_vm10 = vcmask 392448   ;;  %vm1237_vm11 = vcmask 261248  }
   0x9   :  { %v1462_v18 = vld [vmem:[%s3058_s0 + $0x10f] ss:$16 sm:%s201_s9]   ;;  %v199_v19 = vsel %vm130_vm1, %v1461_v17, %v194_v16  ;;  %v1450_v22 = vld [vmem:[%s3058_s0 + $0x107] ss:$16 sm:%s145_s15]   ;;  %s237_s25 = smov 12  ;;  %s242_s26 = smov 48 }
   0xa   :  { %v204_v21 = vsel %vm135_vm2, %v1462_v18, %v199_v19  ;;  %v1451_v23 = vld [vmem:[%s3058_s0 + $0x107] ss:$16 sm:%s150_s16]   ;;  %v148_v24 = vsel %vm125_vm0, %v1450_v22, %v1449_v20  ;;  %s247_s29 = smov 192  ;;  %s211_s30 = smov 3 }
   0xb   :  { %205 = vrot.lane.b32.xlu1 %v204_v21, %s1725_s6  ;;  %v1452_v25 = vld [vmem:[%s3058_s0 + $0x107] ss:$16 sm:%s155_s19]   ;;  %v153_v26 = vsel %vm130_vm1, %v1451_v23, %v148_v24  ;;  %s214_s7 = smov 12  ;;  %s219_s8 = smov 48 }
   0xc   :  { %v1469_v27 = vld [vmem:[%s3058_s0 + $0x187] ss:$16 sm:%s234_s20]   ;;  %v158_v29 = vsel %vm135_vm2, %v1452_v25, %v153_v26  ;;  %s224_s13 = smov 192  ;;  %s280_s16 = smov 3 }
   0xd   :  { %v1470_v28 = vld [vmem:[%s3058_s0 + $0x187] ss:$16 sm:%s237_s25]   ;;  %159 = vrot.lane.b32.xlu0 %v158_v29, %s1725_s6  ;;  %s283_s17 = smov 12  ;;  %s288_s22 = smov 48 }
   0xe   :  { %v240_v30 = vsel %vm125_vm0, %v1470_v28, %v1469_v27  ;;  %v1471_v31 = vld [vmem:[%s3058_s0 + $0x187] ss:$16 sm:%s242_s26]   ;;  %s293_s23 = smov 192  ;;  %s257_s26 = smov 3  ;;  %v1479_v41 = vld [vmem:[%s3058_s0 + $0x18f] ss:$16 sm:%s280_s16]  }
   0xf   :  { %v1472_v32 = vld [vmem:[%s3058_s0 + $0x187] ss:$16 sm:%s247_s29]   ;;  %v245_v33 = vsel %vm130_vm1, %v1471_v31, %v240_v30  ;;  %v1480_v42 = vld [vmem:[%s3058_s0 + $0x18f] ss:$16 sm:%s283_s17]   ;;  %s260_s2 = smov 12  ;;  %s265_s3 = smov 48 }
  0x10   :  { %v1464_v34 = vld [vmem:[%s3058_s0 + $0x87] ss:$16 sm:%s211_s30]   ;;  %v250_v35 = vsel %vm135_vm2, %v1472_v32, %v245_v33  ;;  %v286_v44 = vsel %vm125_vm0, %v1480_v42, %v1479_v41  ;;  %v1481_v45 = vld [vmem:[%s3058_s0 + $0x18f] ss:$16 sm:%s288_s22]   ;;  %s270_s9 = smov 192  ;;  %s325_s12 = smov 3 }
  0x11   :  { %v1465_v36 = vld [vmem:[%s3058_s0 + $0x87] ss:$16 sm:%s214_s7]   ;;  %251 = vrot.lane.b32.xlu1 %v250_v35, %s1725_s6  ;;  %v291_v47 = vsel %vm130_vm1, %v1481_v45, %v286_v44  ;;  %s333_s18 = smov 48  ;;  %s338_s19 = smov 192 }
  0x12   :  { %v1466_v37 = vld [vmem:[%s3058_s0 + $0x87] ss:$16 sm:%s219_s8]   ;;  %v217_v38 = vsel %vm125_vm0, %v1465_v36, %v1464_v34  ;;  %v1482_v46 = vld [vmem:[%s3058_s0 + $0x18f] ss:$16 sm:%s293_s23]   ;;  %s303_s22 = smov 3  ;;  %s306_s27 = smov 12 }
  0x13   :  { %v1467_v39 = vld [vmem:[%s3058_s0 + $0x87] ss:$16 sm:%s224_s13]   ;;  %v222_v40 = vsel %vm130_vm1, %v1466_v37, %v217_v38  ;;  %v1474_v48 = vld [vmem:[%s3058_s0 + $0x8f] ss:$16 sm:%s257_s26]   ;;  %s328_s13 = smov 12  ;;  %v296_v49 = vsel %vm135_vm2, %v1482_v46, %v291_v47  ;;  %s311_s28 = smov 48 }
  0x14   :  { %v227_v43 = vsel %vm135_vm2, %v1467_v39, %v222_v40  ;;  %v1475_v50 = vld [vmem:[%s3058_s0 + $0x8f] ss:$16 sm:%s260_s2]   ;;  %v1488_v55 = vld [vmem:[%s3058_s0 + $0x106] ss:$16 sm:%s325_s12]   ;;  %s316_s4 = smov 192  ;;  %s371_s7 = smov 3 }
  0x15   :  { %228 = vrot.lane.b32.xlu0 %v227_v43, %s1725_s6  ;;  %v1476_v51 = vld [vmem:[%s3058_s0 + $0x8f] ss:$16 sm:%s265_s3]   ;;  %297 = vrot.lane.b32.xlu1 %v296_v49, %s1725_s6  ;;  %v263_v52 = vsel %vm125_vm0, %v1475_v50, %v1474_v48  ;;  %s374_s8 = smov 12  ;;  %s384_s14 = smov 192 }
  0x16   :  { %v1477_v53 = vld [vmem:[%s3058_s0 + $0x8f] ss:$16 sm:%s270_s9]   ;;  %v268_v54 = vsel %vm130_vm1, %v1476_v51, %v263_v52  ;;  %v1489_v56 = vld [vmem:[%s3058_s0 + $0x106] ss:$16 sm:%s328_s13]   ;;  %s379_s13 = smov 48  ;;  %s1726_s15 = smov 96  }
  0x17   :  { %v273_v57 = vsel %vm135_vm2, %v1477_v53, %v268_v54  ;;  %v331_v58 = vsel %vm125_vm0, %v1489_v56, %v1488_v55  ;;  %v1490_v59 = vld [vmem:[%s3058_s0 + $0x106] ss:$16 sm:%s333_s18]   ;;  %s348_s18 = smov 3  ;;  %v1498_v5 = vld [vmem:[%s3058_s0 + $0x10e] ss:$16 sm:%s371_s7]   ;;  %s351_s23 = smov 12 }
  0x18   :  { %v1491_v60 = vld [vmem:[%s3058_s0 + $0x106] ss:$16 sm:%s338_s19]   ;;  %v336_v61 = vsel %vm130_vm1, %v1490_v59, %v331_v58  ;;  %v1499_v6 = vld [vmem:[%s3058_s0 + $0x10e] ss:$16 sm:%s374_s8]   ;;  %s356_s24 = smov 48  ;;  %s361_s29 = smov 192 }
  0x19   :  { %274 = vrot.lane.b32.xlu0 %v273_v57, %s1725_s6  ;;  %v1484_v62 = vld [vmem:[%s3058_s0 + $0x6] ss:$16 sm:%s303_s22]   ;;  %v341_v63 = vsel %vm135_vm2, %v1491_v60, %v336_v61  ;;  %v377_v8 = vsel %vm125_vm0, %v1499_v6, %v1498_v5  ;;  %s417_s3 = smov 3  ;;  %s425_s9 = smov 48 }
  0x1a   :  { %v1485_v0 = vld [vmem:[%s3058_s0 + $0x6] ss:$16 sm:%s306_s27]   ;;  %342 = vrot.lane.b32.xlu1 %v341_v63, %s1726_s15  ;;  %s430_s10 = smov 192  ;;  %s397_s19 = smov 12 }
  0x1b   :  { %v1486_v1 = vld [vmem:[%s3058_s0 + $0x6] ss:$16 sm:%s311_s28]   ;;  %v309_v2 = vsel %vm125_vm0, %v1485_v0, %v1484_v62  ;;  %v1500_v9 = vld [vmem:[%s3058_s0 + $0x10e] ss:$16 sm:%s379_s13]   ;;  %s394_s13 = smov 3  ;;  %s402_s20 = smov 48 }
  0x1c   :  { %v1487_v3 = vld [vmem:[%s3058_s0 + $0x6] ss:$16 sm:%s316_s4]   ;;  %v314_v4 = vsel %vm130_vm1, %v1486_v1, %v309_v2  ;;  %v1501_v10 = vld [vmem:[%s3058_s0 + $0x10e] ss:$16 sm:%s384_s14]   ;;  %v382_v11 = vsel %vm130_vm1, %v1500_v9, %v377_v8  ;;  %s420_s4 = smov 12  ;;  %s407_s25 = smov 192 }
  0x1d   :  { %v319_v7 = vsel %vm135_vm2, %v1487_v3, %v314_v4  ;;  %v1493_v12 = vld [vmem:[%s3058_s0 + $0xe] ss:$16 sm:%s348_s18]   ;;  %v387_v13 = vsel %vm135_vm2, %v1501_v10, %v382_v11  ;;  %v1508_v19 = vld [vmem:[%s3058_s0 + $0x186] ss:$16 sm:%s417_s3]   ;;  %s463_s28 = smov 3  ;;  %s471_s6 = smov 48 }
  0x1e   :  { %320 = vrot.lane.b32.xlu0 %v319_v7, %s1726_s15  ;;  %v1494_v14 = vld [vmem:[%s3058_s0 + $0xe] ss:$16 sm:%s351_s23]   ;;  %388 = vrot.lane.b32.xlu1 %v387_v13, %s1726_s15  ;;  %s476_s5 = smov 192  ;;  %s443_s14 = smov 12 }
  0x1f   :  { %v1495_v15 = vld [vmem:[%s3058_s0 + $0xe] ss:$16 sm:%s356_s24]   ;;  %v354_v16 = vsel %vm125_vm0, %v1494_v14, %v1493_v12  ;;  %v1509_v20 = vld [vmem:[%s3058_s0 + $0x186] ss:$16 sm:%s420_s4]   ;;  %s448_s16 = smov 48  ;;  %s453_s21 = smov 192 }
  0x20   :  { %v1496_v17 = vld [vmem:[%s3058_s0 + $0xe] ss:$16 sm:%s361_s29]   ;;  %v359_v18 = vsel %vm130_vm1, %v1495_v15, %v354_v16  ;;  %v423_v22 = vsel %vm125_vm0, %v1509_v20, %v1508_v19  ;;  %v1510_v23 = vld [vmem:[%s3058_s0 + $0x186] ss:$16 sm:%s425_s9]   ;;  %s466_s29 = smov 12  ;;  %s440_s9 = smov 3 }
  0x21   :  { %v364_v21 = vsel %vm135_vm2, %v1496_v17, %v359_v18  ;;  %v1511_v24 = vld [vmem:[%s3058_s0 + $0x186] ss:$16 sm:%s430_s10]   ;;  %v428_v25 = vsel %vm130_vm1, %v1510_v23, %v423_v22  ;;  %v1518_v33 = vld [vmem:[%s3058_s0 + $0x18e] ss:$16 sm:%s463_s28]   ;;  %s508_s24 = smov 3  ;;  %s516_s30 = smov 48 }
  0x22   :  { %365 = vrot.lane.b32.xlu0 %v364_v21, %s1726_s15  ;;  %v1503_v26 = vld [vmem:[%s3058_s0 + $0x86] ss:$16 sm:%s394_s13]   ;;  %v433_v27 = vsel %vm135_vm2, %v1511_v24, %v428_v25  ;;  %s521_s2 = smov 192  ;;  %s489_s10 = smov 12 }
  0x23   :  { %v1504_v28 = vld [vmem:[%s3058_s0 + $0x86] ss:$16 sm:%s397_s19]   ;;  %434 = vrot.lane.b32.xlu1 %v433_v27, %s1726_s15  ;;  %s494_s11 = smov 48  ;;  %s499_s17 = smov 192 }
  0x24   :  { %v1505_v29 = vld [vmem:[%s3058_s0 + $0x86] ss:$16 sm:%s402_s20]   ;;  %v400_v30 = vsel %vm125_vm0, %v1504_v28, %v1503_v26  ;;  %v1519_v34 = vld [vmem:[%s3058_s0 + $0x18e] ss:$16 sm:%s466_s29]   ;;  %s554_s19 = smov 3  ;;  %s557_s20 = smov 12 }
  0x25   :  { %v1506_v31 = vld [vmem:[%s3058_s0 + $0x86] ss:$16 sm:%s407_s25]   ;;  %v405_v32 = vsel %vm130_vm1, %v1505_v29, %v400_v30  ;;  %v469_v36 = vsel %vm125_vm0, %v1519_v34, %v1518_v33  ;;  %v1520_v37 = vld [vmem:[%s3058_s0 + $0x18e] ss:$16 sm:%s471_s6]   ;;  %s511_s25 = smov 12  ;;  %s486_s6 = smov 3 }
  0x26   :  { %v410_v35 = vsel %vm135_vm2, %v1506_v31, %v405_v32  ;;  %v1521_v38 = vld [vmem:[%s3058_s0 + $0x18e] ss:$16 sm:%s476_s5]   ;;  %v474_v39 = vsel %vm130_vm1, %v1520_v37, %v469_v36  ;;  %v1527_v47 = vld [vmem:[%s3058_s0 + $0x105] ss:$16 sm:%s508_s24]   ;;  %s567_s26 = smov 192  ;;  %s1727_s27 = smov 80  }
  0x27   :  { %411 = vrot.lane.b32.xlu0 %v410_v35, %s1726_s15  ;;  %v1513_v40 = vld [vmem:[%s3058_s0 + $0x8e] ss:$16 sm:%s440_s9]   ;;  %v479_v41 = vsel %vm135_vm2, %v1521_v38, %v474_v39  ;;  %s534_s5 = smov 12  ;;  %s539_s7 = smov 48 }
  0x28   :  { %v1514_v42 = vld [vmem:[%s3058_s0 + $0x8e] ss:$16 sm:%s443_s14]   ;;  %480 = vrot.lane.b32.xlu1 %v479_v41, %s1726_s15  ;;  %s544_s12 = smov 192  ;;  %s613_s22 = smov 192 }
  0x29   :  { %v1515_v43 = vld [vmem:[%s3058_s0 + $0x8e] ss:$16 sm:%s448_s16]   ;;  %v446_v44 = vsel %vm125_vm0, %v1514_v42, %v1513_v40  ;;  %v1528_v48 = vld [vmem:[%s3058_s0 + $0x105] ss:$16 sm:%s511_s25]   ;;  %s562_s25 = smov 48  ;;  %s600_s16 = smov 3 }
  0x2a   :  { %v1516_v45 = vld [vmem:[%s3058_s0 + $0x8e] ss:$16 sm:%s453_s21]   ;;  %v451_v46 = vsel %vm130_vm1, %v1515_v43, %v446_v44  ;;  %v514_v50 = vsel %vm125_vm0, %v1528_v48, %v1527_v47  ;;  %v1529_v51 = vld [vmem:[%s3058_s0 + $0x105] ss:$16 sm:%s516_s30]   ;;  %s531_s30 = smov 3  ;;  %s608_s21 = smov 48 }
  0x2b   :  { %v456_v49 = vsel %vm135_vm2, %v1516_v45, %v451_v46  ;;  %v1530_v52 = vld [vmem:[%s3058_s0 + $0x105] ss:$16 sm:%s521_s2]   ;;  %v519_v53 = vsel %vm130_vm1, %v1529_v51, %v514_v50  ;;  %v1537_v61 = vld [vmem:[%s3058_s0 + $0x10d] ss:$16 sm:%s554_s19]   ;;  %s580_s2 = smov 12  ;;  %s585_s3 = smov 48 }
  0x2c   :  { %457 = vrot.lane.b32.xlu0 %v456_v49, %s1726_s15  ;;  %v1523_v54 = vld [vmem:[%s3058_s0 + $0x5] ss:$16 sm:%s486_s6]   ;;  %v524_v55 = vsel %vm135_vm2, %v1530_v52, %v519_v53  ;;  %s590_s8 = smov 192  ;;  %s654_s15 = smov 48 }
  0x2d   :  { %v1524_v56 = vld [vmem:[%s3058_s0 + $0x5] ss:$16 sm:%s489_s10]   ;;  %525 = vrot.lane.b32.xlu1 %v524_v55, %s1727_s27  ;;  %s659_s18 = smov 192  ;;  %s631_s28 = smov 48 }
  0x2e   :  { %v1525_v57 = vld [vmem:[%s3058_s0 + $0x5] ss:$16 sm:%s494_s11]   ;;  %v492_v58 = vsel %vm125_vm0, %v1524_v56, %v1523_v54  ;;  %v1538_v62 = vld [vmem:[%s3058_s0 + $0x10d] ss:$16 sm:%s557_s20]   ;;  %s646_s11 = smov 3  ;;  %s636_s4 = smov 192 }
  0x2f   :  { %v1526_v59 = vld [vmem:[%s3058_s0 + $0x5] ss:$16 sm:%s499_s17]   ;;  %v497_v60 = vsel %vm130_vm1, %v1525_v57, %v492_v58  ;;  %v560_v0 = vsel %vm125_vm0, %v1538_v62, %v1537_v61  ;;  %v1539_v1 = vld [vmem:[%s3058_s0 + $0x10d] ss:$16 sm:%s562_s25]   ;;  %s603_s17 = smov 12  ;;  %s577_s25 = smov 3 }
  0x30   :  { %v502_v63 = vsel %vm135_vm2, %v1526_v59, %v497_v60  ;;  %v1540_v2 = vld [vmem:[%s3058_s0 + $0x10d] ss:$16 sm:%s567_s26]   ;;  %v565_v3 = vsel %vm130_vm1, %v1539_v1, %v560_v0  ;;  %v1547_v11 = vld [vmem:[%s3058_s0 + $0x185] ss:$16 sm:%s600_s16]   ;;  %s626_s26 = smov 12  ;;  %s699_s13 = smov 48 }
  0x31   :  { %503 = vrot.lane.b32.xlu0 %v502_v63, %s1727_s27  ;;  %v1532_v4 = vld [vmem:[%s3058_s0 + $0xd] ss:$16 sm:%s531_s30]   ;;  %v570_v5 = vsel %vm135_vm2, %v1540_v2, %v565_v3  ;;  %s704_s14 = smov 192  ;;  %s677_s23 = smov 48 }
  0x32   :  { %v1533_v6 = vld [vmem:[%s3058_s0 + $0xd] ss:$16 sm:%s534_s5]   ;;  %571 = vrot.lane.b32.xlu1 %v570_v5, %s1727_s27  ;;  %s682_s29 = smov 192  ;;  %s750_s9 = smov 192 }
  0x33   :  { %v1534_v7 = vld [vmem:[%s3058_s0 + $0xd] ss:$16 sm:%s539_s7]   ;;  %v537_v8 = vsel %vm125_vm0, %v1533_v6, %v1532_v4  ;;  %v1548_v12 = vld [vmem:[%s3058_s0 + $0x185] ss:$16 sm:%s603_s17]   ;;  %s691_s7 = smov 3  ;;  %s1728_s10 = smov 64  }
  0x34   :  { %v1535_v9 = vld [vmem:[%s3058_s0 + $0xd] ss:$16 sm:%s544_s12]   ;;  %v542_v10 = vsel %vm130_vm1, %v1534_v7, %v537_v8  ;;  %v606_v14 = vsel %vm125_vm0, %v1548_v12, %v1547_v11  ;;  %v1549_v15 = vld [vmem:[%s3058_s0 + $0x185] ss:$16 sm:%s608_s21]   ;;  %s649_s12 = smov 12  ;;  %s623_s21 = smov 3 }
  0x35   :  { %v547_v13 = vsel %vm135_vm2, %v1535_v9, %v542_v10  ;;  %v1550_v16 = vld [vmem:[%s3058_s0 + $0x185] ss:$16 sm:%s613_s22]   ;;  %v611_v17 = vsel %vm130_vm1, %v1549_v15, %v606_v14  ;;  %v1557_v25 = vld [vmem:[%s3058_s0 + $0x18d] ss:$16 sm:%s646_s11]   ;;  %s672_s22 = smov 12  ;;  %s722_s19 = smov 48 }
  0x36   :  { %548 = vrot.lane.b32.xlu0 %v547_v13, %s1727_s27  ;;  %v1542_v18 = vld [vmem:[%s3058_s0 + $0x85] ss:$16 sm:%s577_s25]   ;;  %v616_v19 = vsel %vm135_vm2, %v1550_v16, %v611_v17  ;;  %s727_s24 = smov 192  ;;  %s796_s6 = smov 192 }
  0x37   :  { %v1543_v20 = vld [vmem:[%s3058_s0 + $0x85] ss:$16 sm:%s580_s2]   ;;  %617 = vrot.lane.b32.xlu1 %v616_v19, %s1727_s27  ;;  %s737_s2 = smov 3  ;;  %s768_s16 = smov 48 }
  0x38   :  { %v1544_v21 = vld [vmem:[%s3058_s0 + $0x85] ss:$16 sm:%s585_s3]   ;;  %v583_v22 = vsel %vm125_vm0, %v1543_v20, %v1542_v18  ;;  %v1558_v26 = vld [vmem:[%s3058_s0 + $0x18d] ss:$16 sm:%s649_s12]   ;;  %s740_s3 = smov 12  ;;  %s773_s20 = smov 192 }
  0x39   :  { %v1545_v23 = vld [vmem:[%s3058_s0 + $0x85] ss:$16 sm:%s590_s8]   ;;  %v588_v24 = vsel %vm130_vm1, %v1544_v21, %v583_v22  ;;  %v652_v28 = vsel %vm125_vm0, %v1558_v26, %v1557_v25  ;;  %v1559_v29 = vld [vmem:[%s3058_s0 + $0x18d] ss:$16 sm:%s654_s15]   ;;  %s694_s8 = smov 12  ;;  %s669_s15 = smov 3 }
  0x3a   :  { %v593_v27 = vsel %vm135_vm2, %v1545_v23, %v588_v24  ;;  %v1560_v30 = vld [vmem:[%s3058_s0 + $0x18d] ss:$16 sm:%s659_s18]   ;;  %v657_v31 = vsel %vm130_vm1, %v1559_v29, %v652_v28  ;;  %v1566_v39 = vld [vmem:[%s3058_s0 + $0x104] ss:$16 sm:%s691_s7]   ;;  %s717_s18 = smov 12  ;;  %s842_s30 = smov 192 }
  0x3b   :  { %594 = vrot.lane.b32.xlu0 %v593_v27, %s1727_s27  ;;  %v1552_v32 = vld [vmem:[%s3058_s0 + $0x8d] ss:$16 sm:%s623_s21]   ;;  %v662_v33 = vsel %vm135_vm2, %v1560_v30, %v657_v31  ;;  %s814_s11 = smov 48  ;;  %s819_s17 = smov 192 }
  0x3c   :  { %v1553_v34 = vld [vmem:[%s3058_s0 + $0x8d] ss:$16 sm:%s626_s26]   ;;  %663 = vrot.lane.b32.xlu1 %v662_v33, %s1727_s27  ;;  %s882_s25 = smov 48  ;;  %s887_s26 = smov 192 }
  0x3d   :  { %v1554_v35 = vld [vmem:[%s3058_s0 + $0x8d] ss:$16 sm:%s631_s28]   ;;  %v629_v36 = vsel %vm125_vm0, %v1553_v34, %v1552_v32  ;;  %v1567_v40 = vld [vmem:[%s3058_s0 + $0x104] ss:$16 sm:%s694_s8]   ;;  %s745_s8 = smov 48  ;;  %s783_s28 = smov 3 }
  0x3e   :  { %v1555_v37 = vld [vmem:[%s3058_s0 + $0x8d] ss:$16 sm:%s636_s4]   ;;  %v634_v38 = vsel %vm130_vm1, %v1554_v35, %v629_v36  ;;  %v697_v42 = vsel %vm125_vm0, %v1567_v40, %v1566_v39  ;;  %v1568_v43 = vld [vmem:[%s3058_s0 + $0x104] ss:$16 sm:%s699_s13]   ;;  %s714_s13 = smov 3  ;;  %s791_s4 = smov 48 }
  0x3f   :  { %v639_v41 = vsel %vm135_vm2, %v1555_v37, %v634_v38  ;;  %v1569_v44 = vld [vmem:[%s3058_s0 + $0x104] ss:$16 sm:%s704_s14]   ;;  %v702_v45 = vsel %vm130_vm1, %v1568_v43, %v697_v42  ;;  %v1576_v53 = vld [vmem:[%s3058_s0 + $0x10c] ss:$16 sm:%s737_s2]   ;;  %s763_s14 = smov 12  ;;  %s860_s5 = smov 48 }
  0x40   :  { %640 = vrot.lane.b32.xlu0 %v639_v41, %s1727_s27  ;;  %v1562_v46 = vld [vmem:[%s3058_s0 + $0x4] ss:$16 sm:%s669_s15]   ;;  %v707_v47 = vsel %vm135_vm2, %v1569_v44, %v702_v45  ;;  %s837_s27 = smov 48  ;;  %s865_s12 = smov 192 }
  0x41   :  { %v1563_v48 = vld [vmem:[%s3058_s0 + $0x4] ss:$16 sm:%s672_s22]   ;;  %708 = vrot.lane.b32.xlu1 %v707_v47, %s1728_s10  ;;  %s933_s21 = smov 192  ;;  %s1729_s22 = smov 48  }
  0x42   :  { %v1564_v49 = vld [vmem:[%s3058_s0 + $0x4] ss:$16 sm:%s677_s23]   ;;  %v675_v50 = vsel %vm125_vm0, %v1563_v48, %v1562_v46  ;;  %v1577_v54 = vld [vmem:[%s3058_s0 + $0x10c] ss:$16 sm:%s740_s3]   ;;  %s829_s23 = smov 3  ;;  %s905_s2 = smov 48 }
  0x43   :  { %v1565_v51 = vld [vmem:[%s3058_s0 + $0x4] ss:$16 sm:%s682_s29]   ;;  %v680_v52 = vsel %vm130_vm1, %v1564_v49, %v675_v50  ;;  %v743_v56 = vsel %vm125_vm0, %v1577_v54, %v1576_v53  ;;  %v1578_v57 = vld [vmem:[%s3058_s0 + $0x10c] ss:$16 sm:%s745_s8]   ;;  %s786_s29 = smov 12  ;;  %s760_s8 = smov 3 }
  0x44   :  { %v685_v55 = vsel %vm135_vm2, %v1565_v51, %v680_v52  ;;  %v1579_v58 = vld [vmem:[%s3058_s0 + $0x10c] ss:$16 sm:%s750_s9]   ;;  %v748_v59 = vsel %vm130_vm1, %v1578_v57, %v743_v56  ;;  %v1586_v3 = vld [vmem:[%s3058_s0 + $0x184] ss:$16 sm:%s783_s28]   ;;  %s809_s9 = smov 12  ;;  %s910_s7 = smov 192 }
  0x45   :  { %686 = vrot.lane.b32.xlu0 %v685_v55, %s1728_s10  ;;  %v1571_v60 = vld [vmem:[%s3058_s0 + $0xc] ss:$16 sm:%s714_s13]   ;;  %v753_v61 = vsel %vm135_vm2, %v1579_v58, %v748_v59  ;;  %s979_s15 = smov 192  ;;  %s951_s28 = smov 48 }
  0x46   :  { %v1572_v62 = vld [vmem:[%s3058_s0 + $0xc] ss:$16 sm:%s717_s18]   ;;  %754 = vrot.lane.b32.xlu1 %v753_v61, %s1728_s10  ;;  %s956_s3 = smov 192  ;;  %s1025_s13 = smov 192 }
  0x47   :  { %v1573_v63 = vld [vmem:[%s3058_s0 + $0xc] ss:$16 sm:%s722_s19]   ;;  %v720_v0 = vsel %vm125_vm0, %v1572_v62, %v1571_v60  ;;  %v1587_v4 = vld [vmem:[%s3058_s0 + $0x184] ss:$16 sm:%s786_s29]   ;;  %s874_s19 = smov 3  ;;  %s1002_s29 = smov 192 }
  0x48   :  { %v1574_v1 = vld [vmem:[%s3058_s0 + $0xc] ss:$16 sm:%s727_s24]   ;;  %v725_v2 = vsel %vm130_vm1, %v1573_v63, %v720_v0  ;;  %v789_v6 = vsel %vm125_vm0, %v1587_v4, %v1586_v3  ;;  %v1588_v7 = vld [vmem:[%s3058_s0 + $0x184] ss:$16 sm:%s791_s4]   ;;  %s832_s24 = smov 12  ;;  %s806_s4 = smov 3 }
  0x49   :  { %v730_v5 = vsel %vm135_vm2, %v1574_v1, %v725_v2  ;;  %v1589_v8 = vld [vmem:[%s3058_s0 + $0x184] ss:$16 sm:%s796_s6]   ;;  %v794_v9 = vsel %vm130_vm1, %v1588_v7, %v789_v6  ;;  %v1596_v17 = vld [vmem:[%s3058_s0 + $0x18c] ss:$16 sm:%s829_s23]   ;;  %s855_s6 = smov 12  ;;  %s997_s23 = smov 48 }
  0x4a   :  { %731 = vrot.lane.b32.xlu0 %v730_v5, %s1728_s10  ;;  %v1581_v10 = vld [vmem:[%s3058_s0 + $0x84] ss:$16 sm:%s760_s8]   ;;  %v799_v11 = vsel %vm135_vm2, %v1589_v8, %v794_v9  ;;  %s1065_s8 = smov 48  ;;  %s1043_s18 = smov 48 }
  0x4b   :  { %v1582_v12 = vld [vmem:[%s3058_s0 + $0x84] ss:$16 sm:%s763_s14]   ;;  %800 = vrot.lane.b32.xlu1 %v799_v11, %s1728_s10  ;;  %s920_s14 = smov 3 }
  0x4c   :  { %v1583_v13 = vld [vmem:[%s3058_s0 + $0x84] ss:$16 sm:%s768_s16]   ;;  %v766_v14 = vsel %vm125_vm0, %v1582_v12, %v1581_v10  ;;  %v1597_v18 = vld [vmem:[%s3058_s0 + $0x18c] ss:$16 sm:%s832_s24]   ;;  %s923_s16 = smov 12  ;;  %s1048_s24 = smov 192 }
  0x4d   :  { %v1584_v15 = vld [vmem:[%s3058_s0 + $0x84] ss:$16 sm:%s773_s20]   ;;  %v771_v16 = vsel %vm130_vm1, %v1583_v13, %v766_v14  ;;  %v835_v20 = vsel %vm125_vm0, %v1597_v18, %v1596_v17  ;;  %v1598_v21 = vld [vmem:[%s3058_s0 + $0x18c] ss:$16 sm:%s837_s27]   ;;  %s877_s20 = smov 12  ;;  %s852_s27 = smov 3 }
  0x4e   :  { %v776_v19 = vsel %vm135_vm2, %v1584_v15, %v771_v16  ;;  %v1599_v22 = vld [vmem:[%s3058_s0 + $0x18c] ss:$16 sm:%s842_s30]   ;;  %v840_v23 = vsel %vm130_vm1, %v1598_v21, %v835_v20  ;;  %v1605_v31 = vld [vmem:[%s3058_s0 + $0x103] ss:$16 sm:%s874_s19]   ;;  %s900_s30 = smov 12  ;;  %s1093_s19 = smov 192 }
  0x4f   :  { %777 = vrot.lane.b32.xlu0 %v776_v19, %s1728_s10  ;;  %v1591_v24 = vld [vmem:[%s3058_s0 + $0x8c] ss:$16 sm:%s806_s4]   ;;  %v845_v25 = vsel %vm135_vm2, %v1599_v22, %v840_v23  ;;  %s1116_s4 = smov 192 }
  0x50   :  { %v1592_v26 = vld [vmem:[%s3058_s0 + $0x8c] ss:$16 sm:%s809_s9]   ;;  %846 = vrot.lane.b32.xlu1 %v845_v25, %s1728_s10  ;;  %s1070_s9 = smov 192 }
  0x51   :  { %v1593_v27 = vld [vmem:[%s3058_s0 + $0x8c] ss:$16 sm:%s814_s11]   ;;  %v812_v28 = vsel %vm125_vm0, %v1592_v26, %v1591_v24  ;;  %v1606_v32 = vld [vmem:[%s3058_s0 + $0x103] ss:$16 sm:%s877_s20]   ;;  %s928_s20 = smov 48  ;;  %s966_s11 = smov 3 }
  0x52   :  { %v1594_v29 = vld [vmem:[%s3058_s0 + $0x8c] ss:$16 sm:%s819_s17]   ;;  %v817_v30 = vsel %vm130_vm1, %v1593_v27, %v812_v28  ;;  %v880_v34 = vsel %vm125_vm0, %v1606_v32, %v1605_v31  ;;  %v1607_v35 = vld [vmem:[%s3058_s0 + $0x103] ss:$16 sm:%s882_s25]   ;;  %s897_s25 = smov 3  ;;  %s974_s17 = smov 48 }
  0x53   :  { %v822_v33 = vsel %vm135_vm2, %v1594_v29, %v817_v30  ;;  %v1608_v36 = vld [vmem:[%s3058_s0 + $0x103] ss:$16 sm:%s887_s26]   ;;  %v885_v37 = vsel %vm130_vm1, %v1607_v35, %v880_v34  ;;  %v1615_v45 = vld [vmem:[%s3058_s0 + $0x10b] ss:$16 sm:%s920_s14]   ;;  %s946_s26 = smov 12  ;;  %s1088_s14 = smov 48 }
  0x54   :  { %823 = vrot.lane.b32.xlu0 %v822_v33, %s1728_s10  ;;  %v1601_v38 = vld [vmem:[%s3058_s0 + $0x3] ss:$16 sm:%s852_s27]   ;;  %v890_v39 = vsel %vm135_vm2, %v1608_v36, %v885_v37  ;;  %s1020_s10 = smov 48  ;;  %s1162_s27 = smov 192 }
  0x55   :  { %v1602_v40 = vld [vmem:[%s3058_s0 + $0x3] ss:$16 sm:%s855_s6]   ;;  %891 = vrot.lane.b32.xlu1 %v890_v39, %s1729_s22  ;;  %s1730_s6 = smov 32  }
  0x56   :  { %v1603_v41 = vld [vmem:[%s3058_s0 + $0x3] ss:$16 sm:%s860_s5]   ;;  %v858_v42 = vsel %vm125_vm0, %v1602_v40, %v1601_v38  ;;  %v1616_v46 = vld [vmem:[%s3058_s0 + $0x10b] ss:$16 sm:%s923_s16]   ;;  %s1012_s5 = smov 3  ;;  %s1139_s16 = smov 192 }
  0x57   :  { %v1604_v43 = vld [vmem:[%s3058_s0 + $0x3] ss:$16 sm:%s865_s12]   ;;  %v863_v44 = vsel %vm130_vm1, %v1603_v41, %v858_v42  ;;  %v926_v48 = vsel %vm125_vm0, %v1616_v46, %v1615_v45  ;;  %v1617_v49 = vld [vmem:[%s3058_s0 + $0x10b] ss:$16 sm:%s928_s20]   ;;  %s969_s12 = smov 12  ;;  %s943_s20 = smov 3 }
  0x58   :  { %v868_v47 = vsel %vm135_vm2, %v1604_v43, %v863_v44  ;;  %v1618_v50 = vld [vmem:[%s3058_s0 + $0x10b] ss:$16 sm:%s933_s21]   ;;  %v931_v51 = vsel %vm130_vm1, %v1617_v49, %v926_v48  ;;  %v1625_v59 = vld [vmem:[%s3058_s0 + $0x183] ss:$16 sm:%s966_s11]   ;;  %s992_s21 = smov 12  ;;  %s1134_s11 = smov 48 }
  0x59   :  { %869 = vrot.lane.b32.xlu0 %v868_v47, %s1729_s22  ;;  %v1610_v52 = vld [vmem:[%s3058_s0 + $0xb] ss:$16 sm:%s897_s25]   ;;  %v936_v53 = vsel %vm135_vm2, %v1618_v50, %v931_v51  ;;  %s1208_s25 = smov 192 }
  0x5a   :  { %v1611_v54 = vld [vmem:[%s3058_s0 + $0xb] ss:$16 sm:%s900_s30]   ;;  %937 = vrot.lane.b32.xlu1 %v936_v53, %s1729_s22  ;;  %s1276_s30 = smov 192 }
  0x5b   :  { %v1612_v55 = vld [vmem:[%s3058_s0 + $0xb] ss:$16 sm:%s905_s2]   ;;  %v903_v56 = vsel %vm125_vm0, %v1611_v54, %v1610_v52  ;;  %v1626_v60 = vld [vmem:[%s3058_s0 + $0x183] ss:$16 sm:%s969_s12]   ;;  %s1057_s2 = smov 3 }
  0x5c   :  { %v1613_v57 = vld [vmem:[%s3058_s0 + $0xb] ss:$16 sm:%s910_s7]   ;;  %v908_v58 = vsel %vm130_vm1, %v1612_v55, %v903_v56  ;;  %v972_v62 = vsel %vm125_vm0, %v1626_v60, %v1625_v59  ;;  %v1627_v63 = vld [vmem:[%s3058_s0 + $0x183] ss:$16 sm:%s974_s17]   ;;  %s1015_s7 = smov 12  ;;  %s989_s17 = smov 3 }
  0x5d   :  { %v913_v61 = vsel %vm135_vm2, %v1613_v57, %v908_v58  ;;  %v1628_v0 = vld [vmem:[%s3058_s0 + $0x183] ss:$16 sm:%s979_s15]   ;;  %v977_v1 = vsel %vm130_vm1, %v1627_v63, %v972_v62  ;;  %v1635_v9 = vld [vmem:[%s3058_s0 + $0x18b] ss:$16 sm:%s1012_s5]   ;;  %s1038_s15 = smov 12 }
  0x5e   :  { %914 = vrot.lane.b32.xlu0 %v913_v61, %s1729_s22  ;;  %v1620_v2 = vld [vmem:[%s3058_s0 + $0x83] ss:$16 sm:%s943_s20]   ;;  %v982_v3 = vsel %vm135_vm2, %v1628_v0, %v977_v1  ;;  %s1203_s20 = smov 48  ;;  %v1421_v0 = vld [vmem:[%s3058_s0 + $0x100] ss:$8 sm:$0xf]  }
  0x5f   :  { %v1621_v4 = vld [vmem:[%s3058_s0 + $0x83] ss:$16 sm:%s946_s26]   ;;  %983 = vrot.lane.b32.xlu1 %v982_v3, %s1729_s22  ;;  %s1103_s26 = smov 3 }
  0x60   :  { %v1622_v5 = vld [vmem:[%s3058_s0 + $0x83] ss:$16 sm:%s951_s28]   ;;  %v949_v6 = vsel %vm125_vm0, %v1621_v4, %v1620_v2  ;;  %v1636_v10 = vld [vmem:[%s3058_s0 + $0x18b] ss:$16 sm:%s1015_s7]   ;;  %s1106_s28 = smov 12  ;;  %s1335_s7 = smov 12 }
  0x61   :  { %v1623_v7 = vld [vmem:[%s3058_s0 + $0x83] ss:$16 sm:%s956_s3]   ;;  %v954_v8 = vsel %vm130_vm1, %v1622_v5, %v949_v6  ;;  %v1018_v12 = vsel %vm125_vm0, %v1636_v10, %v1635_v9  ;;  %v1637_v13 = vld [vmem:[%s3058_s0 + $0x18b] ss:$16 sm:%s1020_s10]   ;;  %s1060_s3 = smov 12  ;;  %s1035_s10 = smov 3 }
  0x62   :  { %v959_v11 = vsel %vm135_vm2, %v1623_v7, %v954_v8  ;;  %v1638_v14 = vld [vmem:[%s3058_s0 + $0x18b] ss:$16 sm:%s1025_s13]   ;;  %v1023_v15 = vsel %vm130_vm1, %v1637_v13, %v1018_v12  ;;  %v1644_v23 = vld [vmem:[%s3058_s0 + $0x102] ss:$16 sm:%s1057_s2]   ;;  %s1083_s13 = smov 12  ;;  %s1294_s2 = smov 48 }
  0x63   :  { %960 = vrot.lane.b32.xlu0 %v959_v11, %s1729_s22  ;;  %v1630_v16 = vld [vmem:[%s3058_s0 + $0x8b] ss:$16 sm:%s989_s17]   ;;  %v1028_v17 = vsel %vm135_vm2, %v1638_v14, %v1023_v15  ;;  %s1195_s17 = smov 3  ;;  %v1422_v10 = vld [vmem:[%s3058_s0 + $0x100] ss:$8 sm:$0xf0]  }
  0x64   :  { %v1631_v18 = vld [vmem:[%s3058_s0 + $0x8b] ss:$16 sm:%s992_s21]   ;;  %1029 = vrot.lane.b32.xlu1 %v1028_v17, %s1729_s22  ;;  %v64_v14 = vsel %vm4_vm3, %v1422_v10, %v1421_v0  ;;  %s1231_s21 = smov 192 }
  0x65   :  { %v1632_v19 = vld [vmem:[%s3058_s0 + $0x8b] ss:$16 sm:%s997_s23]   ;;  %v995_v20 = vsel %vm125_vm0, %v1631_v18, %v1630_v16  ;;  %v1645_v24 = vld [vmem:[%s3058_s0 + $0x102] ss:$16 sm:%s1060_s3]   ;;  %s1111_s3 = smov 48  ;;  %s1149_s23 = smov 3 }
  0x66   :  { %v1633_v21 = vld [vmem:[%s3058_s0 + $0x8b] ss:$16 sm:%s1002_s29]   ;;  %v1000_v22 = vsel %vm130_vm1, %v1632_v19, %v995_v20  ;;  %v1063_v26 = vsel %vm125_vm0, %v1645_v24, %v1644_v23  ;;  %v1646_v27 = vld [vmem:[%s3058_s0 + $0x102] ss:$16 sm:%s1065_s8]   ;;  %s1080_s8 = smov 3  ;;  %s1157_s29 = smov 48 }
  0x67   :  { %v1005_v25 = vsel %vm135_vm2, %v1633_v21, %v1000_v22  ;;  %v1647_v28 = vld [vmem:[%s3058_s0 + $0x102] ss:$16 sm:%s1070_s9]   ;;  %v1068_v29 = vsel %vm130_vm1, %v1646_v27, %v1063_v26  ;;  %v1654_v37 = vld [vmem:[%s3058_s0 + $0x10a] ss:$16 sm:%s1103_s26]   ;;  %s1129_s9 = smov 12  ;;  %s1172_s26 = smov 3 }
  0x68   :  { %1006 = vrot.lane.b32.xlu0 %v1005_v25, %s1729_s22  ;;  %v1640_v30 = vld [vmem:[%s3058_s0 + $0x2] ss:$16 sm:%s1035_s10]   ;;  %v1073_v31 = vsel %vm135_vm2, %v1647_v28, %v1068_v29  ;;  %s1248_s22 = smov 48  ;;  %1423 = vst.msk [vmem:[%s3059_s1 + $0x20] ss:$8 sm:$0x3] %vm6_vm4, %v64_v14  }
  0x69   :  { %v1641_v32 = vld [vmem:[%s3058_s0 + $0x2] ss:$16 sm:%s1038_s15]   ;;  %1074 = vrot.lane.b32.xlu1 %v1073_v31, %s1730_s6  ;;  %s1243_s15 = smov 12  ;;  %1424 = vst.msk [vmem:[%s3059_s1 + $0x11] ss:$8 sm:$0xc] %vm6_vm4, %v64_v14  }
  0x6a   :  { %v1642_v33 = vld [vmem:[%s3058_s0 + $0x2] ss:$16 sm:%s1043_s18]   ;;  %v1041_v34 = vsel %vm125_vm0, %v1641_v32, %v1640_v30  ;;  %v1655_v38 = vld [vmem:[%s3058_s0 + $0x10a] ss:$16 sm:%s1106_s28]   ;;  %s1355_s28 = smov 3 }
  0x6b   :  { %v1643_v35 = vld [vmem:[%s3058_s0 + $0x2] ss:$16 sm:%s1048_s24]   ;;  %v1046_v36 = vsel %vm130_vm1, %v1642_v33, %v1041_v34  ;;  %v1109_v40 = vsel %vm125_vm0, %v1655_v38, %v1654_v37  ;;  %v1656_v41 = vld [vmem:[%s3058_s0 + $0x10a] ss:$16 sm:%s1111_s3]   ;;  %s1152_s24 = smov 12  ;;  %s1126_s3 = smov 3 }
  0x6c   :  { %v1051_v39 = vsel %vm135_vm2, %v1643_v35, %v1046_v36  ;;  %v1657_v42 = vld [vmem:[%s3058_s0 + $0x10a] ss:$16 sm:%s1116_s4]   ;;  %v1114_v43 = vsel %vm130_vm1, %v1656_v41, %v1109_v40  ;;  %v1664_v51 = vld [vmem:[%s3058_s0 + $0x182] ss:$16 sm:%s1149_s23]   ;;  %s1286_s23 = smov 3  ;;  %s1731_s4 = smov 16  }
  0x6d   :  { %1052 = vrot.lane.b32.xlu0 %v1051_v39, %s1730_s6  ;;  %v1649_v44 = vld [vmem:[%s3058_s0 + $0xa] ss:$16 sm:%s1080_s8]   ;;  %v1119_v45 = vsel %vm135_vm2, %v1657_v42, %v1114_v43  ;;  %s1180_s8 = smov 48  ;;  %1425 = vst.msk [vmem:[%s3059_s1 + $0x2] ss:$8 sm:$0x30] %vm6_vm4, %v64_v14  }
  0x6e   :  { %v1650_v46 = vld [vmem:[%s3058_s0 + $0xa] ss:$16 sm:%s1083_s13]   ;;  %1120 = vrot.lane.b32.xlu1 %v1119_v45, %s1730_s6  ;;  %1426 = vst.msk [vmem:[%s3059_s1 - $0xd] ss:$8 sm:$0xc0] %vm6_vm4, %v64_v14   ;;  %s1322_s13 = smov 192 }
  0x6f   :  { %v1651_v47 = vld [vmem:[%s3058_s0 + $0xa] ss:$16 sm:%s1088_s14]   ;;  %v1086_v48 = vsel %vm125_vm0, %v1650_v46, %v1649_v44  ;;  %v1665_v52 = vld [vmem:[%s3058_s0 + $0x182] ss:$16 sm:%s1152_s24]   ;;  %s1240_s14 = smov 3  ;;  %s1271_s24 = smov 48 }
  0x70   :  { %v1652_v49 = vld [vmem:[%s3058_s0 + $0xa] ss:$16 sm:%s1093_s19]   ;;  %v1091_v50 = vsel %vm130_vm1, %v1651_v47, %v1086_v48  ;;  %v1155_v54 = vsel %vm125_vm0, %v1665_v52, %v1664_v51  ;;  %v1666_v55 = vld [vmem:[%s3058_s0 + $0x182] ss:$16 sm:%s1157_s29]   ;;  %s1198_s19 = smov 12  ;;  %s1218_s29 = smov 3 }
  0x71   :  { %v1096_v53 = vsel %vm135_vm2, %v1652_v49, %v1091_v50  ;;  %v1667_v56 = vld [vmem:[%s3058_s0 + $0x182] ss:$16 sm:%s1162_s27]   ;;  %v1160_v57 = vsel %vm130_vm1, %v1666_v55, %v1155_v54  ;;  %s1175_s27 = smov 12  ;;  %v1674_v2 = vld [vmem:[%s3058_s0 + $0x18a] ss:$16 sm:%s1195_s17]   ;;  %s1226_s17 = smov 48 }
  0x72   :  { %1097 = vrot.lane.b32.xlu0 %v1096_v53, %s1730_s6  ;;  %v1659_v58 = vld [vmem:[%s3058_s0 + $0x82] ss:$16 sm:%s1126_s3]   ;;  %v1165_v59 = vsel %vm135_vm2, %v1667_v56, %v1160_v57  ;;  %v1427_v18 = vld [vmem:[%s3058_s0 + $0x140] ss:$8 sm:$0xf]   ;;  %s1299_s3 = smov 192 }
  0x73   :  { %v1660_v60 = vld [vmem:[%s3058_s0 + $0x82] ss:$16 sm:%s1129_s9]   ;;  %1166 = vrot.lane.b32.xlu1 %v1165_v59, %s1730_s6  ;;  %s1185_s9 = smov 192  ;;  %v1428_v29 = vld [vmem:[%s3058_s0 + $0x140] ss:$8 sm:$0xf0]  }
  0x74   :  { %v1661_v61 = vld [vmem:[%s3058_s0 + $0x82] ss:$16 sm:%s1134_s11]   ;;  %v1132_v62 = vsel %vm125_vm0, %v1660_v60, %v1659_v58  ;;  %v1675_v3 = vld [vmem:[%s3058_s0 + $0x18a] ss:$16 sm:%s1198_s19]   ;;  %v79_v34 = vsel %vm4_vm3, %v1428_v29, %v1427_v18 }
  0x75   :  { %v1662_v63 = vld [vmem:[%s3058_s0 + $0x82] ss:$16 sm:%s1139_s16]   ;;  %v1137_v1 = vsel %vm130_vm1, %v1661_v61, %v1132_v62  ;;  %v1201_v5 = vsel %vm125_vm0, %v1675_v3, %v1674_v2  ;;  %v1676_v6 = vld [vmem:[%s3058_s0 + $0x18a] ss:$16 sm:%s1203_s20]   ;;  %s1221_s16 = smov 12  ;;  %s1309_s20 = smov 3 }
  0x76   :  { %v1142_v4 = vsel %vm135_vm2, %v1662_v63, %v1137_v1  ;;  %v1677_v7 = vld [vmem:[%s3058_s0 + $0x18a] ss:$16 sm:%s1208_s25]   ;;  %v1206_v8 = vsel %vm130_vm1, %v1676_v6, %v1201_v5  ;;  %s1253_s25 = smov 192  ;;  %v1683_v20 = vld [vmem:[%s3058_s0 + $0x101] ss:$16 sm:%s1240_s14]   ;;  %s1378_s14 = smov 3 }
  0x77   :  { %1143 = vrot.lane.b32.xlu0 %v1142_v4, %s1730_s6  ;;  %v1669_v9 = vld [vmem:[%s3058_s0 + $0x8a] ss:$16 sm:%s1172_s26]   ;;  %v1211_v11 = vsel %vm135_vm2, %v1677_v7, %v1206_v8  ;;  %1429 = vst.msk [vmem:[%s3059_s1 + $0x24] ss:$8 sm:$0x3] %vm6_vm4, %v79_v34  }
  0x78   :  { %v1670_v12 = vld [vmem:[%s3058_s0 + $0x8a] ss:$16 sm:%s1175_s27]   ;;  %1212 = vrot.lane.b32.xlu1 %v1211_v11, %s1730_s6  ;;  %v2514_v17 = vpop.permute.xlu1 %182   ;;  %1430 = vst.msk [vmem:[%s3059_s1 + $0x15] ss:$8 sm:$0xc] %vm6_vm4, %v79_v34  }
  0x79   :  { %v1671_v13 = vld [vmem:[%s3058_s0 + $0x8a] ss:$16 sm:%s1180_s8]   ;;  %v1178_v15 = vsel %vm125_vm0, %v1670_v12, %v1669_v9  ;;  %v1684_v21 = vld [vmem:[%s3058_s0 + $0x101] ss:$16 sm:%s1243_s15]   ;;  %s1263_s8 = smov 3  ;;  %s1345_s15 = smov 192 }
  0x7a   :  { %v1672_v16 = vld [vmem:[%s3058_s0 + $0x8a] ss:$16 sm:%s1185_s9]   ;;  %v1183_v19 = vsel %vm130_vm1, %v1671_v13, %v1178_v15  ;;  %v1246_v23 = vsel %vm125_vm0, %v1684_v21, %v1683_v20  ;;  %v1685_v24 = vld [vmem:[%s3058_s0 + $0x101] ss:$16 sm:%s1248_s22]   ;;  %v2550_v26 = vpop.permute.xlu0 %137   ;;  %s1289_s22 = smov 12 }
  0x7b   :  { %v1188_v22 = vsel %vm135_vm2, %v1672_v16, %v1183_v19  ;;  %v1686_v25 = vld [vmem:[%s3058_s0 + $0x101] ss:$16 sm:%s1253_s25]   ;;  %v1251_v27 = vsel %vm130_vm1, %v1685_v24, %v1246_v23  ;;  %1431 = vst.msk [vmem:[%s3059_s1 + $0x6] ss:$8 sm:$0x30] %vm6_vm4, %v79_v34  }
  0x7c   :  { %1189 = vrot.lane.b32.xlu0 %v1188_v22, %s1730_s6  ;;  %v1679_v28 = vld [vmem:[%s3058_s0 + $0x1] ss:$16 sm:%s1218_s29]   ;;  %v1256_v30 = vsel %vm135_vm2, %v1686_v25, %v1251_v27  ;;  %1432 = vst.msk [vmem:[%s3059_s1 - $0x9] ss:$8 sm:$0xc0] %vm6_vm4, %v79_v34   ;;  %s1266_s6 = smov 12 }
  0x7d   :  { %v1680_v31 = vld [vmem:[%s3058_s0 + $0x1] ss:$16 sm:%s1221_s16]   ;;  %v206_v33 = vpop.permute.xlu1 %205   ;;  %1257 = vrot.lane.b32.xlu1 %v1256_v30, %s1731_s4  ;;  %v2_v37 = vld [vmem:[%s3058_s0] ss:$8 sm:$0xf]   ;;  %s1358_s16 = smov 12 }
  0x7e   :  { %v1681_v32 = vld [vmem:[%s3058_s0 + $0x1] ss:$16 sm:%s1226_s17]   ;;  %v1224_v35 = vsel %vm125_vm0, %v1680_v31, %v1679_v28  ;;  %v1693_v39 = vld [vmem:[%s3058_s0 + $0x109] ss:$16 sm:%s1286_s23]   ;;  %s1340_s17 = smov 48 }
  0x7f   :  { %v1682_v36 = vld [vmem:[%s3058_s0 + $0x1] ss:$16 sm:%s1231_s21]   ;;  %v1229_v38 = vsel %vm130_vm1, %v1681_v32, %v1224_v35  ;;  %v1694_v40 = vld [vmem:[%s3058_s0 + $0x109] ss:$16 sm:%s1289_s22]   ;;  %v160_v45 = vpop.permute.xlu0 %159   ;;  %s1391_s22 = smov 192 }
  0x80   :  { %1463 = vst.msk [vmem:[%s3059_s1 + $0x28] sm:$0xff] %vm139_vm5, %v206_v33   ;;  %v1234_v41 = vsel %vm135_vm2, %v1682_v36, %v1229_v38  ;;  %v1292_v42 = vsel %vm125_vm0, %v1694_v40, %v1693_v39  ;;  %v1695_v43 = vld [vmem:[%s3058_s0 + $0x109] ss:$16 sm:%s1294_s2]   ;;  %s1332_s2 = smov 3  ;;  %1453 = vst.msk [vmem:[%s3059_s1 + $0x20] sm:$0xff] %vm139_vm5, %v160_v45  }
  0x81   :  { %v1696_v44 = vld [vmem:[%s3058_s0 + $0x109] ss:$16 sm:%s1299_s3]   ;;  %1235 = vrot.lane.b32.xlu0 %v1234_v41, %s1731_s4  ;;  %v1297_v46 = vsel %vm130_vm1, %v1695_v43, %v1292_v42  ;;  %v3_v48 = vld [vmem:[%s3058_s0] ss:$8 sm:$0xf0]  }
  0x82   :  { %v1688_v47 = vld [vmem:[%s3058_s0 + $0x9] ss:$16 sm:%s1263_s8]   ;;  %v1302_v49 = vsel %vm135_vm2, %v1696_v44, %v1297_v46  ;;  %v5_v53 = vsel %vm4_vm3, %v3_v48, %v2_v37  ;;  %v1403_v56 = vld [vmem:[%s3058_s0 + $0x40] ss:$8 sm:$0xf]   ;;  %s1317_s8 = smov 48 }
  0x83   :  { %v1689_v50 = vld [vmem:[%s3058_s0 + $0x9] ss:$16 sm:%s1266_s6]   ;;  %v2630_v52 = vpop.permute.xlu1 %251   ;;  %1303 = vrot.lane.b32.xlu1 %v1302_v49, %s1731_s4  ;;  %7 = vst.msk [vmem:[%s3059_s1] ss:$8 sm:$0x3] %vm6_vm4, %v5_v53  }
  0x84   :  { %v1690_v51 = vld [vmem:[%s3058_s0 + $0x9] ss:$16 sm:%s1271_s24]   ;;  %v1269_v54 = vsel %vm125_vm0, %v1689_v50, %v1688_v47  ;;  %1400 = vst.msk [vmem:[%s3059_s1 - $0xf] ss:$8 sm:$0xc] %vm6_vm4, %v5_v53   ;;  %s1386_s24 = smov 48 }
  0x85   :  { %v1691_v55 = vld [vmem:[%s3058_s0 + $0x9] ss:$16 sm:%s1276_s30]   ;;  %1401 = vst.msk [vmem:[%s3059_s1 - $0x1e] ss:$8 sm:$0x30] %vm6_vm4, %v5_v53   ;;  %v1274_v57 = vsel %vm130_vm1, %v1690_v51, %v1269_v54 }
  0x86   :  { %1402 = vst.msk [vmem:[%s3059_s1 - $0x2d] ss:$8 sm:$0xc0] %vm6_vm4, %v5_v53   ;;  %v1703_v58 = vld [vmem:[%s3058_s0 + $0x181] ss:$16 sm:%s1332_s2]   ;;  %v1279_v60 = vsel %vm135_vm2, %v1691_v55, %v1274_v57 }
  0x87   :  { %v1704_v59 = vld [vmem:[%s3058_s0 + $0x181] ss:$16 sm:%s1335_s7]   ;;  %s1312_s7 = smov 12  ;;  %v2672_v0 = vpop.permute.xlu0 %228   ;;  %1280 = vrot.lane.b32.xlu0 %v1279_v60, %s1731_s4  ;;  %v1404_v3 = vld [vmem:[%s3058_s0 + $0x40] ss:$8 sm:$0xf0]   ;;  %v298_v7 = vpop.permute.xlu1 %297  }
  0x88   :  { %v1338_v61 = vsel %vm125_vm0, %v1704_v59, %v1703_v58  ;;  %v1705_v62 = vld [vmem:[%s3058_s0 + $0x181] ss:$16 sm:%s1340_s17]   ;;  %v19_v8 = vsel %vm4_vm3, %v1404_v3, %v1403_v56  ;;  %v1433_v11 = vld [vmem:[%s3058_s0 + $0x180] ss:$8 sm:$0xf]   ;;  %s1363_s17 = smov 48 }
  0x89   :  { %v1706_v63 = vld [vmem:[%s3058_s0 + $0x181] ss:$16 sm:%s1345_s15]   ;;  %v1343_v1 = vsel %vm130_vm1, %v1705_v62, %v1338_v61  ;;  %s1381_s15 = smov 12  ;;  %1405 = vst.msk [vmem:[%s3059_s1 + $0x4] ss:$8 sm:$0x3] %vm6_vm4, %v19_v8  }
  0x8a   :  { %v1698_v2 = vld [vmem:[%s3058_s0 + $0x81] ss:$16 sm:%s1309_s20]   ;;  %v1348_v4 = vsel %vm135_vm2, %v1706_v63, %v1343_v1  ;;  %1406 = vst.msk [vmem:[%s3059_s1 - $0xb] ss:$8 sm:$0xc] %vm6_vm4, %v19_v8  }
  0x8b   :  { %v1699_v5 = vld [vmem:[%s3058_s0 + $0x81] ss:$16 sm:%s1312_s7]   ;;  %1349 = vrot.lane.b32.xlu1 %v1348_v4, %s1731_s4  ;;  %1407 = vst.msk [vmem:[%s3059_s1 - $0x1a] ss:$8 sm:$0x30] %vm6_vm4, %v19_v8   ;;  %v275_v19 = vpop.permute.xlu0 %274  }
  0x8c   :  { %v1700_v6 = vld [vmem:[%s3058_s0 + $0x81] ss:$16 sm:%s1317_s8]   ;;  %v1315_v9 = vsel %vm125_vm0, %v1699_v5, %v1698_v2  ;;  %1408 = vst.msk [vmem:[%s3059_s1 - $0x29] ss:$8 sm:$0xc0] %vm6_vm4, %v19_v8  }
  0x8d   :  { %v1701_v10 = vld [vmem:[%s3058_s0 + $0x81] ss:$16 sm:%s1322_s13]   ;;  %v1320_v12 = vsel %vm130_vm1, %v1700_v6, %v1315_v9  ;;  %v1713_v13 = vld [vmem:[%s3058_s0 + $0x189] ss:$16 sm:%s1378_s14]  }
  0x8e   :  { %v1714_v14 = vld [vmem:[%s3058_s0 + $0x189] ss:$16 sm:%s1381_s15]   ;;  %140 = vst.msk [vmem:[%s3059_s1] sm:$0xff] %vm139_vm5, %v2550_v26   ;;  %1458 = vst.msk [vmem:[%s3059_s1 + $0x8] sm:$0xff] %vm139_vm5, %v2514_v17   ;;  %v1325_v15 = vsel %vm135_vm2, %v1701_v10, %v1320_v12  ;;  %v343_v26 = vpop.permute.xlu1 %342  }
  0x8f   :  { %v1384_v16 = vsel %vm125_vm0, %v1714_v14, %v1713_v13  ;;  %v1715_v17 = vld [vmem:[%s3058_s0 + $0x189] ss:$16 sm:%s1386_s24]   ;;  %1326 = vrot.lane.b32.xlu0 %v1325_v15, %s1731_s4  ;;  %v1434_v22 = vld [vmem:[%s3058_s0 + $0x180] ss:$8 sm:$0xf0]  }
  0x90   :  { %v1716_v18 = vld [vmem:[%s3058_s0 + $0x189] ss:$16 sm:%s1391_s22]   ;;  %s1368_s22 = smov 192  ;;  %v1389_v20 = vsel %vm130_vm1, %v1715_v17, %v1384_v16  ;;  %v94_v27 = vsel %vm4_vm3, %v1434_v22, %v1433_v11  ;;  %1492 = vst.msk [vmem:[%s3059_s1 + $0x20] sm:$0xff] %vm322_vm6, %v343_v26   ;;  %v321_v35 = vpop.permute.xlu0 %320  }
  0x91   :  { %v1708_v21 = vld [vmem:[%s3058_s0 + $0x89] ss:$16 sm:%s1355_s28]   ;;  %v1394_v23 = vsel %vm135_vm2, %v1716_v18, %v1389_v20  ;;  %1435 = vst.msk [vmem:[%s3059_s1 + $0x30] ss:$8 sm:$0x3] %vm6_vm4, %v94_v27  }
  0x92   :  { %v1709_v24 = vld [vmem:[%s3058_s0 + $0x89] ss:$16 sm:%s1358_s16]   ;;  %1395 = vrot.lane.b32.xlu1 %v1394_v23, %s1731_s4  ;;  %1436 = vst.msk [vmem:[%s3059_s1 + $0x21] ss:$8 sm:$0xc] %vm6_vm4, %v94_v27   ;;  %v389_v41 = vpop.permute.xlu1 %388  }
  0x93   :  { %v1710_v25 = vld [vmem:[%s3058_s0 + $0x89] ss:$16 sm:%s1363_s17]   ;;  %v1361_v28 = vsel %vm125_vm0, %v1709_v24, %v1708_v21  ;;  %1437 = vst.msk [vmem:[%s3059_s1 + $0x12] ss:$8 sm:$0x30] %vm6_vm4, %v94_v27  }
  0x94   :  { %v1711_v29 = vld [vmem:[%s3058_s0 + $0x89] ss:$16 sm:%s1368_s22]   ;;  %1438 = vst.msk [vmem:[%s3059_s1 + $0x3] ss:$8 sm:$0xc0] %vm6_vm4, %v94_v27   ;;  %v1366_v31 = vsel %vm130_vm1, %v1710_v25, %v1361_v28  ;;  %v366_v43 = vpop.permute.xlu0 %365  }
  0x95   :  { %v1439_v30 = vld [vmem:[%s3058_s0 + $0x1c0] ss:$8 sm:$0xf]   ;;  %v1371_v34 = vsel %vm135_vm2, %v1711_v29, %v1366_v31  ;;  %323 = vst.msk [vmem:[%s3059_s1] sm:$0xff] %vm322_vm6, %v321_v35   ;;  %1502 = vst.msk [vmem:[%s3059_s1 + $0x28] sm:$0xff] %vm322_vm6, %v389_v41  }
  0x96   :  { %v1440_v32 = vld [vmem:[%s3058_s0 + $0x1c0] ss:$8 sm:$0xf0]   ;;  %1372 = vrot.lane.b32.xlu0 %v1371_v34, %s1731_s4  ;;  %1497 = vst.msk [vmem:[%s3059_s1 + $0x8] sm:$0xff] %vm322_vm6, %v366_v43   ;;  %v435_v44 = vpop.permute.xlu1 %434  }
  0x97   :  { %v1409_v33 = vld [vmem:[%s3058_s0 + $0x80] ss:$8 sm:$0xf]   ;;  %v109_v36 = vsel %vm4_vm3, %v1440_v32, %v1439_v30 }
  0x98   :  { %v1410_v37 = vld [vmem:[%s3058_s0 + $0x80] ss:$8 sm:$0xf0]   ;;  %1441 = vst.msk [vmem:[%s3059_s1 + $0x34] ss:$8 sm:$0x3] %vm6_vm4, %v109_v36  }
  0x99   :  { %v1415_v38 = vld [vmem:[%s3058_s0 + $0xc0] ss:$8 sm:$0xf]   ;;  %1442 = vst.msk [vmem:[%s3059_s1 + $0x25] ss:$8 sm:$0xc] %vm6_vm4, %v109_v36   ;;  %v34_v39 = vsel %vm4_vm3, %v1410_v37, %v1409_v33  ;;  %v412_v45 = vpop.permute.xlu0 %411  }
  0x9a   :  { %1443 = vst.msk [vmem:[%s3059_s1 + $0x16] ss:$8 sm:$0x30] %vm6_vm4, %v109_v36   ;;  %1444 = vst.msk [vmem:[%s3059_s1 + $0x7] ss:$8 sm:$0xc0] %vm6_vm4, %v109_v36   ;;  %v481_v46 = vpop.permute.xlu1 %480  }
  0x9b   :  { %v1416_v40 = vld [vmem:[%s3058_s0 + $0xc0] ss:$8 sm:$0xf0]   ;;  %1473 = vst.msk [vmem:[%s3059_s1 + $0x30] sm:$0xff] %vm139_vm5, %v2630_v52   ;;  %1483 = vst.msk [vmem:[%s3059_s1 + $0x38] sm:$0xff] %vm139_vm5, %v298_v7  }
  0x9c   :  { %1411 = vst.msk [vmem:[%s3059_s1 + $0x10] ss:$8 sm:$0x3] %vm6_vm4, %v34_v39   ;;  %1412 = vst.msk [vmem:[%s3059_s1 + $0x1] ss:$8 sm:$0xc] %vm6_vm4, %v34_v39   ;;  %v49_v42 = vsel %vm4_vm3, %v1416_v40, %v1415_v38 }
  0x9d   :  { %1413 = vst.msk [vmem:[%s3059_s1 - $0xe] ss:$8 sm:$0x30] %vm6_vm4, %v34_v39   ;;  %1414 = vst.msk [vmem:[%s3059_s1 - $0x1d] ss:$8 sm:$0xc0] %vm6_vm4, %v34_v39  }
  0x9e   :  { %1417 = vst.msk [vmem:[%s3059_s1 + $0x14] ss:$8 sm:$0x3] %vm6_vm4, %v49_v42   ;;  %1418 = vst.msk [vmem:[%s3059_s1 + $0x5] ss:$8 sm:$0xc] %vm6_vm4, %v49_v42   ;;  %v458_v47 = vpop.permute.xlu0 %457  }
  0x9f   :  { %1419 = vst.msk [vmem:[%s3059_s1 - $0xa] ss:$8 sm:$0x30] %vm6_vm4, %v49_v42   ;;  %1420 = vst.msk [vmem:[%s3059_s1 - $0x19] ss:$8 sm:$0xc0] %vm6_vm4, %v49_v42   ;;  %v526_v48 = vpop.permute.xlu1 %525  }
  0xa0   :  { %1468 = vst.msk [vmem:[%s3059_s1 + $0x10] sm:$0xff] %vm139_vm5, %v2672_v0   ;;  %1478 = vst.msk [vmem:[%s3059_s1 + $0x18] sm:$0xff] %vm139_vm5, %v275_v19  }
  0xa1   :  { %1512 = vst.msk [vmem:[%s3059_s1 + $0x30] sm:$0xff] %vm322_vm6, %v435_v44   ;;  %1507 = vst.msk [vmem:[%s3059_s1 + $0x10] sm:$0xff] %vm322_vm6, %v412_v45  }
  0xa2   :  { %1522 = vst.msk [vmem:[%s3059_s1 + $0x38] sm:$0xff] %vm322_vm6, %v481_v46   ;;  %1517 = vst.msk [vmem:[%s3059_s1 + $0x18] sm:$0xff] %vm322_vm6, %v458_v47  }
  0xa3   :  { %1531 = vst.msk [vmem:[%s3059_s1 + $0x20] sm:$0xff] %vm505_vm7, %v526_v48   ;;  %v504_v49 = vpop.permute.xlu0 %503  }
  0xa4   :  { %506 = vst.msk [vmem:[%s3059_s1] sm:$0xff] %vm505_vm7, %v504_v49   ;;  %v572_v50 = vpop.permute.xlu1 %571  }
  0xa5   :  { %1541 = vst.msk [vmem:[%s3059_s1 + $0x28] sm:$0xff] %vm505_vm7, %v572_v50  }
  0xa8   :  { %v549_v51 = vpop.permute.xlu0 %548  }
  0xa9   :  { %1536 = vst.msk [vmem:[%s3059_s1 + $0x8] sm:$0xff] %vm505_vm7, %v549_v51   ;;  %v618_v52 = vpop.permute.xlu1 %617  }
  0xaa   :  { %1551 = vst.msk [vmem:[%s3059_s1 + $0x30] sm:$0xff] %vm505_vm7, %v618_v52  }
  0xad   :  { %v595_v53 = vpop.permute.xlu0 %594  }
  0xae   :  { %1546 = vst.msk [vmem:[%s3059_s1 + $0x10] sm:$0xff] %vm505_vm7, %v595_v53   ;;  %v664_v54 = vpop.permute.xlu1 %663  }
  0xaf   :  { %1561 = vst.msk [vmem:[%s3059_s1 + $0x38] sm:$0xff] %vm505_vm7, %v664_v54  }
  0xb2   :  { %v641_v55 = vpop.permute.xlu0 %640  }
  0xb3   :  { %1556 = vst.msk [vmem:[%s3059_s1 + $0x18] sm:$0xff] %vm505_vm7, %v641_v55   ;;  %v709_v56 = vpop.permute.xlu1 %708  }
  0xb4   :  { %1570 = vst.msk [vmem:[%s3059_s1 + $0x20] sm:$0xff] %vm688_vm8, %v709_v56  }
  0xb7   :  { %v687_v57 = vpop.permute.xlu0 %686  }
  0xb8   :  { %689 = vst.msk [vmem:[%s3059_s1] sm:$0xff] %vm688_vm8, %v687_v57   ;;  %v755_v58 = vpop.permute.xlu1 %754  }
  0xb9   :  { %1580 = vst.msk [vmem:[%s3059_s1 + $0x28] sm:$0xff] %vm688_vm8, %v755_v58  }
  0xbc   :  { %v732_v59 = vpop.permute.xlu0 %731  }
  0xbd   :  { %1575 = vst.msk [vmem:[%s3059_s1 + $0x8] sm:$0xff] %vm688_vm8, %v732_v59   ;;  %v801_v60 = vpop.permute.xlu1 %800  }
  0xbe   :  { %1590 = vst.msk [vmem:[%s3059_s1 + $0x30] sm:$0xff] %vm688_vm8, %v801_v60  }
  0xc1   :  { %v778_v61 = vpop.permute.xlu0 %777  }
  0xc2   :  { %1585 = vst.msk [vmem:[%s3059_s1 + $0x10] sm:$0xff] %vm688_vm8, %v778_v61   ;;  %v847_v62 = vpop.permute.xlu1 %846  }
  0xc3   :  { %1600 = vst.msk [vmem:[%s3059_s1 + $0x38] sm:$0xff] %vm688_vm8, %v847_v62  }
  0xc6   :  { %v824_v63 = vpop.permute.xlu0 %823  }
  0xc7   :  { %1595 = vst.msk [vmem:[%s3059_s1 + $0x18] sm:$0xff] %vm688_vm8, %v824_v63   ;;  %v892_v0 = vpop.permute.xlu1 %891  }
  0xc8   :  { %1609 = vst.msk [vmem:[%s3059_s1 + $0x20] sm:$0xff] %vm871_vm9, %v892_v0  }
  0xcb   :  { %v870_v1 = vpop.permute.xlu0 %869  }
  0xcc   :  { %872 = vst.msk [vmem:[%s3059_s1] sm:$0xff] %vm871_vm9, %v870_v1   ;;  %v938_v2 = vpop.permute.xlu1 %937  }
  0xcd   :  { %1619 = vst.msk [vmem:[%s3059_s1 + $0x28] sm:$0xff] %vm871_vm9, %v938_v2  }
  0xd0   :  { %v915_v3 = vpop.permute.xlu0 %914  }
  0xd1   :  { %1614 = vst.msk [vmem:[%s3059_s1 + $0x8] sm:$0xff] %vm871_vm9, %v915_v3   ;;  %v984_v4 = vpop.permute.xlu1 %983  }
  0xd2   :  { %1629 = vst.msk [vmem:[%s3059_s1 + $0x30] sm:$0xff] %vm871_vm9, %v984_v4  }
  0xd5   :  { %v961_v5 = vpop.permute.xlu0 %960  }
  0xd6   :  { %1624 = vst.msk [vmem:[%s3059_s1 + $0x10] sm:$0xff] %vm871_vm9, %v961_v5   ;;  %v1030_v6 = vpop.permute.xlu1 %1029  }
  0xd7   :  { %1639 = vst.msk [vmem:[%s3059_s1 + $0x38] sm:$0xff] %vm871_vm9, %v1030_v6  }
  0xda   :  { %v1007_v7 = vpop.permute.xlu0 %1006  }
  0xdb   :  { %1634 = vst.msk [vmem:[%s3059_s1 + $0x18] sm:$0xff] %vm871_vm9, %v1007_v7   ;;  %v1075_v8 = vpop.permute.xlu1 %1074  }
  0xdc   :  { %1648 = vst.msk [vmem:[%s3059_s1 + $0x20] sm:$0xff] %vm1054_vm10, %v1075_v8  }
  0xdf   :  { %v1053_v9 = vpop.permute.xlu0 %1052  }
  0xe0   :  { %1055 = vst.msk [vmem:[%s3059_s1] sm:$0xff] %vm1054_vm10, %v1053_v9   ;;  %v1121_v10 = vpop.permute.xlu1 %1120  }
  0xe1   :  { %1658 = vst.msk [vmem:[%s3059_s1 + $0x28] sm:$0xff] %vm1054_vm10, %v1121_v10  }
  0xe4   :  { %v1098_v11 = vpop.permute.xlu0 %1097  }
  0xe5   :  { %1653 = vst.msk [vmem:[%s3059_s1 + $0x8] sm:$0xff] %vm1054_vm10, %v1098_v11   ;;  %v1167_v12 = vpop.permute.xlu1 %1166  }
  0xe6   :  { %1668 = vst.msk [vmem:[%s3059_s1 + $0x30] sm:$0xff] %vm1054_vm10, %v1167_v12  }
  0xe9   :  { %v1144_v13 = vpop.permute.xlu0 %1143  }
  0xea   :  { %1663 = vst.msk [vmem:[%s3059_s1 + $0x10] sm:$0xff] %vm1054_vm10, %v1144_v13   ;;  %v1213_v14 = vpop.permute.xlu1 %1212  }
  0xeb   :  { %1678 = vst.msk [vmem:[%s3059_s1 + $0x38] sm:$0xff] %vm1054_vm10, %v1213_v14  }
  0xee   :  { %v1190_v15 = vpop.permute.xlu0 %1189  }
  0xef   :  { %1673 = vst.msk [vmem:[%s3059_s1 + $0x18] sm:$0xff] %vm1054_vm10, %v1190_v15   ;;  %v1258_v16 = vpop.permute.xlu1 %1257  }
  0xf0   :  { %1687 = vst.msk [vmem:[%s3059_s1 + $0x20] sm:$0xff] %vm1237_vm11, %v1258_v16  }
  0xf3   :  { %v1236_v17 = vpop.permute.xlu0 %1235  }
  0xf4   :  { %1238 = vst.msk [vmem:[%s3059_s1] sm:$0xff] %vm1237_vm11, %v1236_v17  }
  0xf5   :  { %v1304_v18 = vpop.permute.xlu1 %1303  }
  0xf6   :  { %1697 = vst.msk [vmem:[%s3059_s1 + $0x28] sm:$0xff] %vm1237_vm11, %v1304_v18  }
  0xf9   :  { %v1281_v19 = vpop.permute.xlu0 %1280  }
  0xfa   :  { %1692 = vst.msk [vmem:[%s3059_s1 + $0x8] sm:$0xff] %vm1237_vm11, %v1281_v19  }
  0xfd   :  { %v1350_v20 = vpop.permute.xlu1 %1349  }
  0xfe   :  { %1707 = vst.msk [vmem:[%s3059_s1 + $0x30] sm:$0xff] %vm1237_vm11, %v1350_v20  }
 0x101   :  { %v1327_v21 = vpop.permute.xlu0 %1326  }
 0x102   :  { %1702 = vst.msk [vmem:[%s3059_s1 + $0x10] sm:$0xff] %vm1237_vm11, %v1327_v21  }
 0x104   :  { %v1396_v22 = vpop.permute.xlu1 %1395  }
 0x105   :  { %1717 = vst.msk [vmem:[%s3059_s1 + $0x38] sm:$0xff] %vm1237_vm11, %v1396_v22  }
 0x108   :  { %v1373_v23 = vpop.permute.xlu0 %1372  }
 0x109   :  { %1712 = vst.msk [vmem:[%s3059_s1 + $0x18] sm:$0xff] %vm1237_vm11, %v1373_v23  }

// kernel: reg_loss.2
= control target key start
LH: loop header
LB: loop body
LE: loop exit
PB: predicated region body
PF: predicated region fallthrough
CT: control target
= control target key end

     0   :  { %s1188_s24 = smov 0   ;;  %s1559_s0 = inlined_call_operand.vmem [shape: f32[2,16,256], index: 0, kind: input, shape index: {}]   ;;  %s1560_s1 = inlined_call_operand.vmem [shape: f32[2,16,256], index: 1, kind: input, shape index: {}]   ;;  %s1561_s2 = inlined_call_operand.vmem [shape: f32[2,16,256], index: 2, kind: input, shape index: {}]   ;;  %s1562_s3 = inlined_call_operand.vmem [shape: f32[2,16,256], index: 3, kind: input, shape index: {}]   ;;  %s1563_s4 = inlined_call_operand.vmem [shape: f32[80,80], index: 4, kind: input, shape index: {}]   ;;  %s1564_s5 = inlined_call_operand.vmem [shape: f32[256,256], index: 5, kind: input, shape index: {}]   ;;  %s1565_s6 = inlined_call_operand.vmem [shape: f32[2,1,1], index: 6, kind: output, shape index: {0}]   ;;  %s1566_s7 = inlined_call_operand.vmem [shape: f32[2,1,1], index: 7, kind: output, shape index: {1}]  }
   0x1 LB: > { %s965_s25 = sadd.s32 4294967295, %s1145_s24   ;;  %p969_p0 = scmp.ge.s32.totalorder %s1145_s24, 1  ;;  %s1145_s24 = sphi %s1188_s24, %s18_s24  }
   0x2   : > { %p270_p1 = scmp.lt.s32.totalorder %s1145_s24, 3 }
   0x4   : > { %p271_p2 = pnand %p969_p0, %p270_p1 }
   0x5   : > { %p318_p3 = scmp.lt.s32.totalorder (!%p271_p2), %s965_s25, 1  ;;  %v1147_v0 = vmov (!%p271_p2), 0.0   ;;  %v363_v1 = vld [vmem:[%s1564_s5 + $0x8] sm:$0xff] (!%p271_p2)  ;;  %v365_v2 = vld [vmem:[%s1564_s5 + $0x18] sm:$0xff] (!%p271_p2)  ;;  %v362_v4 = vld [vmem:[%s1564_s5] sm:$0xff] (!%p271_p2)  ;;  %vm438_vm0 = vcmask (!%p271_p2), 654336  }
   0x6   : > { %274 = sbr.rel (%p271_p2) target bundleno = 801 (0x321), region = 44  ;;  %533 = vmatprep.mubr.f32.mxu0 (!%p271_p2), %v1147_v0  ;;  %v1208_v3 = vpack.c.bf16 (!%p271_p2), %v365_v2, %v363_v1  ;;  %v364_v5 = vld [vmem:[%s1564_s5 + $0x10] sm:$0xff] (!%p271_p2)  ;;  %v367_v6 = vld [vmem:[%s1564_s5 + $0x28] sm:$0xff] (!%p271_p2)  ;;  %v369_v8 = vld [vmem:[%s1564_s5 + $0x38] sm:$0xff] (!%p271_p2)  ;;  %vm796_vm1 = vcmask (!%p271_p2), 0  }
   0x7   : > { %v1227_v7 = vpack.c.bf16 (!%p271_p2), %v364_v5, %v362_v4  ;;  %v1232_v12 = vpack.c.bf16 (!%p271_p2), %v369_v8, %v367_v6  ;;  %v366_v13 = vld [vmem:[%s1564_s5 + $0x20] sm:$0xff] (!%p271_p2)  ;;  %v368_v24 = vld [vmem:[%s1564_s5 + $0x30] sm:$0xff] (!%p271_p2)  ;;  %v371_v25 = vld [vmem:[%s1564_s5 + $0x48] sm:$0xff] (!%p271_p2) }
   0x8   : > { %1078 = vmatprep.subr.bf16.mxu1 (!%p271_p2), %v1208_v3  ;;  %v373_v26 = vld [vmem:[%s1564_s5 + $0x58] sm:$0xff] (!%p271_p2)  ;;  %v1249_v30 = vpack.c.bf16 (!%p271_p2), %v368_v24, %v366_v13  ;;  %v370_v35 = vld [vmem:[%s1564_s5 + $0x40] sm:$0xff] (!%p271_p2)  ;;  %v372_v36 = vld [vmem:[%s1564_s5 + $0x50] sm:$0xff] (!%p271_p2) }
   0x9   : > { %1094 = vmatpush1.bf16.msra.mxu1 (!%p271_p2), %v1227_v7  ;;  %v1251_v34 = vpack.c.bf16 (!%p271_p2), %v373_v26, %v371_v25  ;;  %v375_v37 = vld [vmem:[%s1564_s5 + $0x68] sm:$0xff] (!%p271_p2)  ;;  %v377_v38 = vld [vmem:[%s1564_s5 + $0x78] sm:$0xff] (!%p271_p2)  ;;  %v1267_v42 = vpack.c.bf16 (!%p271_p2), %v372_v36, %v370_v35  ;;  %v374_v47 = vld [vmem:[%s1564_s5 + $0x60] sm:$0xff] (!%p271_p2) }
   0xa   : > { %1079 = vmatprep.subr.bf16.mxu1 (!%p271_p2), %v1232_v12  ;;  %v1269_v46 = vpack.c.bf16 (!%p271_p2), %v377_v38, %v375_v37  ;;  %v376_v48 = vld [vmem:[%s1564_s5 + $0x70] sm:$0xff] (!%p271_p2)  ;;  %v379_v49 = vld [vmem:[%s1564_s5 + $0x88] sm:$0xff] (!%p271_p2)  ;;  %v381_v50 = vld [vmem:[%s1564_s5 + $0x98] sm:$0xff] (!%p271_p2) }
   0xb   : > { %v1285_v54 = vpack.c.bf16 (!%p271_p2), %v376_v48, %v374_v47  ;;  %v1287_v56 = vpack.c.bf16 (!%p271_p2), %v381_v50, %v379_v49  ;;  %v378_v57 = vld [vmem:[%s1564_s5 + $0x80] sm:$0xff] (!%p271_p2)  ;;  %v380_v58 = vld [vmem:[%s1564_s5 + $0x90] sm:$0xff] (!%p271_p2)  ;;  %v383_v59 = vld [vmem:[%s1564_s5 + $0xa8] sm:$0xff] (!%p271_p2) }
   0xc   : > { %v385_v60 = vld [vmem:[%s1564_s5 + $0xb8] sm:$0xff] (!%p271_p2)  ;;  %v1303_v62 = vpack.c.bf16 (!%p271_p2), %v380_v58, %v378_v57  ;;  %v382_v1 = vld [vmem:[%s1564_s5 + $0xa0] sm:$0xff] (!%p271_p2)  ;;  %v384_v2 = vld [vmem:[%s1564_s5 + $0xb0] sm:$0xff] (!%p271_p2) }
   0xd   : > { %s1568_s25 = smov (!%p318_p3, %s965_s25), 1  ;;  %1095 = vmatpush1.bf16.msra.mxu1 %v1249_v30  ;;  %v1305_v63 = vpack.c.bf16 %v385_v60, %v383_v59  ;;  %v387_v4 = vld [vmem:[%s1564_s5 + $0xc8] sm:$0xff]  ;;  %v389_v5 = vld [vmem:[%s1564_s5 + $0xd8] sm:$0xff]  ;;  %v352_v6 = vld [vmem:[%s1563_s4] sm:$0xff]  ;;  %v1324_v8 = vpack.c.bf16 %v384_v2, %v382_v1 }
   0xe   : > { %s1206_s30 = sshll.u32 %s1568_s25, 5  ;;  %1080 = vmatprep.subr.bf16.mxu1 %v1251_v34  ;;  %v391_v13 = vld [vmem:[%s1564_s5 + $0xe8] sm:$0xff]  ;;  %v401_v25 = vld [vmem:[%s1564_s5 + $0x138] sm:$0xff]  ;;  %v402_v36 = vld [vmem:[%s1564_s5 + $0x140] sm:$0xff]  ;;  %s340_s27 = scalar_lea.vmem %s1565_s6, %s1568_s25 }
   0xf   : > { %s322_s16 = scalar_lea.vmem %s1559_s0, %s1206_s30  ;;  %s327_s19 = scalar_lea.vmem %s1560_s1, %s1206_s30  ;;  %v399_v24 = vld [vmem:[%s1564_s5 + $0x128] sm:$0xff]  ;;  %v355_v26 = vld [vmem:[%s1563_s4 + $0x18] sm:$0xff]  ;;  %v404_v37 = vld [vmem:[%s1564_s5 + $0x150] sm:$0xff] }
  0x10   : > { %v345_v9 = vld [vmem:[%s322_s16 + $0x8] sm:$0xff]  ;;  %v347_v10 = vld [vmem:[%s322_s16 + $0x18] sm:$0xff]  ;;  %v348_v16 = vld [vmem:[%s327_s19] sm:$0xff]  ;;  %s337_s20 = scalar_lea.vmem %s1562_s3, %s1206_s30  ;;  %s332_s23 = scalar_lea.vmem %s1561_s2, %s1206_s30 }
  0x11   : > { %v349_v11 = vld [vmem:[%s327_s19 + $0x8] sm:$0xff]  ;;  %v351_v14 = vld [vmem:[%s327_s19 + $0x18] sm:$0xff]  ;;  %v350_v17 = vld [vmem:[%s327_s19 + $0x10] sm:$0xff]  ;;  %v998_v21 = vpack.c.bf16 %v347_v10, %v345_v9  ;;  %v426_v28 = vmul.f32 %v348_v16, %v348_v16  ;;  %v431_v32 = vmul.f32 %v345_v9, %v345_v9  ;;  %v433_v33 = vmul.f32 %v347_v10, %v347_v10  ;;  %1096 = vmatpush1.bf16.msra.mxu1 %v1267_v42  ;;  %s343_s18 = scalar_lea.vmem %s1566_s7, %s1568_s25 }
  0x12   : > { %v427_v15 = vmul.f32 %v349_v11, %v349_v11  ;;  %v429_v18 = vmul.f32 %v351_v14, %v351_v14  ;;  %v994_v19 = vpack.c.bf16 %v351_v14, %v349_v11  ;;  %v996_v20 = vpack.c.bf16 %v350_v17, %v348_v16  ;;  %v344_v22 = vld [vmem:[%s322_s16] sm:$0xff]  ;;  %v346_v23 = vld [vmem:[%s322_s16 + $0x10] sm:$0xff]  ;;  %1081 = vmatprep.subr.bf16.mxu1 %v1269_v46  ;;  %v407_v38 = vld [vmem:[%s1564_s5 + $0x168] sm:$0xff] }
  0x13   : > { %v1000_v27 = vpack.c.bf16 %v346_v23, %v344_v22  ;;  %v428_v29 = vmul.f32 %v350_v17, %v350_v17  ;;  %v430_v40 = vmul.f32 %v344_v22, %v344_v22  ;;  %v432_v41 = vmul.f32 %v346_v23, %v346_v23  ;;  %v358_v47 = vld [vmem:[%s1563_s4 + $0x30] sm:$0xff]  ;;  %v410_v50 = vld [vmem:[%s1564_s5 + $0x180] sm:$0xff]  ;;  %v419_v59 = vld [vmem:[%s1564_s5 + $0x1c8] sm:$0xff] }
  0x14   : > { %995 = vmatprep.subr.bf16.mxu0 %v994_v19  ;;  %v1002_v31 = vpack.c.bf16 %v429_v18, %v427_v15  ;;  %v435_v43 = vmul.f32 %v349_v11, %v345_v9  ;;  %v437_v44 = vmul.f32 %v351_v14, %v347_v10  ;;  %v1006_v45 = vpack.c.bf16 %v433_v33, %v431_v32  ;;  %v386_v10 = vld [vmem:[%s1564_s5 + $0xc0] sm:$0xff]  ;;  %v388_v11 = vld [vmem:[%s1564_s5 + $0xd0] sm:$0xff]  ;;  %v393_v14 = vld [vmem:[%s1564_s5 + $0xf8] sm:$0xff] }
  0x15   : > { %997 = vmatpush1.bf16.msra.mxu0 %v996_v20  ;;  %v1004_v39 = vpack.c.bf16 %v428_v29, %v426_v28  ;;  %v1008_v51 = vpack.c.bf16 %v432_v41, %v430_v40  ;;  %v434_v52 = vmul.f32 %v348_v16, %v344_v22  ;;  %v436_v53 = vmul.f32 %v350_v17, %v346_v23  ;;  %v390_v17 = vld [vmem:[%s1564_s5 + $0xe0] sm:$0xff]  ;;  %v392_v18 = vld [vmem:[%s1564_s5 + $0xf0] sm:$0xff]  ;;  %v395_v19 = vld [vmem:[%s1564_s5 + $0x108] sm:$0xff] }
  0x16   : > { %999 = vmatprep.subr.bf16.mxu0 %v998_v21  ;;  %v1010_v55 = vpack.c.bf16 %v437_v44, %v435_v43  ;;  %1097 = vmatpush1.bf16.msra.mxu1 %v1285_v54  ;;  %v1327_v9 = vpack.c.bf16 %v389_v5, %v387_v4  ;;  %v1349_v15 = vpack.c.bf16 %v388_v11, %v386_v10  ;;  %v394_v22 = vld [vmem:[%s1564_s5 + $0x100] sm:$0xff]  ;;  %v396_v23 = vld [vmem:[%s1564_s5 + $0x110] sm:$0xff]  ;;  %v405_v32 = vld [vmem:[%s1564_s5 + $0x158] sm:$0xff] }
  0x17   : > { %1082 = vmatprep.subr.bf16.mxu1 %v1287_v56  ;;  %v1012_v61 = vpack.c.bf16 %v436_v53, %v434_v52  ;;  %v1352_v16 = vpack.c.bf16 %v393_v14, %v391_v13  ;;  %v1374_v20 = vpack.c.bf16 %v392_v18, %v390_v17  ;;  %v1402_v28 = vpack.c.bf16 %v401_v25, %v399_v24  ;;  %v398_v29 = vld [vmem:[%s1564_s5 + $0x120] sm:$0xff]  ;;  %v357_v40 = vld [vmem:[%s1563_s4 + $0x28] sm:$0xff]  ;;  %v408_v44 = vld [vmem:[%s1564_s5 + $0x170] sm:$0xff] }
  0x18   : > { %v356_v33 = vld [vmem:[%s1563_s4 + $0x20] sm:$0xff]  ;;  %v1056_v41 = vpack.c.bf16 %v404_v37, %v402_v36  ;;  %v415_v52 = vld [vmem:[%s1564_s5 + $0x1a8] sm:$0xff]  ;;  %v417_v53 = vld [vmem:[%s1564_s5 + $0x1b8] sm:$0xff] }
  0x19   : > { %1001 = vmatpush1.bf16.msra.mxu0 %v1000_v27  ;;  %v1399_v27 = vpack.c.bf16 %v396_v23, %v394_v22  ;;  %v406_v43 = vld [vmem:[%s1564_s5 + $0x160] sm:$0xff]  ;;  %v416_v58 = vld [vmem:[%s1564_s5 + $0x1b0] sm:$0xff]  ;;  %v421_v60 = vld [vmem:[%s1564_s5 + $0x1d8] sm:$0xff] }
  0x1a   : > { %1003 = vmatprep.subr.bf16.mxu0 %v1002_v31  ;;  %1098 = vmatpush1.bf16.msra.mxu1 %v1303_v62  ;;  %v403_v31 = vld [vmem:[%s1564_s5 + $0x148] sm:$0xff]  ;;  %v1060_v48 = vpack.c.bf16 %v408_v44, %v406_v43  ;;  %v414_v57 = vld [vmem:[%s1564_s5 + $0x1a0] sm:$0xff]  ;;  %v420_v2 = vld [vmem:[%s1564_s5 + $0x1d0] sm:$0xff] }
  0x1b   : > { %1083 = vmatprep.subr.bf16.mxu1 %v1305_v63  ;;  %v1427_v35 = vpack.c.bf16 %v405_v32, %v403_v31  ;;  %v418_v1 = vld [vmem:[%s1564_s5 + $0x1c0] sm:$0xff]  ;;  %v423_v4 = vld [vmem:[%s1564_s5 + $0x1e8] sm:$0xff]  ;;  %v425_v5 = vld [vmem:[%s1564_s5 + $0x1f8] sm:$0xff] }
  0x1c   : > { %v424_v10 = vld [vmem:[%s1564_s5 + $0x1f0] sm:$0xff]  ;;  %v803_v31 = vld [vmem:[%s337_s20 + $0x8] sm:$0xff]  ;;  %v798_v36 = vld [vmem:[%s332_s23] sm:$0xff] }
  0x1d   : > { %1005 = vmatpush1.bf16.msra.mxu0 %v1004_v39  ;;  %v409_v39 = vld [vmem:[%s1564_s5 + $0x178] sm:$0xff]  ;;  %v799_v37 = vld [vmem:[%s332_s23 + $0x8] sm:$0xff] }
  0x1e   : > { %1007 = vmatprep.subr.bf16.mxu0 %v1006_v45  ;;  %1099 = vmatpush1.bf16.msra.mxu1 %v1324_v8  ;;  %v411_v45 = vld [vmem:[%s1564_s5 + $0x188] sm:$0xff]  ;;  %v807_v43 = vmul.f32 %v803_v31, %v799_v37 }
  0x1f   : > { %1084 = vmatprep.subr.bf16.mxu1 %v1327_v9 }
  0x21   : > { %1009 = vmatpush1.bf16.msra.mxu0 %v1008_v51  ;;  %v412_v51 = vld [vmem:[%s1564_s5 + $0x190] sm:$0xff] }
  0x22   : > { %1011 = vmatprep.subr.bf16.mxu0 %v1010_v55  ;;  %1100 = vmatpush1.bf16.msra.mxu1 %v1349_v15  ;;  %v1064_v55 = vpack.c.bf16 %v412_v51, %v410_v50 }
  0x23   : > { %1085 = vmatprep.subr.bf16.mxu1 %v1352_v16 }
  0x25   : > { %1013 = vmatpush1.bf16.msra.mxu0 %v1012_v61  ;;  %v360_v61 = vld [vmem:[%s1563_s4 + $0x40] sm:$0xff] }
  0x26   : > { %1015 = vmatprep.subr.bf16.mxu0 %v1208_v3  ;;  %v353_v3 = vld [vmem:[%s1563_s4 + $0x8] sm:$0xff]  ;;  %1101 = vmatpush1.bf16.msra.mxu1 %v1374_v20 }
  0x28   : > { %978 = vmatmul.mubr.msk.f32.vlgmr.msra.gmra.mrb[0].mxu0 %vm438_vm0, %v352_v6  ;;  %v361_v6 = vld [vmem:[%s1563_s4 + $0x48] sm:$0xff] }
  0x29   : > { %539 = vmatprep.mubr.f32.mxu0 %v1147_v0  ;;  %1017 = vmatpush1.bf16.msra.mxu0 %v1227_v7  ;;  %v397_v7 = vld [vmem:[%s1564_s5 + $0x118] sm:$0xff] }
  0x2a   : > { %1019 = vmatprep.subr.bf16.mxu0 %v1232_v12  ;;  %v354_v12 = vld [vmem:[%s1563_s4 + $0x10] sm:$0xff]  ;;  %v1377_v21 = vpack.c.bf16 %v397_v7, %v395_v19 }
  0x2c   : > { %979 = vmatmul.mubr.msk.f32.gmra.mrb[2].mxu0 %vm438_vm0, %v353_v3  ;;  %1086 = vmatprep.subr.bf16.mxu1 %v1377_v21 }
  0x2d   : > { %545 = vmatprep.mubr.f32.mxu0 %v1147_v0  ;;  %1021 = vmatpush1.bf16.msra.mxu0 %v1249_v30  ;;  %v400_v30 = vld [vmem:[%s1564_s5 + $0x130] sm:$0xff] }
  0x2e   : > { %1023 = vmatprep.subr.bf16.mxu0 %v1251_v34  ;;  %1102 = vmatpush1.bf16.msra.mxu1 %v1399_v27  ;;  %v1424_v34 = vpack.c.bf16 %v400_v30, %v398_v29  ;;  %v802_v30 = vld [vmem:[%s337_s20] sm:$0xff] }
  0x2f   : > { %1087 = vmatprep.subr.bf16.mxu1 %v1402_v28  ;;  %v822_v32 = vadd.f32 %v803_v31, %v802_v30 }
  0x30   : > { %980 = vmatmul.mubr.msk.f32.gmra.mrb[4].mxu0 %vm438_vm0, %v354_v12 }
  0x31   : > { %551 = vmatprep.mubr.f32.mxu0 %v1147_v0  ;;  %1025 = vmatpush1.bf16.msra.mxu0 %v1267_v42  ;;  %v1058_v42 = vpack.c.bf16 %v409_v39, %v407_v38  ;;  %v834_v39 = vadd.f32 %v799_v37, %v798_v36 }
  0x32   : > { %1027 = vmatprep.subr.bf16.mxu0 %v1269_v46  ;;  %1103 = vmatpush1.bf16.msra.mxu1 %v1424_v34  ;;  %v413_v46 = vld [vmem:[%s1564_s5 + $0x198] sm:$0xff] }
  0x33   : > { %1088 = vmatprep.subr.bf16.mxu1 %v1427_v35  ;;  %v1062_v49 = vpack.c.bf16 %v413_v46, %v411_v45 }
  0x34   : > { %981 = vmatmul.mubr.msk.f32.gmra.mrb[6].mxu0 %vm438_vm0, %v355_v26 }
  0x35   : > { %557 = vmatprep.mubr.f32.mxu0 %v1147_v0  ;;  %1029 = vmatpush1.bf16.msra.mxu0 %v1285_v54  ;;  %v359_v54 = vld [vmem:[%s1563_s4 + $0x38] sm:$0xff] }
  0x36   : > { %1031 = vmatprep.subr.bf16.mxu0 %v1287_v56  ;;  %1104 = vmatpush1.bf16.msra.mxu1 %v1056_v41  ;;  %v1066_v56 = vpack.c.bf16 %v417_v53, %v415_v52 }
  0x37   : > { %1089 = vmatprep.subr.bf16.mxu1 %v1058_v42 }
  0x38   : > { %982 = vmatmul.mubr.msk.f32.gmra.mrb[8].mxu0 %vm438_vm0, %v356_v33  ;;  %v804_v33 = vld [vmem:[%s337_s20 + $0x10] sm:$0xff] }
  0x39   : > { %563 = vmatprep.mubr.f32.mxu0 %v1147_v0  ;;  %1033 = vmatpush1.bf16.msra.mxu0 %v1303_v62  ;;  %v1068_v62 = vpack.c.bf16 %v416_v58, %v414_v57 }
  0x3a   : > { %1035 = vmatprep.subr.bf16.mxu0 %v1305_v63  ;;  %1105 = vmatpush1.bf16.msra.mxu1 %v1060_v48  ;;  %v1070_v63 = vpack.c.bf16 %v421_v60, %v419_v59 }
  0x3b   : > { %1090 = vmatprep.subr.bf16.mxu1 %v1062_v49 }
  0x3c   : > { %983 = vmatmul.mubr.msk.f32.gmra.mrb[10].mxu0 %vm438_vm0, %v357_v40  ;;  %v800_v40 = vld [vmem:[%s332_s23 + $0x10] sm:$0xff] }
  0x3d   : > { %569 = vmatprep.mubr.f32.mxu0 %v1147_v0  ;;  %1037 = vmatpush1.bf16.msra.mxu0 %v1324_v8  ;;  %v1072_v8 = vpack.c.bf16 %v420_v2, %v418_v1  ;;  %v808_v44 = vmul.f32 %v804_v33, %v800_v40  ;;  %v835_v45 = vadd.f32 %v834_v39, %v800_v40 }
  0x3e   : > { %1039 = vmatprep.subr.bf16.mxu0 %v1327_v9  ;;  %1106 = vmatpush1.bf16.msra.mxu1 %v1064_v55  ;;  %v1074_v9 = vpack.c.bf16 %v425_v5, %v423_v4 }
  0x3f   : > { %1091 = vmatprep.subr.bf16.mxu1 %v1066_v56 }
  0x40   : > { %984 = vmatmul.mubr.msk.f32.gmra.mrb[12].mxu0 %vm438_vm0, %v358_v47 }
  0x41   : > { %575 = vmatprep.mubr.f32.mxu0 %v1147_v0  ;;  %1041 = vmatpush1.bf16.msra.mxu0 %v1349_v15 }
  0x42   : > { %1043 = vmatprep.subr.bf16.mxu0 %v1352_v16  ;;  %1107 = vmatpush1.bf16.msra.mxu1 %v1068_v62 }
  0x43   : > { %1092 = vmatprep.subr.bf16.mxu1 %v1070_v63 }
  0x44   : > { %985 = vmatmul.mubr.msk.f32.gmra.mrb[14].mxu0 %vm438_vm0, %v359_v54 }
  0x45   : > { %581 = vmatprep.mubr.f32.mxu0 %v1147_v0  ;;  %1045 = vmatpush1.bf16.msra.mxu0 %v1374_v20 }
  0x46   : > { %1047 = vmatprep.subr.bf16.mxu0 %v1377_v21  ;;  %1108 = vmatpush1.bf16.msra.mxu1 %v1072_v8 }
  0x47   : > { %1093 = vmatprep.subr.bf16.mxu1 %v1074_v9 }
  0x48   : > { %986 = vmatmul.mubr.msk.f32.gmra.mrb[16].mxu0 %vm438_vm0, %v360_v61 }
  0x49   : > { %587 = vmatprep.mubr.f32.mxu0 %v1147_v0  ;;  %1049 = vmatpush1.bf16.msra.mxu0 %v1399_v27  ;;  %v422_v0 = vld [vmem:[%s1564_s5 + $0x1e0] sm:$0xff] }
  0x4a   : > { %1051 = vmatprep.subr.bf16.mxu0 %v1402_v28  ;;  %v1076_v11 = vpack.c.bf16 %v424_v10, %v422_v0 }
  0x4c   : > { %987 = vmatmul.mubr.msk.f32.gmra.mrb[18].mxu0 %vm438_vm0, %v361_v6  ;;  %1109 = vmatpush1.bf16.msra.mxu1 %v1076_v11 }
  0x4d   : > { %1053 = vmatpush1.bf16.msra.mxu0 %v1424_v34  ;;  %v823_v34 = vadd.f32 %v822_v32, %v804_v33 }
  0x4e   : > { %1055 = vmatprep.subr.bf16.mxu0 %v1427_v35  ;;  %v805_v35 = vld [vmem:[%s337_s20 + $0x18] sm:$0xff] }
  0x4f   : > { %v824_v38 = vadd.f32 %v823_v34, %v805_v35 }
  0x51   : > { %1057 = vmatpush1.bf16.msra.mxu0 %v1056_v41  ;;  %825 = vadd.xlane.f32.xlu1 %v824_v38  ;;  %v801_v41 = vld [vmem:[%s332_s23 + $0x18] sm:$0xff] }
  0x52   : > { %1059 = vmatprep.subr.bf16.mxu0 %v1058_v42  ;;  %v806_v42 = vmul.f32 %v802_v30, %v798_v36  ;;  %v809_v46 = vmul.f32 %v805_v35, %v801_v41  ;;  %v836_v47 = vadd.f32 %v835_v45, %v801_v41 }
  0x55   : > { %1061 = vmatpush1.bf16.msra.mxu0 %v1060_v48  ;;  %837 = vadd.xlane.f32.xlu1 %v836_v47  ;;  %v810_v48 = vadd.f32 %v807_v43, %v806_v42 }
  0x56   : > { %1063 = vmatprep.subr.bf16.mxu0 %v1062_v49 }
  0x57   : > { %v811_v49 = vadd.f32 %v810_v48, %v808_v44 }
  0x59   : > { %1065 = vmatpush1.bf16.msra.mxu0 %v1064_v55  ;;  %v1543_v50 = vadd.f32 %v811_v49, %v809_v46 }
  0x5a   : > { %1067 = vmatprep.subr.bf16.mxu0 %v1066_v56 }
  0x5d   : > { %1069 = vmatpush1.bf16.msra.mxu0 %v1068_v62 }
  0x5e   : > { %1071 = vmatprep.subr.bf16.mxu0 %v1070_v63 }
  0x61   : > { %1073 = vmatpush1.bf16.msra.mxu0 %v1072_v8 }
  0x62   : > { %1075 = vmatprep.subr.bf16.mxu0 %v1074_v9 }
  0x65   : > { %1077 = vmatpush1.bf16.msra.mxu0 %v1076_v11 }
  0xfb   : > { %v535_v13 = vpop.f32.mrb[0].mxu0 }
  0xfc   : > { %v537_v14 = vpop.f32.mrb[1].mxu0 }
  0xfd   : > { %658 = vmatprep.mubr.f32.mxu0 %v537_v14 }
  0xfe   : > { %659 = vmatmul.mubr.f32.vlgmr.msra.gmra.mrb[20].mxu0 %v535_v13 }
  0xff   : > { %v541_v3 = vpop.f32.mrb[2].mxu0 }
 0x100   : > { %v543_v15 = vpop.f32.mrb[3].mxu0 }
 0x101   : > { %664 = vmatprep.mubr.f32.mxu0 %v543_v15 }
 0x102   : > { %665 = vmatmul.mubr.f32.gmra.mrb[22].mxu0 %v541_v3 }
 0x103   : > { %v547_v16 = vpop.f32.mrb[4].mxu0 }
 0x104   : > { %v549_v17 = vpop.f32.mrb[5].mxu0 }
 0x105   : > { %670 = vmatprep.mubr.f32.mxu1 %v549_v17 }
 0x106   : > { %671 = vmatmul.mubr.f32.vlgmr.msra.gmra.mrb[0].mxu1 %v547_v16 }
 0x107   : > { %v553_v18 = vpop.f32.mrb[6].mxu0 }
 0x108   : > { %v555_v19 = vpop.f32.mrb[7].mxu0 }
 0x109   : > { %676 = vmatprep.mubr.f32.mxu1 %v555_v19 }
 0x10a   : > { %677 = vmatmul.mubr.f32.gmra.mrb[2].mxu1 %v553_v18 }
 0x10b   : > { %v559_v7 = vpop.f32.mrb[8].mxu0 }
 0x10c   : > { %v561_v12 = vpop.f32.mrb[9].mxu0 }
 0x10d   : > { %682 = vmatprep.mubr.f32.mxu1 %v561_v12 }
 0x10e   : > { %683 = vmatmul.mubr.f32.gmra.mrb[4].mxu1 %v559_v7 }
 0x10f   : > { %v565_v20 = vpop.f32.mrb[10].mxu0 }
 0x110   : > { %v567_v21 = vpop.f32.mrb[11].mxu0 }
 0x111   : > { %688 = vmatprep.mubr.f32.mxu1 %v567_v21 }
 0x112   : > { %689 = vmatmul.mubr.f32.gmra.mrb[6].mxu1 %v565_v20 }
 0x113   : > { %v571_v22 = vpop.f32.mrb[12].mxu0 }
 0x114   : > { %v573_v23 = vpop.f32.mrb[13].mxu0 }
 0x115   : > { %694 = vmatprep.mubr.f32.mxu1 %v573_v23 }
 0x116   : > { %695 = vmatmul.mubr.f32.gmra.mrb[8].mxu1 %v571_v22 }
 0x117   : > { %v577_v24 = vpop.f32.mrb[14].mxu0 }
 0x118   : > { %v579_v25 = vpop.f32.mrb[15].mxu0 }
 0x119   : > { %700 = vmatprep.mubr.f32.mxu1 %v579_v25 }
 0x11a   : > { %701 = vmatmul.mubr.f32.gmra.mrb[10].mxu1 %v577_v24 }
 0x11b   : > { %v583_v26 = vpop.f32.mrb[16].mxu0 }
 0x11c   : > { %v585_v27 = vpop.f32.mrb[17].mxu0 }
 0x11d   : > { %706 = vmatprep.mubr.f32.mxu1 %v585_v27 }
 0x11e   : > { %707 = vmatmul.mubr.f32.gmra.mrb[12].mxu1 %v583_v26 }
 0x11f   : > { %v589_v28 = vpop.f32.mrb[18].mxu0 }
 0x120   : > { %v591_v29 = vpop.f32.mrb[19].mxu0 }
 0x121   : > { %712 = vmatprep.mubr.f32.mxu1 %v591_v29 }
 0x122   : > { %713 = vmatmul.mubr.f32.gmra.mrb[14].mxu1 %v589_v28 }
 0x1d1   : > { %v660_v51 = vpop.f32.mrb[20].mxu0 }
 0x1d2   : > { %v662_v52 = vpop.f32.mrb[21].mxu0  ;;  %v719_v59 = vmul.f32 0.002915452, %v660_v51 }
 0x1d3   : > { %v720_v61 = vmul.f32 0.002915452, %v662_v52 }
 0x1d4   : > { %v735_v6 = vmul.f32 %v719_v59, %v660_v51 }
 0x1d5   : > { %v666_v53 = vpop.f32.mrb[22].mxu0  ;;  %v736_v10 = vmul.f32 %v720_v61, %v662_v52 }
 0x1d6   : > { %v668_v54 = vpop.f32.mrb[23].mxu0  ;;  %v721_v5 = vmul.f32 0.002915452, %v666_v53 }
 0x1d7   : > { %v722_v9 = vmul.f32 0.002915452, %v668_v54 }
 0x1d8   : > { %v737_v15 = vmul.f32 %v721_v5, %v666_v53 }
 0x1d9   : > { %v672_v55 = vpop.f32.mrb[0].mxu1  ;;  %v738_v16 = vmul.f32 %v722_v9, %v668_v54 }
 0x1da   : > { %v723_v56 = vmul.f32 0.002915452, %v672_v55  ;;  %v674_v57 = vpop.f32.mrb[1].mxu1 }
 0x1db   : > { %v724_v58 = vmul.f32 0.002915452, %v674_v57 }
 0x1dc   : > { %v727_v60 = vmul.f32 %v723_v56, %v660_v51  ;;  %v747_v12 = vmul.f32 %v723_v56, %v672_v55 }
 0x1dd   : > { %v678_v62 = vpop.f32.mrb[2].mxu1  ;;  %v728_v63 = vmul.f32 %v724_v58, %v662_v52  ;;  %v748_v20 = vmul.f32 %v724_v58, %v674_v57 }
 0x1de   : > { %v725_v1 = vmul.f32 0.002915452, %v678_v62  ;;  %v680_v2 = vpop.f32.mrb[3].mxu1 }
 0x1df   : > { %v726_v4 = vmul.f32 0.002915452, %v680_v2 }
 0x1e0   : > { %v729_v8 = vmul.f32 %v725_v1, %v666_v53  ;;  %v749_v25 = vmul.f32 %v725_v1, %v678_v62 }
 0x1e1   : > { %v684_v0 = vpop.f32.mrb[4].mxu1  ;;  %v730_v11 = vmul.f32 %v726_v4, %v668_v54  ;;  %v750_v28 = vmul.f32 %v726_v4, %v680_v2 }
 0x1e2   : > { %v739_v13 = vsub.f32 %v684_v0, %v735_v6  ;;  %v686_v14 = vpop.f32.mrb[5].mxu1 }
 0x1e3   : > { %v740_v3 = vsub.f32 %v686_v14, %v736_v10 }
 0x1e4   : > { %v743_v26 = vmax.f32 %v739_v13, 0.0 }
 0x1e5   : > { %v690_v17 = vpop.f32.mrb[6].mxu1  ;;  %v744_v29 = vmax.f32 %v740_v3, 0.0 }
 0x1e6   : > { %v741_v18 = vsub.f32 %v690_v17, %v737_v15  ;;  %v692_v19 = vpop.f32.mrb[7].mxu1 }
 0x1e7   : > { %v742_v7 = vsub.f32 %v692_v19, %v738_v16 }
 0x1e8   : > { %v745_v37 = vmax.f32 %v741_v18, 0.0 }
 0x1e9   : > { %v696_v21 = vpop.f32.mrb[8].mxu1  ;;  %v746_v40 = vmax.f32 %v742_v7, 0.0 }
 0x1ea   : > { %v751_v22 = vsub.f32 %v696_v21, %v747_v12  ;;  %v698_v23 = vpop.f32.mrb[9].mxu1 }
 0x1eb   : > { %v752_v24 = vsub.f32 %v698_v23, %v748_v20 }
 0x1ec   : > { %v755_v27 = vmax.f32 %v751_v22, 0.0 }
 0x1ed   : > { %v756_v30 = vmax.f32 %v752_v24, 0.0  ;;  %v702_v31 = vpop.f32.mrb[10].mxu1 }
 0x1ee   : > { %v767_v32 = vmul.f32 %v755_v27, %v743_v26  ;;  %v753_v33 = vsub.f32 %v702_v31, %v749_v25  ;;  %v704_v34 = vpop.f32.mrb[11].mxu1 }
 0x1ef   : > { %v768_v35 = vmul.f32 %v756_v30, %v744_v29  ;;  %v754_v36 = vsub.f32 %v704_v34, %v750_v28 }
 0x1f0   : > { %v771_v38 = vadd.f32 1e-05, %v767_v32  ;;  %v757_v39 = vmax.f32 %v753_v33, 0.0 }
 0x1f1   : > { %v772_v41 = vadd.f32 1e-05, %v768_v35  ;;  %v758_v42 = vmax.f32 %v754_v36, 0.0  ;;  %v708_v43 = vpop.f32.mrb[12].mxu1 }
 0x1f2   : > { %1129 = vrcp.f32 %v771_v38  ;;  %v769_v44 = vmul.f32 %v757_v39, %v745_v37  ;;  %v731_v45 = vsub.f32 %v708_v43, %v727_v60  ;;  %v710_v46 = vpop.f32.mrb[13].mxu1 }
 0x1f3   : > { %1131 = vrcp.f32 %v772_v41  ;;  %v770_v47 = vmul.f32 %v758_v42, %v746_v40  ;;  %v732_v48 = vsub.f32 %v710_v46, %v728_v63 }
 0x1f4   : > { %v773_v49 = vadd.f32 1e-05, %v769_v44  ;;  %v759_v56 = vmul.f32 %v731_v45, %v731_v45 }
 0x1f5   : > { %v774_v51 = vadd.f32 1e-05, %v770_v47  ;;  %v714_v52 = vpop.f32.mrb[14].mxu1  ;;  %v760_v58 = vmul.f32 %v732_v48, %v732_v48 }
 0x1f6   : > { %1133 = vrcp.f32 %v773_v49  ;;  %v733_v53 = vsub.f32 %v714_v52, %v729_v8  ;;  %v716_v54 = vpop.f32.mrb[15].mxu1  ;;  %v826_v8 = vpop.xlane.xlu1 %825 }
 0x1f7   : > { %1135 = vrcp.f32 %v774_v51  ;;  %v734_v55 = vsub.f32 %v716_v54, %v730_v11  ;;  %v827_v11 = vrot.slane %v826_v8, 4 }
 0x1f8   : > { %v761_v1 = vmul.f32 %v733_v53, %v733_v53 }
 0x1f9   : > { %v762_v2 = vmul.f32 %v734_v55, %v734_v55  ;;  %v828_v14 = vadd.f32 %v827_v11, %v826_v8 }
 0x1fa   : > { %v838_v10 = vpop.xlane.xlu1 %837 }
 0x1fb   : > { %v839_v13 = vrot.slane %v838_v10, 4  ;;  %v829_v18 = vrot.slane %v828_v14, 2 }
 0x1fc   : > { %v1130_v57 = vpop.eup %1129 }
 0x1fd   : > { %v1132_v59 = vpop.eup %1131  ;;  %v776_v61 = vmul.f32 %v1130_v57, %v759_v56  ;;  %v840_v15 = vadd.f32 %v839_v13, %v838_v10  ;;  %v830_v23 = vadd.f32 %v829_v18, %v828_v14 }
 0x1fe   : > { %v778_v62 = vmul.f32 %v1132_v59, %v760_v58 }
 0x1ff   : > { %v841_v7 = vrot.slane %v840_v15, 2  ;;  %v831_v28 = vrot.slane %v830_v23, 1 }
 0x200   : > { %v1134_v60 = vpop.eup %1133  ;;  %v783_v4 = vadd.f32 %v778_v62, %v776_v61 }
 0x201   : > { %v1136_v5 = vpop.eup %1135  ;;  %v780_v63 = vmul.f32 %v1134_v60, %v761_v1  ;;  %v842_v24 = vadd.f32 %v841_v7, %v840_v15  ;;  %v832_v32 = vadd.f32 %v831_v28, %v830_v23 }
 0x202   : > { %v782_v6 = vmul.f32 %v1136_v5, %v762_v2 }
 0x203   : > { %v784_v9 = vadd.f32 %v783_v4, %v780_v63  ;;  %v843_v30 = vrot.slane %v842_v24, 1 }
 0x205   : > { %v785_v0 = vadd.f32 %v784_v9, %v782_v6  ;;  %v844_v33 = vadd.f32 %v843_v30, %v842_v24 }
 0x207   : > { %786 = vadd.xlane.f32.xlu0 %v785_v0 }
 0x20b   : > { %813 = vadd.xlane.f32.xlu0 %v1543_v50 }
 0x294   : > { %v787_v3 = vpop.xlane.xlu0 %786 }
 0x295   : > { %v788_v16 = vrot.slane %v787_v3, 4 }
 0x297   : > { %v789_v17 = vadd.f32 %v788_v16, %v787_v3 }
 0x298   : > { %v814_v19 = vpop.xlane.xlu0 %813 }
 0x299   : > { %v790_v12 = vrot.slane %v789_v17, 2  ;;  %v815_v20 = vrot.slane %v814_v19, 4 }
 0x29b   : > { %v816_v21 = vadd.f32 %v815_v20, %v814_v19  ;;  %v791_v22 = vadd.f32 %v790_v12, %v789_v17 }
 0x29d   : > { %v817_v50 = vrot.slane %v816_v21, 2  ;;  %v792_v25 = vrot.slane %v791_v22, 1 }
 0x29f   : > { %v818_v26 = vadd.f32 %v817_v50, %v816_v21  ;;  %v793_v27 = vadd.f32 %v792_v25, %v791_v22 }
 0x2a1   : > { %1110 = vpush %v793_v27  ;;  %v819_v29 = vrot.slane %v818_v26, 1 }
 0x2a3   : > { %v820_v31 = vadd.f32 %v819_v29, %v818_v26 }
 0x2a5   : > { %1112 = vpush %v820_v31 }
 0x2a6   : > { %1114 = vpush %v832_v32 }
 0x2a7   : > { %1116 = vpush %v844_v33 }
 0x2d2   : > { %s1111_s28 = spop %1110 }
 0x2d3   : > { %v795_v34 = vstv %s1111_s28 }
 0x2d4   : > { %797 = vst.msk [vmem:[%s340_s27] sm:$0x1] %vm796_vm1, %v795_v34 }
 0x2d6   : > { %s1113_s29 = spop %1112 }
 0x2d7   : > { %s1115_s8 = spop %1114  ;;  %s847_s12 = smul.f32 2.0, %s1113_s29 }
 0x2d8   : > { %s1117_s9 = spop %1116 }
 0x2d9   : > { %s846_s10 = sadd.f32 %s1117_s9, %s1115_s8 }
 0x2da   : > { %s848_s13 = sadd.f32 1e-05, %s847_s12 }
 0x2db   : > { %s849_s11 = sadd.f32 1e-05, %s846_s10 }
 0x2dd   : > { %v850_v35 = vstv %s849_s11 }
 0x2de   : > { %1137 = vrcp.f32 %v850_v35 }
 0x2e8   : > { %v1138_v36 = vpop.eup %1137 }
 0x2e9   : > { %1118 = vpush %v1138_v36 }
 0x31a   : > { %s1119_s14 = spop %1118 }
 0x31b   : > { %s853_s15 = smul.f32 %s1119_s14, %s848_s13 }
 0x31d   : > { %s854_s19 = ssub.f32 1.0, %s853_s15 }
 0x31f   : > { %v855_v37 = vstv %s854_s19 }
 0x320   : > { %856 = vst.msk [vmem:[%s343_s18] sm:$0x1] %vm796_vm1, %v855_v37 }
 0x321 PF: > { %s18_s24 = sadd.s32 1, %s1145_s24  }
 0x322   : > { %p15_p4 = scmp.ge.s32.totalorder %s18_s24, 4  }
 0x324   :  { %17 = sbr.rel (!%p15_p4) target bundleno = 1 (0x1), region = 95 }

// kernel: reg_loss.3
= control target key start
LH: loop header
LB: loop body
LE: loop exit
PB: predicated region body
PF: predicated region fallthrough
CT: control target
= control target key end

     0   :  { %s1822_s15 = smov 0   ;;  %s2894_s0 = inlined_call_operand.vmem [shape: f32[2,48,256], index: 0, kind: input, shape index: {}]   ;;  %s2895_s1 = inlined_call_operand.vmem [shape: f32[48,48], index: 1, kind: input, shape index: {}]   ;;  %s2896_s2 = inlined_call_operand.vmem [shape: f32[256,512], index: 2, kind: input, shape index: {}]   ;;  %s2897_s3 = inlined_call_operand.vmem [shape: f32[48,256], index: 3, kind: input, shape index: {}]   ;;  %s2898_s4 = inlined_call_operand.vmem [shape: f32[2,1,1], index: 4, kind: output, shape index: {}]  }
   0x1 LB: > { %s1434_s16 = sadd.s32 4294967295, %s1794_s15   ;;  %p1438_p0 = scmp.ge.s32.totalorder %s1794_s15, 1  ;;  %s1794_s15 = sphi %s1822_s15, %s14_s15  }
   0x2   : > { %p162_p1 = scmp.lt.s32.totalorder %s1794_s15, 3 }
   0x4   : > { %p163_p2 = pnand %p1438_p0, %p162_p1 }
   0x6   : > { %166 = sbr.rel (%p163_p2) target bundleno = 833 (0x341), region = 36 }
   0xd   : > { %v213_v0 = vld [vmem:[%s2896_s2 + $0x8] sm:$0xff]  ;;  %v212_v2 = vld [vmem:[%s2896_s2] sm:$0xff]  ;;  %p186_p3 = scmp.lt.s32.totalorder %s1434_s16, 1  ;;  %v2899_v7 = vmov 0.0   ;;  %v215_v47 = vld [vmem:[%s2896_s2 + $0x18] sm:$0xff]  ;;  %vm352_vm0 = vcmask 392192  }
   0xe   : > { %v217_v1 = vld [vmem:[%s2896_s2 + $0x28] sm:$0xff]  ;;  %v216_v4 = vld [vmem:[%s2896_s2 + $0x20] sm:$0xff]  ;;  %435 = vmatprep.mubr.f32.mxu0 %v2899_v7  ;;  %v219_v48 = vld [vmem:[%s2896_s2 + $0x38] sm:$0xff]  ;;  %vm1385_vm1 = vcmask 0  }
   0xf   : > { %v1839_v3 = vpack.c.bf16 %v217_v1, %v213_v0  ;;  %v221_v5 = vld [vmem:[%s2896_s2 + $0x48] sm:$0xff]  ;;  %v1851_v8 = vpack.c.bf16 %v216_v4, %v212_v2  ;;  %v220_v10 = vld [vmem:[%s2896_s2 + $0x40] sm:$0xff]  ;;  %s2985_s16 = smov (!%p186_p3, %s1434_s16), 1  ;;  %v1991_v54 = vpack.c.bf16 %v219_v48, %v215_v47  ;;  %v214_v55 = vld [vmem:[%s2896_s2 + $0x10] sm:$0xff] }
  0x10   : > { %v225_v6 = vld [vmem:[%s2896_s2 + $0x68] sm:$0xff]  ;;  %v224_v11 = vld [vmem:[%s2896_s2 + $0x60] sm:$0xff]  ;;  %s1766_s11 = smul.u32 96, %s2985_s16  ;;  %v218_v56 = vld [vmem:[%s2896_s2 + $0x30] sm:$0xff]  ;;  %s193_s19 = scalar_lea.vmem %s2898_s4, %s2985_s16 }
  0x11   : > { %v1853_v9 = vpack.c.bf16 %v225_v6, %v221_v5  ;;  %v229_v12 = vld [vmem:[%s2896_s2 + $0x88] sm:$0xff]  ;;  %1467 = vmatprep.subr.bf16.mxu1 %v1839_v3  ;;  %v1871_v14 = vpack.c.bf16 %v224_v11, %v220_v10  ;;  %v228_v16 = vld [vmem:[%s2896_s2 + $0x80] sm:$0xff]  ;;  %v223_v59 = vld [vmem:[%s2896_s2 + $0x58] sm:$0xff]  ;;  %v2022_v0 = vpack.c.bf16 %v218_v56, %v214_v55 }
  0x12   : > { %v233_v13 = vld [vmem:[%s2896_s2 + $0xa8] sm:$0xff]  ;;  %1469 = vmatpush1.bf16.msra.mxu1 %v1851_v8  ;;  %v232_v17 = vld [vmem:[%s2896_s2 + $0xa0] sm:$0xff]  ;;  %s1886_s20 = scalar_lea.vmem %s2894_s0, %s1766_s11  ;;  %v227_v60 = vld [vmem:[%s2896_s2 + $0x78] sm:$0xff] }
  0x13   : > { %1471 = vmatprep.subr.bf16.mxu1 %v1853_v9  ;;  %v1875_v15 = vpack.c.bf16 %v233_v13, %v229_v12  ;;  %v237_v18 = vld [vmem:[%s2896_s2 + $0xc8] sm:$0xff]  ;;  %v1898_v21 = vld [vmem:[%s1886_s20 + $0x18] sm:$0xff]  ;;  %v1901_v22 = vld [vmem:[%s1886_s20] sm:$0xff]  ;;  %v1915_v27 = vpack.c.bf16 %v232_v17, %v228_v16  ;;  %v2031_v4 = vpack.c.bf16 %v227_v60, %v223_v59 }
  0x14   : > { %v241_v19 = vld [vmem:[%s2896_s2 + $0xe8] sm:$0xff]  ;;  %v236_v23 = vld [vmem:[%s2896_s2 + $0xc0] sm:$0xff]  ;;  %v1913_v26 = vld [vmem:[%s1886_s20 + $0x10] sm:$0xff] }
  0x15   : > { %v1895_v20 = vld [vmem:[%s1886_s20 + $0x8] sm:$0xff]  ;;  %v240_v24 = vld [vmem:[%s2896_s2 + $0xe0] sm:$0xff]  ;;  %v1921_v29 = vld [vmem:[%s1886_s20 + $0x38] sm:$0xff]  ;;  %v1456_v30 = vpack.c.bf16 %v1913_v26, %v1901_v22  ;;  %v1935_v34 = vpack.c.bf16 %v241_v19, %v237_v18 }
  0x16   : > { %1473 = vmatpush1.bf16.msra.mxu1 %v1871_v14  ;;  %v1454_v25 = vpack.c.bf16 %v1898_v21, %v1895_v20  ;;  %v1918_v28 = vld [vmem:[%s1886_s20 + $0x28] sm:$0xff]  ;;  %536 = vmatprep.mubr.f32.mxu1 %v1895_v20  ;;  %v1930_v32 = vld [vmem:[%s1886_s20 + $0x20] sm:$0xff]  ;;  %v1933_v33 = vld [vmem:[%s1886_s20 + $0x30] sm:$0xff]  ;;  %v1952_v40 = vpack.c.bf16 %v240_v24, %v236_v23 }
  0x17   : > { %1475 = vmatprep.subr.bf16.mxu1 %v1875_v15  ;;  %v1458_v31 = vpack.c.bf16 %v1921_v29, %v1918_v28  ;;  %v1938_v35 = vld [vmem:[%s1886_s20 + $0x48] sm:$0xff]  ;;  %v1941_v36 = vld [vmem:[%s1886_s20 + $0x58] sm:$0xff]  ;;  %v1460_v39 = vpack.c.bf16 %v1933_v33, %v1930_v32  ;;  %v1957_v42 = vld [vmem:[%s1886_s20 + $0x40] sm:$0xff] }
  0x18   : > { %1455 = vmatprep.subr.bf16.mxu0 %v1454_v25  ;;  %v245_v37 = vld [vmem:[%s2896_s2 + $0x108] sm:$0xff]  ;;  %v1462_v41 = vpack.c.bf16 %v1941_v36, %v1938_v35  ;;  %v1960_v43 = vld [vmem:[%s1886_s20 + $0x50] sm:$0xff]  ;;  %v244_v44 = vld [vmem:[%s2896_s2 + $0x100] sm:$0xff] }
  0x19   : > { %v249_v38 = vld [vmem:[%s2896_s2 + $0x128] sm:$0xff]  ;;  %1457 = vmatpush1.bf16.msra.mxu0 %v1456_v30  ;;  %v248_v46 = vld [vmem:[%s2896_s2 + $0x120] sm:$0xff]  ;;  %v1464_v51 = vpack.c.bf16 %v1960_v43, %v1957_v42  ;;  %v222_v5 = vld [vmem:[%s2896_s2 + $0x50] sm:$0xff] }
  0x1a   : > { %1477 = vmatpush1.bf16.msra.mxu1 %v1915_v27  ;;  %1459 = vmatprep.subr.bf16.mxu0 %v1458_v31  ;;  %v1966_v45 = vpack.c.bf16 %v249_v38, %v245_v37  ;;  %v253_v49 = vld [vmem:[%s2896_s2 + $0x148] sm:$0xff]  ;;  %v1986_v52 = vpack.c.bf16 %v248_v46, %v244_v44  ;;  %v252_v53 = vld [vmem:[%s2896_s2 + $0x140] sm:$0xff]  ;;  %v226_v6 = vld [vmem:[%s2896_s2 + $0x70] sm:$0xff] }
  0x1b   : > { %1479 = vmatprep.subr.bf16.mxu1 %v1935_v34  ;;  %v257_v50 = vld [vmem:[%s2896_s2 + $0x168] sm:$0xff]  ;;  %v256_v58 = vld [vmem:[%s2896_s2 + $0x160] sm:$0xff]  ;;  %v231_v12 = vld [vmem:[%s2896_s2 + $0x98] sm:$0xff]  ;;  %v2066_v19 = vpack.c.bf16 %v226_v6, %v222_v5 }
  0x1c   : > { %v2000_v57 = vpack.c.bf16 %v257_v50, %v253_v49  ;;  %v261_v61 = vld [vmem:[%s2896_s2 + $0x188] sm:$0xff]  ;;  %v2020_v63 = vld [vmem:[%s2895_s1] sm:$0xff]  ;;  %v2025_v1 = vpack.c.bf16 %v256_v58, %v252_v53  ;;  %v235_v13 = vld [vmem:[%s2896_s2 + $0xb8] sm:$0xff] }
  0x1d   : > { %1461 = vmatpush1.bf16.msra.mxu0 %v1460_v39  ;;  %v265_v62 = vld [vmem:[%s2896_s2 + $0x1a8] sm:$0xff]  ;;  %2939 = vst [vmem:[#allocation2_spill] sm:$0xff] %v2020_v63  ;;  %v260_v2 = vld [vmem:[%s2896_s2 + $0x180] sm:$0xff]  ;;  %v2075_v25 = vpack.c.bf16 %v235_v13, %v231_v12  ;;  %v230_v30 = vld [vmem:[%s2896_s2 + $0x90] sm:$0xff] }
  0x1e   : > { %1481 = vmatpush1.bf16.msra.mxu1 %v1952_v40  ;;  %1463 = vmatprep.subr.bf16.mxu0 %v1462_v41  ;;  %v2040_v10 = vpack.c.bf16 %v265_v62, %v261_v61  ;;  %v264_v11 = vld [vmem:[%s2896_s2 + $0x1a0] sm:$0xff]  ;;  %v269_v16 = vld [vmem:[%s2896_s2 + $0x1c8] sm:$0xff]  ;;  %v234_v31 = vld [vmem:[%s2896_s2 + $0xb0] sm:$0xff] }
  0x1f   : > { %1483 = vmatprep.subr.bf16.mxu1 %v1966_v45  ;;  %v273_v17 = vld [vmem:[%s2896_s2 + $0x1e8] sm:$0xff]  ;;  %v2069_v23 = vpack.c.bf16 %v264_v11, %v260_v2  ;;  %v268_v24 = vld [vmem:[%s2896_s2 + $0x1c0] sm:$0xff]  ;;  %v239_v39 = vld [vmem:[%s2896_s2 + $0xd8] sm:$0xff]  ;;  %v2110_v48 = vpack.c.bf16 %v234_v31, %v230_v30 }
  0x20   : > { %v2063_v18 = vld [vmem:[%s2895_s1 + $0x8] sm:$0xff]  ;;  %v2084_v37 = vpack.c.bf16 %v273_v17, %v269_v16  ;;  %v272_v38 = vld [vmem:[%s2896_s2 + $0x1e0] sm:$0xff]  ;;  %v243_v41 = vld [vmem:[%s2896_s2 + $0xf8] sm:$0xff] }
  0x21   : > { %1465 = vmatpush1.bf16.msra.mxu0 %v1464_v51  ;;  %2940 = vst [vmem:[#allocation3_spill] sm:$0xff] %v2063_v18  ;;  %v277_v44 = vld [vmem:[%s2896_s2 + $0x208] sm:$0xff]  ;;  %v2107_v47 = vld [vmem:[%s2895_s1 + $0x10] sm:$0xff]  ;;  %v2113_v49 = vpack.c.bf16 %v272_v38, %v268_v24  ;;  %v276_v50 = vld [vmem:[%s2896_s2 + $0x200] sm:$0xff]  ;;  %v2119_v51 = vpack.c.bf16 %v243_v41, %v239_v39 }
  0x22   : > { %1485 = vmatpush1.bf16.msra.mxu1 %v1986_v52  ;;  %1531 = vmatprep.subr.bf16.mxu0 %v1991_v54  ;;  %v281_v46 = vld [vmem:[%s2896_s2 + $0x228] sm:$0xff]  ;;  %2941 = vst [vmem:[#allocation4_spill] sm:$0xff] %v2107_v47  ;;  %v238_v53 = vld [vmem:[%s2896_s2 + $0xd0] sm:$0xff]  ;;  %v280_v58 = vld [vmem:[%s2896_s2 + $0x220] sm:$0xff] }
  0x23   : > { %1487 = vmatprep.subr.bf16.mxu1 %v2000_v57  ;;  %v242_v55 = vld [vmem:[%s2896_s2 + $0xf0] sm:$0xff]  ;;  %v2128_v56 = vpack.c.bf16 %v281_v46, %v277_v44  ;;  %v247_v59 = vld [vmem:[%s2896_s2 + $0x118] sm:$0xff]  ;;  %v285_v61 = vld [vmem:[%s2896_s2 + $0x248] sm:$0xff]  ;;  %v2157_v6 = vpack.c.bf16 %v280_v58, %v276_v50 }
  0x24   : > { %1440 = vmatmul.mubr.msk.f32.vlgmr.msra.gmra.mrb[0].mxu0 %vm352_vm0, %v2020_v63  ;;  %v251_v60 = vld [vmem:[%s2896_s2 + $0x138] sm:$0xff]  ;;  %v289_v62 = vld [vmem:[%s2896_s2 + $0x268] sm:$0xff]  ;;  %v2154_v5 = vpack.c.bf16 %v242_v55, %v238_v53  ;;  %v284_v11 = vld [vmem:[%s2896_s2 + $0x240] sm:$0xff] }
  0x25   : > { %441 = vmatprep.mubr.f32.mxu0 %v2899_v7  ;;  %1533 = vmatpush1.bf16.msra.mxu0 %v2022_v0  ;;  %v2151_v2 = vld [vmem:[%s2895_s1 + $0x18] sm:$0xff]  ;;  %v2163_v12 = vpack.c.bf16 %v251_v60, %v247_v59  ;;  %v246_v13 = vld [vmem:[%s2896_s2 + $0x110] sm:$0xff]  ;;  %v2172_v17 = vpack.c.bf16 %v289_v62, %v285_v61  ;;  %v288_v24 = vld [vmem:[%s2896_s2 + $0x260] sm:$0xff] }
  0x26   : > { %1489 = vmatpush1.bf16.msra.mxu1 %v2025_v1  ;;  %1535 = vmatprep.subr.bf16.mxu0 %v2031_v4  ;;  %2942 = vst [vmem:[#allocation5_spill] sm:$0xff] %v2151_v2  ;;  %v250_v16 = vld [vmem:[%s2896_s2 + $0x130] sm:$0xff]  ;;  %v255_v30 = vld [vmem:[%s2896_s2 + $0x158] sm:$0xff]  ;;  %v293_v38 = vld [vmem:[%s2896_s2 + $0x288] sm:$0xff]  ;;  %v2201_v46 = vpack.c.bf16 %v288_v24, %v284_v11 }
  0x27   : > { %1491 = vmatprep.subr.bf16.mxu1 %v2040_v10  ;;  %v259_v31 = vld [vmem:[%s2896_s2 + $0x178] sm:$0xff]  ;;  %v297_v39 = vld [vmem:[%s2896_s2 + $0x2a8] sm:$0xff]  ;;  %v2195_v41 = vld [vmem:[%s2895_s1 + $0x20] sm:$0xff]  ;;  %v2198_v44 = vpack.c.bf16 %v250_v16, %v246_v13 }
  0x28   : > { %1441 = vmatmul.mubr.msk.f32.gmra.mrb[2].mxu0 %vm352_vm0, %v2063_v18  ;;  %2943 = vst [vmem:[#allocation6_spill] sm:$0xff] %v2195_v41  ;;  %v292_v50 = vld [vmem:[%s2896_s2 + $0x280] sm:$0xff]  ;;  %v2207_v53 = vpack.c.bf16 %v259_v31, %v255_v30  ;;  %v254_v55 = vld [vmem:[%s2896_s2 + $0x150] sm:$0xff]  ;;  %v2216_v59 = vpack.c.bf16 %v297_v39, %v293_v38  ;;  %v263_v61 = vld [vmem:[%s2896_s2 + $0x198] sm:$0xff] }
  0x29   : > { %447 = vmatprep.mubr.f32.mxu0 %v2899_v7  ;;  %1537 = vmatpush1.bf16.msra.mxu0 %v2066_v19  ;;  %2944 = vst [vmem:[#allocation7_spill] sm:$0xff] %v2198_v44  ;;  %v258_v58 = vld [vmem:[%s2896_s2 + $0x170] sm:$0xff]  ;;  %v296_v60 = vld [vmem:[%s2896_s2 + $0x2a0] sm:$0xff]  ;;  %v267_v62 = vld [vmem:[%s2896_s2 + $0x1b8] sm:$0xff] }
  0x2a   : > { %1493 = vmatpush1.bf16.msra.mxu1 %v2069_v23  ;;  %1539 = vmatprep.subr.bf16.mxu0 %v2075_v25  ;;  %2945 = vst [vmem:[#allocation8_spill] sm:$0xff] %v2207_v53  ;;  %v301_v11 = vld [vmem:[%s2896_s2 + $0x2c8] sm:$0xff]  ;;  %v2242_v24 = vpack.c.bf16 %v258_v58, %v254_v55  ;;  %v2245_v30 = vpack.c.bf16 %v296_v60, %v292_v50  ;;  %v300_v31 = vld [vmem:[%s2896_s2 + $0x2c0] sm:$0xff]  ;;  %v262_v39 = vld [vmem:[%s2896_s2 + $0x190] sm:$0xff] }
  0x2b   : > { %1495 = vmatprep.subr.bf16.mxu1 %v2084_v37  ;;  %v305_v13 = vld [vmem:[%s2896_s2 + $0x2e8] sm:$0xff]  ;;  %v2251_v38 = vpack.c.bf16 %v267_v62, %v263_v61  ;;  %v266_v55 = vld [vmem:[%s2896_s2 + $0x1b0] sm:$0xff]  ;;  %v304_v58 = vld [vmem:[%s2896_s2 + $0x2e0] sm:$0xff] }
  0x2c   : > { %1442 = vmatmul.mubr.msk.f32.gmra.mrb[4].mxu0 %vm352_vm0, %v2107_v47  ;;  %v2239_v16 = vld [vmem:[%s2895_s1 + $0x28] sm:$0xff]  ;;  %2947 = vst [vmem:[#allocation10_spill] sm:$0xff] %v2242_v24  ;;  %v2260_v50 = vpack.c.bf16 %v305_v13, %v301_v11  ;;  %v271_v60 = vld [vmem:[%s2896_s2 + $0x1d8] sm:$0xff]  ;;  %v2280_v13 = vpack.c.bf16 %v266_v55, %v262_v39  ;;  %v312_v39 = vld [vmem:[%s2896_s2 + $0x320] sm:$0xff] }
  0x2d   : > { %453 = vmatprep.mubr.f32.mxu0 %v2899_v7  ;;  %1541 = vmatpush1.bf16.msra.mxu0 %v2110_v48  ;;  %2946 = vst [vmem:[#allocation9_spill] sm:$0xff] %v2239_v16  ;;  %2948 = vst [vmem:[#allocation11_spill] sm:$0xff] %v2251_v38  ;;  %v275_v61 = vld [vmem:[%s2896_s2 + $0x1f8] sm:$0xff]  ;;  %v309_v62 = vld [vmem:[%s2896_s2 + $0x308] sm:$0xff] }
  0x2e   : > { %1497 = vmatpush1.bf16.msra.mxu1 %v2113_v49  ;;  %1543 = vmatprep.subr.bf16.mxu0 %v2119_v51  ;;  %v313_v11 = vld [vmem:[%s2896_s2 + $0x328] sm:$0xff]  ;;  %2949 = vst [vmem:[#allocation12_spill] sm:$0xff] %v2280_v13  ;;  %v279_v55 = vld [vmem:[%s2896_s2 + $0x218] sm:$0xff]  ;;  %v316_v47 = vld [vmem:[%s2896_s2 + $0x340] sm:$0xff] }
  0x2f   : > { %1499 = vmatprep.subr.bf16.mxu1 %v2128_v56  ;;  %v278_v63 = vld [vmem:[%s2896_s2 + $0x210] sm:$0xff] }
  0x30   : > { %1443 = vmatmul.mubr.msk.f32.gmra.mrb[6].mxu0 %vm352_vm0, %v2151_v2  ;;  %v270_v2 = vld [vmem:[%s2896_s2 + $0x1d0] sm:$0xff] }
  0x31   : > { %459 = vmatprep.mubr.f32.mxu0 %v2899_v7  ;;  %1545 = vmatpush1.bf16.msra.mxu0 %v2154_v5 }
  0x32   : > { %1501 = vmatpush1.bf16.msra.mxu1 %v2157_v6  ;;  %1547 = vmatprep.subr.bf16.mxu0 %v2163_v12 }
  0x33   : > { %1503 = vmatprep.subr.bf16.mxu1 %v2172_v17 }
  0x34   : > { %1444 = vmatmul.mubr.msk.f32.gmra.mrb[8].mxu0 %vm352_vm0, %v2195_v41  ;;  %v2290_v41 = vpack.c.bf16 %v275_v61, %v271_v60  ;;  %v317_v60 = vld [vmem:[%s2896_s2 + $0x348] sm:$0xff] }
  0x35   : > { %465 = vmatprep.mubr.f32.mxu0 %v2899_v7  ;;  %1549 = vmatpush1.bf16.msra.mxu0 %v2198_v44  ;;  %v2284_v7 = vpack.c.bf16 %v304_v58, %v300_v31  ;;  %v2299_v31 = vpack.c.bf16 %v313_v11, %v309_v62  ;;  %v283_v58 = vld [vmem:[%s2896_s2 + $0x238] sm:$0xff]  ;;  %v321_v61 = vld [vmem:[%s2896_s2 + $0x368] sm:$0xff]  ;;  %v294_v44 = vld [vmem:[%s2896_s2 + $0x290] sm:$0xff] }
  0x36   : > { %1505 = vmatpush1.bf16.msra.mxu1 %v2201_v46  ;;  %1551 = vmatprep.subr.bf16.mxu0 %v2207_v53  ;;  %2950 = vst [vmem:[#allocation13_spill] sm:$0xff] %v2290_v41  ;;  %v2326_v18 = vpack.c.bf16 %v283_v58, %v279_v55  ;;  %v291_v55 = vld [vmem:[%s2896_s2 + $0x278] sm:$0xff]  ;;  %v325_v58 = vld [vmem:[%s2896_s2 + $0x388] sm:$0xff] }
  0x37   : > { %1507 = vmatprep.subr.bf16.mxu1 %v2216_v59 }
  0x38   : > { %1445 = vmatmul.mubr.msk.f32.gmra.mrb[10].mxu0 %vm352_vm0, %v2239_v16  ;;  %v308_v16 = vld [vmem:[%s2896_s2 + $0x300] sm:$0xff]  ;;  %2952 = vst [vmem:[#allocation15_spill] sm:$0xff] %v2326_v18 }
  0x39   : > { %1553 = vmatpush1.bf16.msra.mxu0 %v2242_v24  ;;  %637 = vmatprep.mubr.f32.mxu0 %v1895_v20  ;;  %v274_v20 = vld [vmem:[%s2896_s2 + $0x1f0] sm:$0xff]  ;;  %v2320_v11 = vpack.c.bf16 %v312_v39, %v308_v16  ;;  %v2335_v16 = vpack.c.bf16 %v321_v61, %v317_v60  ;;  %v287_v39 = vld [vmem:[%s2896_s2 + $0x258] sm:$0xff]  ;;  %v329_v60 = vld [vmem:[%s2896_s2 + $0x3a8] sm:$0xff] }
  0x3a   : > { %1509 = vmatpush1.bf16.msra.mxu1 %v2245_v30  ;;  %1555 = vmatprep.subr.bf16.mxu0 %v2251_v38  ;;  %v2317_v62 = vpack.c.bf16 %v274_v20, %v270_v2  ;;  %v282_v2 = vld [vmem:[%s2896_s2 + $0x230] sm:$0xff]  ;;  %v320_v20 = vld [vmem:[%s2896_s2 + $0x360] sm:$0xff]  ;;  %v2362_v38 = vpack.c.bf16 %v291_v55, %v287_v39  ;;  %v299_v39 = vld [vmem:[%s2896_s2 + $0x2b8] sm:$0xff] }
  0x3b   : > { %1511 = vmatprep.subr.bf16.mxu1 %v2260_v50  ;;  %v2353_v61 = vpack.c.bf16 %v282_v2, %v278_v63  ;;  %v286_v24 = vld [vmem:[%s2896_s2 + $0x250] sm:$0xff]  ;;  %v328_v2 = vld [vmem:[%s2896_s2 + $0x3a0] sm:$0xff]  ;;  %v333_v55 = vld [vmem:[%s2896_s2 + $0x3c8] sm:$0xff] }
  0x3c   : > { %2951 = vst [vmem:[#allocation14_spill] sm:$0xff] %v2317_v62  ;;  %2954 = vst [vmem:[#allocation17_spill] sm:$0xff] %v2362_v38  ;;  %v290_v63 = vld [vmem:[%s2896_s2 + $0x270] sm:$0xff] }
  0x3d   : > { %1557 = vmatpush1.bf16.msra.mxu0 %v2280_v13  ;;  %2953 = vst [vmem:[#allocation16_spill] sm:$0xff] %v2353_v61  ;;  %v324_v13 = vld [vmem:[%s2896_s2 + $0x380] sm:$0xff] }
  0x3e   : > { %1513 = vmatpush1.bf16.msra.mxu1 %v2284_v7  ;;  %1559 = vmatprep.subr.bf16.mxu0 %v2290_v41  ;;  %v2356_v41 = vpack.c.bf16 %v320_v20, %v316_v47  ;;  %v2371_v47 = vpack.c.bf16 %v329_v60, %v325_v58  ;;  %v295_v20 = vld [vmem:[%s2896_s2 + $0x298] sm:$0xff]  ;;  %v337_v58 = vld [vmem:[%s2896_s2 + $0x3e8] sm:$0xff]  ;;  %v2389_v60 = vpack.c.bf16 %v290_v63, %v286_v24  ;;  %v298_v24 = vld [vmem:[%s2896_s2 + $0x2b0] sm:$0xff] }
  0x3f   : > { %1515 = vmatprep.subr.bf16.mxu1 %v2299_v31  ;;  %v2398_v53 = vpack.c.bf16 %v299_v39, %v295_v20  ;;  %v336_v63 = vld [vmem:[%s2896_s2 + $0x3e0] sm:$0xff]  ;;  %v307_v20 = vld [vmem:[%s2896_s2 + $0x2f8] sm:$0xff]  ;;  %v2419_v39 = vpack.c.bf16 %v298_v24, %v294_v44 }
  0x40   : > { %v311_v44 = vld [vmem:[%s2896_s2 + $0x318] sm:$0xff] }
  0x41   : > { %1561 = vmatpush1.bf16.msra.mxu0 %v2317_v62  ;;  %v332_v62 = vld [vmem:[%s2896_s2 + $0x3c0] sm:$0xff]  ;;  %2955 = vst [vmem:[#allocation18_spill] sm:$0xff] %v2419_v39 }
  0x42   : > { %1517 = vmatpush1.bf16.msra.mxu1 %v2320_v11  ;;  %1563 = vmatprep.subr.bf16.mxu0 %v2326_v18  ;;  %v2392_v18 = vpack.c.bf16 %v328_v2, %v324_v13  ;;  %v2407_v13 = vpack.c.bf16 %v337_v58, %v333_v55  ;;  %v303_v2 = vld [vmem:[%s2896_s2 + $0x2d8] sm:$0xff]  ;;  %v2422_v55 = vpack.c.bf16 %v336_v63, %v332_v62 }
  0x43   : > { %1519 = vmatprep.subr.bf16.mxu1 %v2335_v16  ;;  %v2425_v58 = vpack.c.bf16 %v307_v20, %v303_v2  ;;  %v315_v62 = vld [vmem:[%s2896_s2 + $0x338] sm:$0xff]  ;;  %v310_v2 = vld [vmem:[%s2896_s2 + $0x310] sm:$0xff] }
  0x44   : > { %v2445_v63 = vpack.c.bf16 %v315_v62, %v311_v44  ;;  %v314_v20 = vld [vmem:[%s2896_s2 + $0x330] sm:$0xff] }
  0x45   : > { %1565 = vmatpush1.bf16.msra.mxu0 %v2353_v61  ;;  %2956 = vst [vmem:[#allocation19_spill] sm:$0xff] %v2425_v58  ;;  %v306_v61 = vld [vmem:[%s2896_s2 + $0x2f0] sm:$0xff] }
  0x46   : > { %1521 = vmatpush1.bf16.msra.mxu1 %v2356_v41  ;;  %1567 = vmatprep.subr.bf16.mxu0 %v2362_v38  ;;  %v302_v38 = vld [vmem:[%s2896_s2 + $0x2d0] sm:$0xff]  ;;  %2958 = vst [vmem:[#allocation21_spill] sm:$0xff] %v2445_v63 }
  0x47   : > { %1523 = vmatprep.subr.bf16.mxu1 %v2371_v47  ;;  %v2441_v24 = vpack.c.bf16 %v306_v61, %v302_v38  ;;  %v323_v38 = vld [vmem:[%s2896_s2 + $0x378] sm:$0xff]  ;;  %v2461_v61 = vpack.c.bf16 %v314_v20, %v310_v2  ;;  %v318_v62 = vld [vmem:[%s2896_s2 + $0x350] sm:$0xff] }
  0x48   : > { %v331_v2 = vld [vmem:[%s2896_s2 + $0x3b8] sm:$0xff] }
  0x49   : > { %1569 = vmatpush1.bf16.msra.mxu0 %v2389_v60  ;;  %2957 = vst [vmem:[#allocation20_spill] sm:$0xff] %v2441_v24  ;;  %2959 = vst [vmem:[#allocation22_spill] sm:$0xff] %v2461_v61 }
  0x4a   : > { %1525 = vmatpush1.bf16.msra.mxu1 %v2392_v18  ;;  %1571 = vmatprep.subr.bf16.mxu0 %v2398_v53 }
  0x4b   : > { %1527 = vmatprep.subr.bf16.mxu1 %v2407_v13 }
  0x4d   : > { %1573 = vmatpush1.bf16.msra.mxu0 %v2419_v39  ;;  %v319_v39 = vld [vmem:[%s2896_s2 + $0x358] sm:$0xff] }
  0x4e   : > { %1529 = vmatpush1.bf16.msra.mxu1 %v2422_v55  ;;  %1575 = vmatprep.subr.bf16.mxu0 %v2425_v58  ;;  %v2465_v44 = vpack.c.bf16 %v323_v38, %v319_v39  ;;  %v322_v58 = vld [vmem:[%s2896_s2 + $0x370] sm:$0xff] }
  0x4f   : > { %v2481_v39 = vpack.c.bf16 %v322_v58, %v318_v62  ;;  %v326_v38 = vld [vmem:[%s2896_s2 + $0x390] sm:$0xff]  ;;  %v339_v58 = vld [vmem:[%s2896_s2 + $0x3f8] sm:$0xff] }
  0x50   : > { %2960 = vst [vmem:[#allocation23_spill] sm:$0xff] %v2465_v44 }
  0x51   : > { %537 = vmatmul.mubr.f32.vlgmr.msra.gmra.mrb[0].mxu1 %v1901_v22  ;;  %1577 = vmatpush1.bf16.msra.mxu0 %v2441_v24  ;;  %v327_v24 = vld [vmem:[%s2896_s2 + $0x398] sm:$0xff] }
  0x52   : > { %542 = vmatprep.mubr.f32.mxu1 %v1898_v21  ;;  %1579 = vmatprep.subr.bf16.mxu0 %v2445_v63  ;;  %v2485_v20 = vpack.c.bf16 %v331_v2, %v327_v24  ;;  %v330_v63 = vld [vmem:[%s2896_s2 + $0x3b0] sm:$0xff] }
  0x53   : > { %v2501_v24 = vpack.c.bf16 %v330_v63, %v326_v38  ;;  %v334_v2 = vld [vmem:[%s2896_s2 + $0x3d0] sm:$0xff] }
  0x55   : > { %543 = vmatmul.mubr.f32.gmra.mrb[2].mxu1 %v1913_v26  ;;  %1581 = vmatpush1.bf16.msra.mxu0 %v2461_v61  ;;  %v335_v61 = vld [vmem:[%s2896_s2 + $0x3d8] sm:$0xff] }
  0x56   : > { %548 = vmatprep.mubr.f32.mxu1 %v1918_v28  ;;  %1583 = vmatprep.subr.bf16.mxu0 %v2465_v44  ;;  %v2505_v62 = vpack.c.bf16 %v339_v58, %v335_v61  ;;  %v338_v44 = vld [vmem:[%s2896_s2 + $0x3f0] sm:$0xff]  ;;  %v2961_v61 = vmov 0.0  }
  0x57   : > { %v2515_v63 = vpack.c.bf16 %v338_v44, %v334_v2 }
  0x59   : > { %549 = vmatmul.mubr.f32.gmra.mrb[4].mxu1 %v1930_v32  ;;  %1585 = vmatpush1.bf16.msra.mxu0 %v2481_v39 }
  0x5a   : > { %554 = vmatprep.mubr.f32.mxu1 %v1921_v29  ;;  %1587 = vmatprep.subr.bf16.mxu0 %v2485_v20 }
  0x5d   : > { %555 = vmatmul.mubr.f32.gmra.mrb[6].mxu1 %v1933_v33  ;;  %1589 = vmatpush1.bf16.msra.mxu0 %v2501_v24 }
  0x5e   : > { %560 = vmatprep.mubr.f32.mxu1 %v1938_v35  ;;  %1591 = vmatprep.subr.bf16.mxu0 %v2505_v62 }
  0x61   : > { %561 = vmatmul.mubr.f32.gmra.mrb[8].mxu1 %v1957_v42  ;;  %1593 = vmatpush1.bf16.msra.mxu0 %v2515_v63 }
  0x62   : > { %566 = vmatprep.mubr.f32.mxu1 %v1941_v36  ;;  %1607 = vmatprep.subr.bf16.mxu0 %v1839_v3 }
  0x64   : > { %638 = vmatmul.mubr.f32.vlgmr.msra.gmra.mrb[12].mxu0 %v1901_v22 }
  0x65   : > { %567 = vmatmul.mubr.f32.gmra.mrb[10].mxu1 %v1960_v43  ;;  %643 = vmatprep.mubr.f32.mxu0 %v1898_v21 }
  0x66   : > { %1609 = vmatpush1.bf16.msra.mxu0 %v1851_v8  ;;  %738 = vmatprep.mubr.f32.mxu1 %v2961_v61 }
  0x67   : > { %1611 = vmatprep.subr.bf16.mxu0 %v1853_v9 }
  0x68   : > { %644 = vmatmul.mubr.f32.gmra.mrb[14].mxu0 %v1913_v26 }
  0x69   : > { %649 = vmatprep.mubr.f32.mxu0 %v1918_v28 }
  0x6a   : > { %1613 = vmatpush1.bf16.msra.mxu0 %v1871_v14 }
  0x6b   : > { %1615 = vmatprep.subr.bf16.mxu0 %v1875_v15 }
  0x6c   : > { %650 = vmatmul.mubr.f32.gmra.mrb[16].mxu0 %v1930_v32 }
  0x6d   : > { %655 = vmatprep.mubr.f32.mxu0 %v1921_v29 }
  0x6e   : > { %1617 = vmatpush1.bf16.msra.mxu0 %v1915_v27 }
  0x6f   : > { %1619 = vmatprep.subr.bf16.mxu0 %v1935_v34 }
  0x70   : > { %656 = vmatmul.mubr.f32.gmra.mrb[18].mxu0 %v1933_v33 }
  0x71   : > { %661 = vmatprep.mubr.f32.mxu0 %v1938_v35  ;;  %v2962_v35 = vld [vmem:[#allocation7_spill] sm:$0xff] }
  0x72   : > { %1621 = vmatpush1.bf16.msra.mxu0 %v1952_v40 }
  0x73   : > { %1623 = vmatprep.subr.bf16.mxu0 %v1966_v45  ;;  %v2964_v45 = vld [vmem:[#allocation10_spill] sm:$0xff] }
  0x74   : > { %662 = vmatmul.mubr.f32.gmra.mrb[20].mxu0 %v1957_v42  ;;  %v2963_v42 = vld [vmem:[#allocation8_spill] sm:$0xff] }
  0x75   : > { %667 = vmatprep.mubr.f32.mxu0 %v1941_v36 }
  0x76   : > { %1625 = vmatpush1.bf16.msra.mxu0 %v1986_v52  ;;  %v2965_v52 = vld [vmem:[#allocation11_spill] sm:$0xff] }
  0x77   : > { %1627 = vmatprep.subr.bf16.mxu0 %v2000_v57  ;;  %v2966_v57 = vld [vmem:[#allocation2_spill] sm:$0xff] }
  0x78   : > { %668 = vmatmul.mubr.f32.gmra.mrb[22].mxu0 %v1960_v43 }
  0x7a   : > { %1629 = vmatpush1.bf16.msra.mxu0 %v2025_v1  ;;  %v2967_v1 = vld [vmem:[#allocation12_spill] sm:$0xff] }
  0x7b   : > { %1631 = vmatprep.subr.bf16.mxu0 %v2040_v10  ;;  %v2968_v10 = vld [vmem:[#allocation13_spill] sm:$0xff] }
  0x7e   : > { %1633 = vmatpush1.bf16.msra.mxu0 %v2069_v23  ;;  %v2970_v23 = vld [vmem:[#allocation14_spill] sm:$0xff] }
  0x7f   : > { %1635 = vmatprep.subr.bf16.mxu0 %v2084_v37  ;;  %v2973_v37 = vld [vmem:[#allocation16_spill] sm:$0xff] }
  0x82   : > { %1637 = vmatpush1.bf16.msra.mxu0 %v2113_v49 }
  0x83   : > { %1639 = vmatprep.subr.bf16.mxu0 %v2128_v56  ;;  %v2978_v56 = vld [vmem:[#allocation19_spill] sm:$0xff] }
  0x86   : > { %1641 = vmatpush1.bf16.msra.mxu0 %v2157_v6 }
  0x87   : > { %1643 = vmatprep.subr.bf16.mxu0 %v2172_v17  ;;  %v2980_v17 = vld [vmem:[#allocation20_spill] sm:$0xff] }
  0x8a   : > { %1645 = vmatpush1.bf16.msra.mxu0 %v2201_v46 }
  0x8b   : > { %1647 = vmatprep.subr.bf16.mxu0 %v2216_v59 }
  0x8e   : > { %1649 = vmatpush1.bf16.msra.mxu0 %v2245_v30  ;;  %v2982_v30 = vld [vmem:[#allocation22_spill] sm:$0xff] }
  0x8f   : > { %1651 = vmatprep.subr.bf16.mxu0 %v2260_v50  ;;  %v2983_v50 = vld [vmem:[#allocation23_spill] sm:$0xff] }
  0x92   : > { %1653 = vmatpush1.bf16.msra.mxu0 %v2284_v7 }
  0x93   : > { %1655 = vmatprep.subr.bf16.mxu0 %v2299_v31 }
  0x96   : > { %1657 = vmatpush1.bf16.msra.mxu0 %v2320_v11 }
  0x97   : > { %1659 = vmatprep.subr.bf16.mxu0 %v2335_v16 }
  0x9a   : > { %1661 = vmatpush1.bf16.msra.mxu0 %v2356_v41  ;;  %v2981_v41 = vld [vmem:[#allocation21_spill] sm:$0xff] }
  0x9b   : > { %1663 = vmatprep.subr.bf16.mxu0 %v2371_v47 }
  0x9e   : > { %1665 = vmatpush1.bf16.msra.mxu0 %v2392_v18  ;;  %v2969_v18 = vld [vmem:[#allocation3_spill] sm:$0xff] }
  0x9f   : > { %1667 = vmatprep.subr.bf16.mxu0 %v2407_v13 }
  0xa2   : > { %1669 = vmatpush1.bf16.msra.mxu0 %v2422_v55 }
  0xa3   : > { %1671 = vmatprep.subr.bf16.mxu0 %v1991_v54 }
  0xf7   : > { %v2568_v3 = vpop.f32.mrb[0].mxu0 }
  0xf8   : > { %v2570_v7 = vpop.f32.mrb[1].mxu0 }
  0xf9   : > { %839 = vmatprep.mubr.f32.mxu0 %v2570_v7 }
  0xfa   : > { %840 = vmatmul.mubr.f32.vlgmr.msra.gmra.mrb[24].mxu0 %v2568_v3 }
  0xfb   : > { %v2574_v8 = vpop.f32.mrb[2].mxu0  ;;  %1673 = vmatpush1.bf16.msra.mxu0 %v2022_v0 }
  0xfc   : > { %v1596_v9 = vpack.c.bf16 %v2574_v8, %v2568_v3  ;;  %v2579_v14 = vpop.f32.mrb[3].mxu0  ;;  %1675 = vmatprep.subr.bf16.mxu0 %v2031_v4 }
  0xfd   : > { %v1594_v15 = vpack.c.bf16 %v2579_v14, %v2570_v7  ;;  %845 = vmatprep.mubr.f32.mxu0 %v2579_v14 }
  0xfe   : > { %846 = vmatmul.mubr.f32.gmra.mrb[26].mxu0 %v2574_v8 }
  0xff   : > { %v2586_v21 = vpop.f32.mrb[4].mxu0  ;;  %1595 = vmatprep.subr.bf16.mxu1 %v1594_v15  ;;  %1677 = vmatpush1.bf16.msra.mxu0 %v2066_v19 }
 0x100   : > { %v2589_v22 = vpop.f32.mrb[5].mxu0  ;;  %1597 = vmatpush1.bf16.msra.mxu1 %v1596_v9  ;;  %1679 = vmatprep.subr.bf16.mxu0 %v2075_v25 }
 0x101   : > { %851 = vmatprep.mubr.f32.mxu0 %v2589_v22 }
 0x102   : > { %852 = vmatmul.mubr.f32.gmra.mrb[28].mxu0 %v2586_v21 }
 0x103   : > { %v2594_v26 = vpop.f32.mrb[6].mxu0  ;;  %1681 = vmatpush1.bf16.msra.mxu0 %v2110_v48 }
 0x104   : > { %v1600_v27 = vpack.c.bf16 %v2594_v26, %v2586_v21  ;;  %v2599_v28 = vpop.f32.mrb[7].mxu0  ;;  %1683 = vmatprep.subr.bf16.mxu0 %v2119_v51 }
 0x105   : > { %v1598_v29 = vpack.c.bf16 %v2599_v28, %v2589_v22  ;;  %857 = vmatprep.mubr.f32.mxu0 %v2599_v28 }
 0x106   : > { %858 = vmatmul.mubr.f32.gmra.mrb[30].mxu0 %v2594_v26 }
 0x107   : > { %v2606_v32 = vpop.f32.mrb[8].mxu0  ;;  %1599 = vmatprep.subr.bf16.mxu1 %v1598_v29  ;;  %1685 = vmatpush1.bf16.msra.mxu0 %v2154_v5 }
 0x108   : > { %v2609_v33 = vpop.f32.mrb[9].mxu0  ;;  %1601 = vmatpush1.bf16.msra.mxu1 %v1600_v27  ;;  %1687 = vmatprep.subr.bf16.mxu0 %v2163_v12 }
 0x109   : > { %863 = vmatprep.mubr.f32.mxu0 %v2609_v33 }
 0x10a   : > { %864 = vmatmul.mubr.f32.gmra.mrb[32].mxu0 %v2606_v32 }
 0x10b   : > { %v2614_v34 = vpop.f32.mrb[10].mxu0  ;;  %1689 = vmatpush1.bf16.msra.mxu0 %v2962_v35 }
 0x10c   : > { %v1604_v36 = vpack.c.bf16 %v2614_v34, %v2606_v32  ;;  %v2619_v40 = vpop.f32.mrb[11].mxu0  ;;  %1691 = vmatprep.subr.bf16.mxu0 %v2963_v42 }
 0x10d   : > { %v1602_v43 = vpack.c.bf16 %v2619_v40, %v2609_v33  ;;  %869 = vmatprep.mubr.f32.mxu0 %v2619_v40 }
 0x10e   : > { %870 = vmatmul.mubr.f32.gmra.mrb[34].mxu0 %v2614_v34 }
 0x10f   : > { %1603 = vmatprep.subr.bf16.mxu1 %v1602_v43  ;;  %1693 = vmatpush1.bf16.msra.mxu0 %v2964_v45 }
 0x110   : > { %1605 = vmatpush1.bf16.msra.mxu1 %v1604_v36  ;;  %1695 = vmatprep.subr.bf16.mxu0 %v2965_v52 }
 0x111   : > { %1734 = vmatprep.subr.bf16.mxu1 %v1991_v54  ;;  %v2971_v54 = vld [vmem:[#allocation15_spill] sm:$0xff] }
 0x113   : > { %1446 = vmatmul.mubr.msk.f32.vlgmr.msra.gmra.mrb[12].mxu1 %vm352_vm0, %v2966_v57  ;;  %1697 = vmatpush1.bf16.msra.mxu0 %v2967_v1 }
 0x114   : > { %1750 = vmatpush1.bf16.msra.mxu1 %v2022_v0  ;;  %744 = vmatprep.mubr.f32.mxu1 %v2961_v61  ;;  %v2972_v0 = vld [vmem:[#allocation4_spill] sm:$0xff] }
 0x115   : > { %1735 = vmatprep.subr.bf16.mxu1 %v2031_v4  ;;  %1699 = vmatprep.subr.bf16.mxu0 %v2968_v10  ;;  %v2974_v4 = vld [vmem:[#allocation17_spill] sm:$0xff] }
 0x117   : > { %1447 = vmatmul.mubr.msk.f32.gmra.mrb[14].mxu1 %vm352_vm0, %v2969_v18  ;;  %1701 = vmatpush1.bf16.msra.mxu0 %v2970_v23 }
 0x118   : > { %1751 = vmatpush1.bf16.msra.mxu1 %v2066_v19  ;;  %750 = vmatprep.mubr.f32.mxu1 %v2961_v61  ;;  %v2975_v19 = vld [vmem:[#allocation5_spill] sm:$0xff] }
 0x119   : > { %1736 = vmatprep.subr.bf16.mxu1 %v2075_v25  ;;  %1703 = vmatprep.subr.bf16.mxu0 %v2971_v54  ;;  %v2976_v25 = vld [vmem:[#allocation6_spill] sm:$0xff] }
 0x11b   : > { %1448 = vmatmul.mubr.msk.f32.gmra.mrb[16].mxu1 %vm352_vm0, %v2972_v0  ;;  %1705 = vmatpush1.bf16.msra.mxu0 %v2973_v37 }
 0x11c   : > { %1752 = vmatpush1.bf16.msra.mxu1 %v2110_v48  ;;  %756 = vmatprep.mubr.f32.mxu1 %v2961_v61  ;;  %v2977_v48 = vld [vmem:[#allocation18_spill] sm:$0xff] }
 0x11d   : > { %1737 = vmatprep.subr.bf16.mxu1 %v2119_v51  ;;  %1707 = vmatprep.subr.bf16.mxu0 %v2974_v4 }
 0x11f   : > { %1449 = vmatmul.mubr.msk.f32.gmra.mrb[18].mxu1 %vm352_vm0, %v2975_v19  ;;  %1709 = vmatpush1.bf16.msra.mxu0 %v2389_v60 }
 0x120   : > { %1753 = vmatpush1.bf16.msra.mxu1 %v2154_v5  ;;  %762 = vmatprep.mubr.f32.mxu1 %v2961_v61  ;;  %v2979_v5 = vld [vmem:[#allocation9_spill] sm:$0xff] }
 0x121   : > { %1738 = vmatprep.subr.bf16.mxu1 %v2163_v12  ;;  %1711 = vmatprep.subr.bf16.mxu0 %v2398_v53 }
 0x123   : > { %1450 = vmatmul.mubr.msk.f32.gmra.mrb[20].mxu1 %vm352_vm0, %v2976_v25  ;;  %1713 = vmatpush1.bf16.msra.mxu0 %v2977_v48 }
 0x124   : > { %v2660_v49 = vpop.f32.mrb[0].mxu1  ;;  %1754 = vmatpush1.bf16.msra.mxu1 %v2962_v35  ;;  %768 = vmatprep.mubr.f32.mxu1 %v2961_v61  ;;  %v2779_v35 = vld [vmem:[%s2897_s3 + $0x20] sm:$0xff] }
 0x125   : > { %v2664_v51 = vpop.f32.mrb[1].mxu1  ;;  %1739 = vmatprep.subr.bf16.mxu1 %v2963_v42  ;;  %1715 = vmatprep.subr.bf16.mxu0 %v2978_v56 }
 0x126   : > { %875 = vmatprep.mubr.f32.mxu0 %v2664_v51 }
 0x127   : > { %1451 = vmatmul.mubr.msk.f32.gmra.mrb[22].mxu1 %vm352_vm0, %v2979_v5  ;;  %876 = vmatmul.mubr.f32.gmra.mrb[36].mxu0 %v2660_v49  ;;  %v2808_v5 = vld [vmem:[%s2897_s3 + $0x48] sm:$0xff] }
 0x128   : > { %v2672_v6 = vpop.f32.mrb[2].mxu1  ;;  %1755 = vmatpush1.bf16.msra.mxu1 %v2964_v45  ;;  %1006 = vmatprep.mubr.f32.mxu1 %v2579_v14 }
 0x129   : > { %v2676_v12 = vpop.f32.mrb[3].mxu1  ;;  %1740 = vmatprep.subr.bf16.mxu1 %v2965_v52  ;;  %1717 = vmatpush1.bf16.msra.mxu0 %v2980_v17 }
 0x12a   : > { %881 = vmatprep.mubr.f32.mxu0 %v2676_v12  ;;  %1719 = vmatprep.subr.bf16.mxu0 %v2981_v41 }
 0x12b   : > { %882 = vmatmul.mubr.f32.gmra.mrb[38].mxu0 %v2672_v6 }
 0x12c   : > { %v2683_v46 = vpop.f32.mrb[4].mxu1  ;;  %1756 = vmatpush1.bf16.msra.mxu1 %v2967_v1 }
 0x12d   : > { %v2686_v59 = vpop.f32.mrb[5].mxu1  ;;  %1741 = vmatprep.subr.bf16.mxu1 %v2968_v10  ;;  %1721 = vmatpush1.bf16.msra.mxu0 %v2982_v30  ;;  %v2791_v10 = vld [vmem:[%s2897_s3 + $0x30] sm:$0xff] }
 0x12e   : > { %887 = vmatprep.mubr.f32.mxu0 %v2686_v59  ;;  %1723 = vmatprep.subr.bf16.mxu0 %v2983_v50 }
 0x12f   : > { %888 = vmatmul.mubr.f32.gmra.mrb[40].mxu0 %v2683_v46 }
 0x130   : > { %v2693_v31 = vpop.f32.mrb[6].mxu1  ;;  %1757 = vmatpush1.bf16.msra.mxu1 %v2970_v23 }
 0x131   : > { %v2696_v11 = vpop.f32.mrb[7].mxu1  ;;  %1742 = vmatprep.subr.bf16.mxu1 %v2971_v54  ;;  %1725 = vmatpush1.bf16.msra.mxu0 %v2481_v39  ;;  %v2796_v54 = vld [vmem:[%s2897_s3 + $0x38] sm:$0xff] }
 0x132   : > { %893 = vmatprep.mubr.f32.mxu0 %v2696_v11  ;;  %1727 = vmatprep.subr.bf16.mxu0 %v2485_v20 }
 0x133   : > { %894 = vmatmul.mubr.f32.gmra.mrb[42].mxu0 %v2693_v31 }
 0x134   : > { %v2703_v16 = vpop.f32.mrb[8].mxu1  ;;  %1758 = vmatpush1.bf16.msra.mxu1 %v2973_v37 }
 0x135   : > { %v2706_v47 = vpop.f32.mrb[9].mxu1  ;;  %1743 = vmatprep.subr.bf16.mxu1 %v2974_v4  ;;  %1729 = vmatpush1.bf16.msra.mxu0 %v2501_v24 }
 0x136   : > { %899 = vmatprep.mubr.f32.mxu0 %v2706_v47  ;;  %1731 = vmatprep.subr.bf16.mxu0 %v2505_v62 }
 0x137   : > { %900 = vmatmul.mubr.f32.gmra.mrb[44].mxu0 %v2703_v16  ;;  %v2713_v13 = vpop.f32.mrb[12].mxu0 }
 0x138   : > { %v568_v55 = vpop.f32.mrb[10].mxu1  ;;  %1759 = vmatpush1.bf16.msra.mxu1 %v2389_v60  ;;  %v641_v44 = vpop.f32.mrb[13].mxu0 }
 0x139   : > { %v570_v38 = vpop.f32.mrb[11].mxu1  ;;  %1744 = vmatprep.subr.bf16.mxu1 %v2398_v53  ;;  %1733 = vmatpush1.bf16.msra.mxu0 %v2515_v63 }
 0x13a   : > { %905 = vmatprep.mubr.f32.mxu0 %v570_v38 }
 0x13b   : > { %906 = vmatmul.mubr.f32.gmra.mrb[46].mxu0 %v568_v55  ;;  %v645_v58 = vpop.f32.mrb[14].mxu0 }
 0x13c   : > { %1760 = vmatpush1.bf16.msra.mxu1 %v2977_v48  ;;  %911 = vmatprep.mubr.f32.mxu0 %v641_v44  ;;  %v647_v2 = vpop.f32.mrb[15].mxu0 }
 0x13d   : > { %1745 = vmatprep.subr.bf16.mxu1 %v2978_v56 }
 0x13f   : > { %912 = vmatmul.mubr.f32.gmra.mrb[48].mxu0 %v2713_v13  ;;  %v651_v61 = vpop.f32.mrb[16].mxu0 }
 0x140   : > { %1761 = vmatpush1.bf16.msra.mxu1 %v2980_v17  ;;  %915 = vmatprep.mubr.f32.mxu0 %v647_v2  ;;  %v653_v60 = vpop.f32.mrb[17].mxu0 }
 0x141   : > { %1746 = vmatprep.subr.bf16.mxu1 %v2981_v41 }
 0x143   : > { %916 = vmatmul.mubr.f32.gmra.mrb[50].mxu0 %v645_v58  ;;  %v657_v53 = vpop.f32.mrb[18].mxu0 }
 0x144   : > { %1762 = vmatpush1.bf16.msra.mxu1 %v2982_v30  ;;  %919 = vmatprep.mubr.f32.mxu0 %v653_v60  ;;  %v659_v9 = vpop.f32.mrb[19].mxu0  ;;  %v2815_v30 = vld [vmem:[%s2897_s3 + $0x50] sm:$0xff] }
 0x145   : > { %1747 = vmatprep.subr.bf16.mxu1 %v2983_v50 }
 0x147   : > { %920 = vmatmul.mubr.f32.gmra.mrb[52].mxu0 %v651_v61  ;;  %v663_v14 = vpop.f32.mrb[20].mxu0 }
 0x148   : > { %1763 = vmatpush1.bf16.msra.mxu1 %v2481_v39  ;;  %923 = vmatprep.mubr.f32.mxu0 %v659_v9  ;;  %v665_v15 = vpop.f32.mrb[21].mxu0  ;;  %v2755_v39 = vld [vmem:[%s2897_s3] sm:$0xff] }
 0x149   : > { %1748 = vmatprep.subr.bf16.mxu1 %v2485_v20  ;;  %v2760_v20 = vld [vmem:[%s2897_s3 + $0x8] sm:$0xff] }
 0x14b   : > { %924 = vmatmul.mubr.f32.gmra.mrb[54].mxu0 %v657_v53  ;;  %v669_v27 = vpop.f32.mrb[22].mxu0 }
 0x14c   : > { %1764 = vmatpush1.bf16.msra.mxu1 %v2501_v24  ;;  %927 = vmatprep.mubr.f32.mxu0 %v665_v15  ;;  %v671_v29 = vpop.f32.mrb[23].mxu0 }
 0x14d   : > { %1749 = vmatprep.subr.bf16.mxu1 %v2505_v62 }
 0x14f   : > { %928 = vmatmul.mubr.f32.gmra.mrb[56].mxu0 %v663_v14 }
 0x150   : > { %1765 = vmatpush1.bf16.msra.mxu1 %v2515_v63  ;;  %931 = vmatprep.mubr.f32.mxu0 %v671_v29 }
 0x153   : > { %932 = vmatmul.mubr.f32.gmra.mrb[58].mxu0 %v669_v27  ;;  %1007 = vmatmul.mubr.f32.vlgmr.msra.gmra.mrb[24].mxu1 %v2574_v8 }
 0x154   : > { %1000 = vmatprep.mubr.f32.mxu0 %v2570_v7  ;;  %1012 = vmatprep.mubr.f32.mxu1 %v2589_v22  ;;  %v2767_v7 = vld [vmem:[%s2897_s3 + $0x10] sm:$0xff] }
 0x157   : > { %1001 = vmatmul.mubr.f32.vlgmr.msra.gmra.mrb[60].mxu0 %v2568_v3  ;;  %1013 = vmatmul.mubr.f32.gmra.mrb[26].mxu1 %v2586_v21  ;;  %v2772_v21 = vld [vmem:[%s2897_s3 + $0x18] sm:$0xff] }
 0x158   : > { %1018 = vmatprep.mubr.f32.mxu1 %v2599_v28 }
 0x15b   : > { %1019 = vmatmul.mubr.f32.gmra.mrb[28].mxu1 %v2594_v26 }
 0x15c   : > { %1024 = vmatprep.mubr.f32.mxu1 %v2609_v33 }
 0x15f   : > { %1025 = vmatmul.mubr.f32.gmra.mrb[30].mxu1 %v2606_v32 }
 0x160   : > { %1030 = vmatprep.mubr.f32.mxu1 %v2619_v40  ;;  %v2784_v40 = vld [vmem:[%s2897_s3 + $0x28] sm:$0xff] }
 0x163   : > { %1031 = vmatmul.mubr.f32.gmra.mrb[32].mxu1 %v2614_v34 }
 0x164   : > { %1036 = vmatprep.mubr.f32.mxu1 %v2664_v51 }
 0x167   : > { %1037 = vmatmul.mubr.f32.gmra.mrb[34].mxu1 %v2660_v49  ;;  %v2803_v49 = vld [vmem:[%s2897_s3 + $0x40] sm:$0xff] }
 0x168   : > { %1042 = vmatprep.mubr.f32.mxu1 %v2676_v12 }
 0x16b   : > { %1043 = vmatmul.mubr.f32.gmra.mrb[36].mxu1 %v2672_v6 }
 0x16c   : > { %1048 = vmatprep.mubr.f32.mxu1 %v2686_v59 }
 0x16f   : > { %1049 = vmatmul.mubr.f32.gmra.mrb[38].mxu1 %v2683_v46 }
 0x170   : > { %1054 = vmatprep.mubr.f32.mxu1 %v2696_v11  ;;  %v2820_v11 = vld [vmem:[%s2897_s3 + $0x58] sm:$0xff] }
 0x173   : > { %1055 = vmatmul.mubr.f32.gmra.mrb[40].mxu1 %v2693_v31 }
 0x174   : > { %1060 = vmatprep.mubr.f32.mxu1 %v2706_v47 }
 0x177   : > { %1061 = vmatmul.mubr.f32.gmra.mrb[42].mxu1 %v2703_v16 }
 0x178   : > { %1066 = vmatprep.mubr.f32.mxu1 %v570_v38 }
 0x17b   : > { %1067 = vmatmul.mubr.f32.gmra.mrb[44].mxu1 %v568_v55 }
 0x17c   : > { %1072 = vmatprep.mubr.f32.mxu1 %v641_v44 }
 0x17f   : > { %1073 = vmatmul.mubr.f32.gmra.mrb[46].mxu1 %v2713_v13 }
 0x180   : > { %1078 = vmatprep.mubr.f32.mxu1 %v647_v2 }
 0x183   : > { %1079 = vmatmul.mubr.f32.gmra.mrb[48].mxu1 %v645_v58 }
 0x184   : > { %1084 = vmatprep.mubr.f32.mxu1 %v653_v60 }
 0x187   : > { %1085 = vmatmul.mubr.f32.gmra.mrb[50].mxu1 %v651_v61 }
 0x188   : > { %1090 = vmatprep.mubr.f32.mxu1 %v659_v9 }
 0x18b   : > { %1091 = vmatmul.mubr.f32.gmra.mrb[52].mxu1 %v657_v53 }
 0x18c   : > { %1096 = vmatprep.mubr.f32.mxu1 %v665_v15 }
 0x18f   : > { %1097 = vmatmul.mubr.f32.gmra.mrb[54].mxu1 %v663_v14 }
 0x190   : > { %1102 = vmatprep.mubr.f32.mxu1 %v671_v29 }
 0x193   : > { %1103 = vmatmul.mubr.f32.gmra.mrb[56].mxu1 %v669_v27 }
 0x1cd   : > { %v841_v24 = vpop.f32.mrb[24].mxu0 }
 0x1ce   : > { %v1153_v62 = vmul.f32 %v841_v24, %v2755_v39  ;;  %v843_v63 = vpop.f32.mrb[25].mxu0 }
 0x1cf   : > { %v1154_v3 = vmul.f32 %v843_v63, %v2760_v20 }
 0x1d0   : > { %v1165_v8 = vmul.f32 %v1153_v62, %v841_v24 }
 0x1d1   : > { %v1166_v22 = vmul.f32 %v1154_v3, %v843_v63  ;;  %v847_v26 = vpop.f32.mrb[26].mxu0 }
 0x1d2   : > { %v1155_v28 = vmul.f32 %v847_v26, %v2767_v7  ;;  %v849_v32 = vpop.f32.mrb[27].mxu0 }
 0x1d3   : > { %v1177_v33 = vadd.f32 %v1166_v22, %v1165_v8  ;;  %v1156_v34 = vmul.f32 %v849_v32, %v2772_v21 }
 0x1d4   : > { %v1167_v36 = vmul.f32 %v1155_v28, %v847_v26 }
 0x1d5   : > { %v1168_v42 = vmul.f32 %v1156_v34, %v849_v32  ;;  %v853_v43 = vpop.f32.mrb[28].mxu0 }
 0x1d6   : > { %v1178_v45 = vadd.f32 %v1177_v33, %v1167_v36  ;;  %v1157_v52 = vmul.f32 %v853_v43, %v2779_v35  ;;  %v855_v57 = vpop.f32.mrb[29].mxu0 }
 0x1d7   : > { %v1158_v1 = vmul.f32 %v855_v57, %v2784_v40 }
 0x1d8   : > { %v1179_v18 = vadd.f32 %v1178_v45, %v1168_v42  ;;  %v1169_v23 = vmul.f32 %v1157_v52, %v853_v43 }
 0x1d9   : > { %v1170_v0 = vmul.f32 %v1158_v1, %v855_v57  ;;  %v859_v37 = vpop.f32.mrb[30].mxu0 }
 0x1da   : > { %v1180_v4 = vadd.f32 %v1179_v18, %v1169_v23  ;;  %v1159_v19 = vmul.f32 %v859_v37, %v2791_v10  ;;  %v861_v25 = vpop.f32.mrb[31].mxu0 }
 0x1db   : > { %v1160_v48 = vmul.f32 %v861_v25, %v2796_v54 }
 0x1dc   : > { %v1181_v51 = vadd.f32 %v1180_v4, %v1170_v0  ;;  %v1171_v56 = vmul.f32 %v1159_v19, %v859_v37 }
 0x1dd   : > { %v1172_v6 = vmul.f32 %v1160_v48, %v861_v25  ;;  %v865_v12 = vpop.f32.mrb[32].mxu0 }
 0x1de   : > { %v1182_v17 = vadd.f32 %v1181_v51, %v1171_v56  ;;  %v1161_v41 = vmul.f32 %v865_v12, %v2803_v49  ;;  %v867_v46 = vpop.f32.mrb[33].mxu0 }
 0x1df   : > { %v1162_v59 = vmul.f32 %v867_v46, %v2808_v5 }
 0x1e0   : > { %v1183_v50 = vadd.f32 %v1182_v17, %v1172_v6  ;;  %v1173_v31 = vmul.f32 %v1161_v41, %v865_v12 }
 0x1e1   : > { %v1174_v16 = vmul.f32 %v1162_v59, %v867_v46  ;;  %v871_v47 = vpop.f32.mrb[34].mxu0 }
 0x1e2   : > { %v1184_v13 = vadd.f32 %v1183_v50, %v1173_v31  ;;  %v1163_v55 = vmul.f32 %v871_v47, %v2815_v30  ;;  %v873_v44 = vpop.f32.mrb[35].mxu0 }
 0x1e3   : > { %v1164_v38 = vmul.f32 %v873_v44, %v2820_v11 }
 0x1e4   : > { %v1185_v58 = vadd.f32 %v1184_v13, %v1174_v16  ;;  %v1175_v2 = vmul.f32 %v1163_v55, %v871_v47 }
 0x1e5   : > { %v1176_v61 = vmul.f32 %v1164_v38, %v873_v44 }
 0x1e6   : > { %v740_v60 = vpop.f32.mrb[12].mxu1  ;;  %v1186_v53 = vadd.f32 %v1185_v58, %v1175_v2 }
 0x1e7   : > { %v1109_v9 = vmul.f32 %v740_v60, %v2755_v39  ;;  %v742_v14 = vpop.f32.mrb[13].mxu1 }
 0x1e8   : > { %v1110_v15 = vmul.f32 %v742_v14, %v2760_v20  ;;  %v1187_v27 = vadd.f32 %v1186_v53, %v1176_v61 }
 0x1e9   : > { %v1121_v29 = vmul.f32 %v1109_v9, %v740_v60 }
 0x1ea   : > { %v1122_v24 = vmul.f32 %v1110_v15, %v742_v14  ;;  %v746_v62 = vpop.f32.mrb[14].mxu1  ;;  %1188 = vadd.xlane.f32.xlu0 %v1187_v27 }
 0x1eb   : > { %v1111_v63 = vmul.f32 %v746_v62, %v2767_v7  ;;  %v748_v3 = vpop.f32.mrb[15].mxu1 }
 0x1ec   : > { %v1133_v8 = vadd.f32 %v1122_v24, %v1121_v29  ;;  %v1112_v22 = vmul.f32 %v748_v3, %v2772_v21 }
 0x1ed   : > { %v1123_v26 = vmul.f32 %v1111_v63, %v746_v62 }
 0x1ee   : > { %v1124_v28 = vmul.f32 %v1112_v22, %v748_v3  ;;  %v752_v32 = vpop.f32.mrb[16].mxu1 }
 0x1ef   : > { %v1134_v33 = vadd.f32 %v1133_v8, %v1123_v26  ;;  %v1113_v34 = vmul.f32 %v752_v32, %v2779_v35  ;;  %v754_v36 = vpop.f32.mrb[17].mxu1 }
 0x1f0   : > { %v1114_v42 = vmul.f32 %v754_v36, %v2784_v40 }
 0x1f1   : > { %v1135_v43 = vadd.f32 %v1134_v33, %v1124_v28  ;;  %v1125_v45 = vmul.f32 %v1113_v34, %v752_v32 }
 0x1f2   : > { %v1126_v52 = vmul.f32 %v1114_v42, %v754_v36  ;;  %v758_v57 = vpop.f32.mrb[18].mxu1 }
 0x1f3   : > { %v1136_v1 = vadd.f32 %v1135_v43, %v1125_v45  ;;  %v1115_v18 = vmul.f32 %v758_v57, %v2791_v10  ;;  %v760_v23 = vpop.f32.mrb[19].mxu1 }
 0x1f4   : > { %v1116_v0 = vmul.f32 %v760_v23, %v2796_v54 }
 0x1f5   : > { %v1137_v37 = vadd.f32 %v1136_v1, %v1126_v52  ;;  %v1127_v4 = vmul.f32 %v1115_v18, %v758_v57 }
 0x1f6   : > { %v1128_v19 = vmul.f32 %v1116_v0, %v760_v23  ;;  %v764_v25 = vpop.f32.mrb[20].mxu1 }
 0x1f7   : > { %v1138_v48 = vadd.f32 %v1137_v37, %v1127_v4  ;;  %v1117_v51 = vmul.f32 %v764_v25, %v2803_v49  ;;  %v766_v56 = vpop.f32.mrb[21].mxu1 }
 0x1f8   : > { %v1118_v6 = vmul.f32 %v766_v56, %v2808_v5 }
 0x1f9   : > { %v1139_v12 = vadd.f32 %v1138_v48, %v1128_v19  ;;  %v1129_v17 = vmul.f32 %v1117_v51, %v764_v25 }
 0x1fa   : > { %v1130_v41 = vmul.f32 %v1118_v6, %v766_v56  ;;  %v770_v46 = vpop.f32.mrb[22].mxu1  ;;  %v877_v59 = vpop.f32.mrb[36].mxu0 }
 0x1fb   : > { %v1140_v50 = vadd.f32 %v1139_v12, %v1129_v17  ;;  %v1119_v31 = vmul.f32 %v770_v46, %v2815_v30  ;;  %v772_v16 = vpop.f32.mrb[23].mxu1  ;;  %v1246_v47 = vmul.f32 %v877_v59, %v2755_v39  ;;  %v879_v13 = vpop.f32.mrb[37].mxu0 }
 0x1fc   : > { %v1120_v55 = vmul.f32 %v772_v16, %v2820_v11  ;;  %v1247_v44 = vmul.f32 %v879_v13, %v2760_v20 }
 0x1fd   : > { %v1141_v38 = vadd.f32 %v1140_v50, %v1130_v41  ;;  %v1131_v58 = vmul.f32 %v1119_v31, %v770_v46  ;;  %v1258_v2 = vmul.f32 %v1246_v47, %v877_v59 }
 0x1fe   : > { %v1132_v61 = vmul.f32 %v1120_v55, %v772_v16  ;;  %v1259_v60 = vmul.f32 %v1247_v44, %v879_v13  ;;  %v883_v53 = vpop.f32.mrb[38].mxu0 }
 0x1ff   : > { %v1142_v9 = vadd.f32 %v1141_v38, %v1131_v58  ;;  %v1248_v14 = vmul.f32 %v883_v53, %v2767_v7  ;;  %v885_v15 = vpop.f32.mrb[39].mxu0 }
 0x200   : > { %v1270_v27 = vadd.f32 %v1259_v60, %v1258_v2  ;;  %v1249_v29 = vmul.f32 %v885_v15, %v2772_v21 }
 0x201   : > { %v1143_v24 = vadd.f32 %v1142_v9, %v1132_v61  ;;  %v1260_v62 = vmul.f32 %v1248_v14, %v883_v53 }
 0x202   : > { %v1261_v63 = vmul.f32 %v1249_v29, %v885_v15  ;;  %v889_v3 = vpop.f32.mrb[40].mxu0 }
 0x203   : > { %1144 = vadd.xlane.f32.xlu0 %v1143_v24  ;;  %v1271_v8 = vadd.f32 %v1270_v27, %v1260_v62  ;;  %v1250_v22 = vmul.f32 %v889_v3, %v2779_v35  ;;  %v891_v26 = vpop.f32.mrb[41].mxu0 }
 0x204   : > { %v1251_v28 = vmul.f32 %v891_v26, %v2784_v40 }
 0x205   : > { %v1272_v32 = vadd.f32 %v1271_v8, %v1261_v63  ;;  %v1262_v33 = vmul.f32 %v1250_v22, %v889_v3 }
 0x206   : > { %v1263_v34 = vmul.f32 %v1251_v28, %v891_v26  ;;  %v895_v36 = vpop.f32.mrb[42].mxu0 }
 0x207   : > { %v1273_v42 = vadd.f32 %v1272_v32, %v1262_v33  ;;  %v1252_v43 = vmul.f32 %v895_v36, %v2791_v10  ;;  %v897_v45 = vpop.f32.mrb[43].mxu0 }
 0x208   : > { %v1253_v52 = vmul.f32 %v897_v45, %v2796_v54 }
 0x209   : > { %v1274_v57 = vadd.f32 %v1273_v42, %v1263_v34  ;;  %v1264_v1 = vmul.f32 %v1252_v43, %v895_v36 }
 0x20a   : > { %v1265_v18 = vmul.f32 %v1253_v52, %v897_v45  ;;  %v901_v23 = vpop.f32.mrb[44].mxu0 }
 0x20b   : > { %v1275_v0 = vadd.f32 %v1274_v57, %v1264_v1  ;;  %v1254_v37 = vmul.f32 %v901_v23, %v2803_v49  ;;  %v903_v4 = vpop.f32.mrb[45].mxu0 }
 0x20c   : > { %v1255_v19 = vmul.f32 %v903_v4, %v2808_v5 }
 0x20d   : > { %v1276_v25 = vadd.f32 %v1275_v0, %v1265_v18  ;;  %v1266_v48 = vmul.f32 %v1254_v37, %v901_v23 }
 0x20e   : > { %v1267_v51 = vmul.f32 %v1255_v19, %v903_v4  ;;  %v907_v56 = vpop.f32.mrb[46].mxu0 }
 0x20f   : > { %v1277_v6 = vadd.f32 %v1276_v25, %v1266_v48  ;;  %v1256_v12 = vmul.f32 %v907_v56, %v2815_v30  ;;  %v909_v17 = vpop.f32.mrb[47].mxu0 }
 0x210   : > { %v1257_v41 = vmul.f32 %v909_v17, %v2820_v11 }
 0x211   : > { %v1278_v46 = vadd.f32 %v1277_v6, %v1267_v51  ;;  %v1268_v59 = vmul.f32 %v1256_v12, %v907_v56 }
 0x212   : > { %v1269_v50 = vmul.f32 %v1257_v41, %v909_v17  ;;  %v913_v31 = vpop.f32.mrb[48].mxu0 }
 0x213   : > { %v914_v16 = vpop.f32.mrb[49].mxu0  ;;  %v1279_v47 = vadd.f32 %v1278_v46, %v1268_v59 }
 0x215   : > { %v2848_v13 = vadd.f32 %v1279_v47, %v1269_v50 }
 0x216   : > { %v917_v55 = vpop.f32.mrb[50].mxu0 }
 0x217   : > { %v918_v44 = vpop.f32.mrb[51].mxu0 }
 0x21a   : > { %v921_v38 = vpop.f32.mrb[52].mxu0 }
 0x21b   : > { %v922_v58 = vpop.f32.mrb[53].mxu0 }
 0x21e   : > { %v925_v2 = vpop.f32.mrb[54].mxu0 }
 0x21f   : > { %v926_v61 = vpop.f32.mrb[55].mxu0 }
 0x222   : > { %v929_v60 = vpop.f32.mrb[56].mxu0 }
 0x223   : > { %v930_v53 = vpop.f32.mrb[57].mxu0 }
 0x226   : > { %v1008_v9 = vpop.f32.mrb[24].mxu1  ;;  %v933_v14 = vpop.f32.mrb[58].mxu0 }
 0x227   : > { %v1010_v15 = vpop.f32.mrb[25].mxu1  ;;  %v934_v27 = vpop.f32.mrb[59].mxu0  ;;  %v1201_v8 = vmul.f32 %v1008_v9, %v2767_v7 }
 0x228   : > { %v1202_v28 = vmul.f32 %v1010_v15, %v2772_v21 }
 0x229   : > { %v1213_v36 = vmul.f32 %v1201_v8, %v1008_v9 }
 0x22a   : > { %v1002_v29 = vpop.f32.mrb[60].mxu0  ;;  %v1014_v24 = vpop.f32.mrb[26].mxu1  ;;  %v1214_v45 = vmul.f32 %v1202_v28, %v1010_v15 }
 0x22b   : > { %v1199_v62 = vmul.f32 %v1002_v29, %v2755_v39  ;;  %v1004_v63 = vpop.f32.mrb[61].mxu0  ;;  %v1016_v3 = vpop.f32.mrb[27].mxu1  ;;  %v1203_v42 = vmul.f32 %v1014_v24, %v2779_v35 }
 0x22c   : > { %v1200_v22 = vmul.f32 %v1004_v63, %v2760_v20  ;;  %v1204_v57 = vmul.f32 %v1016_v3, %v2784_v40 }
 0x22d   : > { %v1211_v26 = vmul.f32 %v1199_v62, %v1002_v29  ;;  %v1215_v23 = vmul.f32 %v1203_v42, %v1014_v24 }
 0x22e   : > { %v1212_v32 = vmul.f32 %v1200_v22, %v1004_v63  ;;  %v1020_v33 = vpop.f32.mrb[28].mxu1  ;;  %v1216_v4 = vmul.f32 %v1204_v57, %v1016_v3 }
 0x22f   : > { %v1022_v34 = vpop.f32.mrb[29].mxu1  ;;  %v1205_v37 = vmul.f32 %v1020_v33, %v2791_v10 }
 0x230   : > { %v1223_v43 = vadd.f32 %v1212_v32, %v1211_v26  ;;  %v1206_v25 = vmul.f32 %v1022_v34, %v2796_v54 }
 0x231   : > { %v1217_v6 = vmul.f32 %v1205_v37, %v1020_v33 }
 0x232   : > { %v1224_v52 = vadd.f32 %v1223_v43, %v1213_v36  ;;  %v1026_v1 = vpop.f32.mrb[30].mxu1  ;;  %v1218_v41 = vmul.f32 %v1206_v25, %v1022_v34 }
 0x233   : > { %v1028_v18 = vpop.f32.mrb[31].mxu1  ;;  %v1207_v12 = vmul.f32 %v1026_v1, %v2803_v49 }
 0x234   : > { %v1225_v0 = vadd.f32 %v1224_v52, %v1214_v45  ;;  %v1208_v46 = vmul.f32 %v1028_v18, %v2808_v5 }
 0x235   : > { %v1219_v47 = vmul.f32 %v1207_v12, %v1026_v1 }
 0x236   : > { %v1226_v19 = vadd.f32 %v1225_v0, %v1215_v23  ;;  %v1032_v48 = vpop.f32.mrb[32].mxu1  ;;  %v1220_v2 = vmul.f32 %v1208_v46, %v1028_v18 }
 0x237   : > { %v1034_v51 = vpop.f32.mrb[33].mxu1  ;;  %v1209_v55 = vmul.f32 %v1032_v48, %v2815_v30 }
 0x238   : > { %v1227_v56 = vadd.f32 %v1226_v19, %v1216_v4  ;;  %v1210_v61 = vmul.f32 %v1034_v51, %v2820_v11 }
 0x239   : > { %v1221_v27 = vmul.f32 %v1209_v55, %v1032_v48 }
 0x23a   : > { %v1228_v17 = vadd.f32 %v1227_v56, %v1217_v6  ;;  %v1038_v59 = vpop.f32.mrb[34].mxu1  ;;  %v1222_v63 = vmul.f32 %v1210_v61, %v1034_v51 }
 0x23b   : > { %v1290_v50 = vmul.f32 %v1038_v59, %v2755_v39  ;;  %v1040_v31 = vpop.f32.mrb[35].mxu1 }
 0x23c   : > { %v1229_v16 = vadd.f32 %v1228_v17, %v1218_v41  ;;  %v1291_v44 = vmul.f32 %v1040_v31, %v2760_v20 }
 0x23d   : > { %v1302_v38 = vmul.f32 %v1290_v50, %v1038_v59 }
 0x23e   : > { %v1230_v58 = vadd.f32 %v1229_v16, %v1219_v47  ;;  %v1303_v60 = vmul.f32 %v1291_v44, %v1040_v31  ;;  %v1044_v53 = vpop.f32.mrb[36].mxu1 }
 0x23f   : > { %v1292_v9 = vmul.f32 %v1044_v53, %v2767_v7  ;;  %v1046_v14 = vpop.f32.mrb[37].mxu1 }
 0x240   : > { %v1231_v15 = vadd.f32 %v1230_v58, %v1220_v2  ;;  %v1314_v29 = vadd.f32 %v1303_v60, %v1302_v38  ;;  %v1293_v24 = vmul.f32 %v1046_v14, %v2772_v21 }
 0x241   : > { %v1304_v62 = vmul.f32 %v1292_v9, %v1044_v53 }
 0x242   : > { %v1305_v3 = vmul.f32 %v1293_v24, %v1046_v14  ;;  %v1050_v8 = vpop.f32.mrb[38].mxu1  ;;  %v1232_v22 = vadd.f32 %v1231_v15, %v1221_v27 }
 0x243   : > { %v1315_v26 = vadd.f32 %v1314_v29, %v1304_v62  ;;  %v1294_v28 = vmul.f32 %v1050_v8, %v2779_v35  ;;  %v1052_v32 = vpop.f32.mrb[39].mxu1 }
 0x244   : > { %v1295_v33 = vmul.f32 %v1052_v32, %v2784_v40  ;;  %v1233_v34 = vadd.f32 %v1232_v22, %v1222_v63 }
 0x245   : > { %v1316_v36 = vadd.f32 %v1315_v26, %v1305_v3  ;;  %v1306_v42 = vmul.f32 %v1294_v28, %v1050_v8 }
 0x246   : > { %v1307_v43 = vmul.f32 %v1295_v33, %v1052_v32  ;;  %v1056_v45 = vpop.f32.mrb[40].mxu1  ;;  %1234 = vadd.xlane.f32.xlu1 %v1233_v34 }
 0x247   : > { %v1317_v52 = vadd.f32 %v1316_v36, %v1306_v42  ;;  %v1296_v57 = vmul.f32 %v1056_v45, %v2791_v10  ;;  %v1058_v1 = vpop.f32.mrb[41].mxu1 }
 0x248   : > { %v1297_v18 = vmul.f32 %v1058_v1, %v2796_v54 }
 0x249   : > { %v1318_v23 = vadd.f32 %v1317_v52, %v1307_v43  ;;  %v1308_v0 = vmul.f32 %v1296_v57, %v1056_v45 }
 0x24a   : > { %v1309_v37 = vmul.f32 %v1297_v18, %v1058_v1  ;;  %v1062_v4 = vpop.f32.mrb[42].mxu1  ;;  %1281 = vadd.xlane.f32.xlu1 %v2848_v13 }
 0x24b   : > { %v1319_v19 = vadd.f32 %v1318_v23, %v1308_v0  ;;  %v1298_v25 = vmul.f32 %v1062_v4, %v2803_v49  ;;  %v1064_v48 = vpop.f32.mrb[43].mxu1 }
 0x24c   : > { %v1299_v51 = vmul.f32 %v1064_v48, %v2808_v5 }
 0x24d   : > { %v1320_v56 = vadd.f32 %v1319_v19, %v1309_v37  ;;  %v1310_v6 = vmul.f32 %v1298_v25, %v1062_v4 }
 0x24e   : > { %v1311_v12 = vmul.f32 %v1299_v51, %v1064_v48  ;;  %v1068_v17 = vpop.f32.mrb[44].mxu1 }
 0x24f   : > { %v1321_v41 = vadd.f32 %v1320_v56, %v1310_v6  ;;  %v1300_v46 = vmul.f32 %v1068_v17, %v2815_v30  ;;  %v1070_v59 = vpop.f32.mrb[45].mxu1 }
 0x250   : > { %v1301_v50 = vmul.f32 %v1070_v59, %v2820_v11 }
 0x251   : > { %v1322_v31 = vadd.f32 %v1321_v41, %v1311_v12  ;;  %v1312_v16 = vmul.f32 %v1300_v46, %v1068_v17 }
 0x252   : > { %v1313_v47 = vmul.f32 %v1301_v50, %v1070_v59  ;;  %v1074_v13 = vpop.f32.mrb[46].mxu1 }
 0x253   : > { %v1338_v55 = vmul.f32 %v1074_v13, %v2755_v39  ;;  %v1076_v44 = vpop.f32.mrb[47].mxu1  ;;  %v1323_v38 = vadd.f32 %v1322_v31, %v1312_v16 }
 0x254   : > { %v1339_v58 = vmul.f32 %v1076_v44, %v2760_v20 }
 0x255   : > { %v1350_v2 = vmul.f32 %v1338_v55, %v1074_v13  ;;  %v1324_v61 = vadd.f32 %v1323_v38, %v1313_v47 }
 0x256   : > { %v1351_v60 = vmul.f32 %v1339_v58, %v1076_v44  ;;  %v1080_v53 = vpop.f32.mrb[48].mxu1 }
 0x257   : > { %v1340_v9 = vmul.f32 %v1080_v53, %v2767_v7  ;;  %v1082_v14 = vpop.f32.mrb[49].mxu1  ;;  %1325 = vadd.xlane.f32.xlu0 %v1324_v61 }
 0x258   : > { %v1362_v15 = vadd.f32 %v1351_v60, %v1350_v2  ;;  %v1341_v27 = vmul.f32 %v1082_v14, %v2772_v21 }
 0x259   : > { %v1352_v29 = vmul.f32 %v1340_v9, %v1080_v53 }
 0x25a   : > { %v1353_v24 = vmul.f32 %v1341_v27, %v1082_v14  ;;  %v1086_v62 = vpop.f32.mrb[50].mxu1 }
 0x25b   : > { %v1363_v63 = vadd.f32 %v1362_v15, %v1352_v29  ;;  %v1342_v39 = vmul.f32 %v1086_v62, %v2779_v35  ;;  %v1088_v3 = vpop.f32.mrb[51].mxu1 }
 0x25c   : > { %v1343_v20 = vmul.f32 %v1088_v3, %v2784_v40 }
 0x25d   : > { %v1364_v8 = vadd.f32 %v1363_v63, %v1353_v24  ;;  %v1354_v22 = vmul.f32 %v1342_v39, %v1086_v62 }
 0x25e   : > { %v1355_v26 = vmul.f32 %v1343_v20, %v1088_v3  ;;  %v1092_v28 = vpop.f32.mrb[52].mxu1 }
 0x25f   : > { %v1365_v32 = vadd.f32 %v1364_v8, %v1354_v22  ;;  %v1344_v7 = vmul.f32 %v1092_v28, %v2791_v10  ;;  %v1094_v33 = vpop.f32.mrb[53].mxu1 }
 0x260   : > { %v1345_v34 = vmul.f32 %v1094_v33, %v2796_v54 }
 0x261   : > { %v1366_v21 = vadd.f32 %v1365_v32, %v1355_v26  ;;  %v1356_v36 = vmul.f32 %v1344_v7, %v1092_v28 }
 0x262   : > { %v1357_v42 = vmul.f32 %v1345_v34, %v1094_v33  ;;  %v1098_v43 = vpop.f32.mrb[54].mxu1 }
 0x263   : > { %v1367_v45 = vadd.f32 %v1366_v21, %v1356_v36  ;;  %v1346_v35 = vmul.f32 %v1098_v43, %v2803_v49  ;;  %v1100_v52 = vpop.f32.mrb[55].mxu1 }
 0x264   : > { %v1347_v40 = vmul.f32 %v1100_v52, %v2808_v5 }
 0x265   : > { %v1368_v57 = vadd.f32 %v1367_v45, %v1357_v42  ;;  %v1358_v1 = vmul.f32 %v1346_v35, %v1098_v43 }
 0x266   : > { %v1359_v18 = vmul.f32 %v1347_v40, %v1100_v52  ;;  %v1104_v23 = vpop.f32.mrb[56].mxu1 }
 0x267   : > { %v1369_v0 = vadd.f32 %v1368_v57, %v1358_v1  ;;  %v1348_v10 = vmul.f32 %v1104_v23, %v2815_v30  ;;  %v1106_v37 = vpop.f32.mrb[57].mxu1 }
 0x268   : > { %v1349_v54 = vmul.f32 %v1106_v37, %v2820_v11 }
 0x269   : > { %v1370_v4 = vadd.f32 %v1369_v0, %v1359_v18  ;;  %v1360_v19 = vmul.f32 %v1348_v10, %v1104_v23 }
 0x26a   : > { %v1361_v25 = vmul.f32 %v1349_v54, %v1106_v37 }
 0x26b   : > { %v1371_v48 = vadd.f32 %v1370_v4, %v1360_v19 }
 0x26d   : > { %v1372_v51 = vadd.f32 %v1371_v48, %v1361_v25 }
 0x26f   : > { %1373 = vadd.xlane.f32.xlu1 %v1372_v51 }
 0x277   : > { %v1189_v49 = vpop.xlane.xlu0 %1188 }
 0x278   : > { %v1190_v56 = vrot.slane %v1189_v49, 4 }
 0x27a   : > { %v1191_v6 = vadd.f32 %v1190_v56, %v1189_v49 }
 0x27c   : > { %v1192_v5 = vrot.slane %v1191_v6, 2 }
 0x27e   : > { %v1193_v46 = vadd.f32 %v1192_v5, %v1191_v6 }
 0x280   : > { %v1194_v30 = vrot.slane %v1193_v46, 1 }
 0x282   : > { %v1195_v11 = vadd.f32 %v1194_v30, %v1193_v46 }
 0x290   : > { %v1145_v12 = vpop.xlane.xlu0 %1144 }
 0x291   : > { %v1146_v17 = vrot.slane %v1145_v12, 4 }
 0x293   : > { %v1147_v41 = vadd.f32 %v1146_v17, %v1145_v12 }
 0x295   : > { %v1148_v59 = vrot.slane %v1147_v41, 2 }
 0x297   : > { %v1149_v50 = vadd.f32 %v1148_v59, %v1147_v41 }
 0x299   : > { %v1150_v31 = vrot.slane %v1149_v50, 1 }
 0x29b   : > { %v1151_v16 = vadd.f32 %v1150_v31, %v1149_v50 }
 0x29d   : > { %1767 = vpush %v1151_v16 }
 0x29e   : > { %1769 = vpush %v1195_v11 }
 0x2ce   : > { %s1768_s25 = spop %1767 }
 0x2cf   : > { %s1770_s26 = spop %1769 }
 0x2d0   : > { %s1197_s30 = smul.f32 2.0, %s1770_s26 }
 0x2d2   : > { %s1198_s7 = sadd.f32 %s1768_s25, %s1197_s30 }
 0x2d3   : > { %v1235_v47 = vpop.xlane.xlu1 %1234 }
 0x2d4   : > { %v1236_v13 = vrot.slane %v1235_v47, 4 }
 0x2d6   : > { %v1237_v55 = vadd.f32 %v1236_v13, %v1235_v47 }
 0x2d7   : > { %v1282_v44 = vpop.xlane.xlu1 %1281 }
 0x2d8   : > { %v1238_v38 = vrot.slane %v1237_v55, 2  ;;  %v1283_v58 = vrot.slane %v1282_v44, 4 }
 0x2da   : > { %v1284_v2 = vadd.f32 %v1283_v58, %v1282_v44  ;;  %v1239_v61 = vadd.f32 %v1238_v38, %v1237_v55 }
 0x2dc   : > { %v1285_v60 = vrot.slane %v1284_v2, 2  ;;  %v1240_v53 = vrot.slane %v1239_v61, 1 }
 0x2de   : > { %v1241_v9 = vadd.f32 %v1240_v53, %v1239_v61  ;;  %v1286_v14 = vadd.f32 %v1285_v60, %v1284_v2 }
 0x2e0   : > { %1771 = vpush %v1241_v9  ;;  %v1287_v15 = vrot.slane %v1286_v14, 1 }
 0x2e2   : > { %v1288_v27 = vadd.f32 %v1287_v15, %v1286_v14 }
 0x2e4   : > { %v1326_v29 = vpop.xlane.xlu0 %1325  ;;  %1773 = vpush %v1288_v27 }
 0x2e5   : > { %v1327_v24 = vrot.slane %v1326_v29, 4 }
 0x2e7   : > { %v1328_v62 = vadd.f32 %v1327_v24, %v1326_v29 }
 0x2e9   : > { %v1329_v63 = vrot.slane %v1328_v62, 2 }
 0x2eb   : > { %v1330_v39 = vadd.f32 %v1329_v63, %v1328_v62 }
 0x2ed   : > { %v1331_v3 = vrot.slane %v1330_v39, 1 }
 0x2ef   : > { %v1332_v20 = vadd.f32 %v1331_v3, %v1330_v39 }
 0x2f1   : > { %1775 = vpush %v1332_v20 }
 0x2fc   : > { %v1374_v8 = vpop.xlane.xlu1 %1373 }
 0x2fd   : > { %v1375_v22 = vrot.slane %v1374_v8, 4 }
 0x2ff   : > { %v1376_v26 = vadd.f32 %v1375_v22, %v1374_v8 }
 0x301   : > { %v1377_v28 = vrot.slane %v1376_v26, 2 }
 0x303   : > { %v1378_v32 = vadd.f32 %v1377_v28, %v1376_v26 }
 0x305   : > { %v1379_v7 = vrot.slane %v1378_v32, 1 }
 0x307   : > { %v1380_v33 = vadd.f32 %v1379_v7, %v1378_v32 }
 0x309   : > { %1777 = vpush %v1380_v33 }
 0x311   : > { %s1772_s27 = spop %1771 }
 0x312   : > { %s1243_s6 = smul.f32 2.0, %s1772_s27 }
 0x314   : > { %s1244_s9 = sadd.f32 %s1243_s6, %s1198_s7 }
 0x315   : > { %s1774_s28 = spop %1773 }
 0x316   : > { %s1245_s11 = smul.f32 256.0, %s1244_s9 }
 0x322   : > { %s1776_s29 = spop %1775 }
 0x323   : > { %s1334_s5 = smul.f32 2.0, %s1776_s29 }
 0x325   : > { %s1335_s8 = sadd.f32 %s1774_s28, %s1334_s5 }
 0x327   : > { %s1336_s10 = smul.f32 256.0, %s1335_s8 }
 0x329   : > { %s1337_s13 = sadd.f32 %s1336_s10, %s1245_s11 }
 0x33a   : > { %s1778_s12 = spop %1777 }
 0x33b   : > { %s1382_s14 = smul.f32 256.0, %s1778_s12 }
 0x33d   : > { %s1383_s20 = sadd.f32 %s1382_s14, %s1337_s13 }
 0x33f   : > { %v1384_v34 = vstv %s1383_s20 }
 0x340   : > { %1386 = vst.msk [vmem:[%s193_s19] sm:$0x1] %vm1385_vm1, %v1384_v34 }
 0x341 PF: > { %s14_s15 = sadd.s32 1, %s1794_s15  }
 0x342   : > { %p11_p4 = scmp.ge.s32.totalorder %s14_s15, 4  }
 0x344   :  { %13 = sbr.rel (!%p11_p4) target bundleno = 1 (0x1), region = 66 }

</bundles_post_ra>
